<compile_context>
chip_gen: v7x
topology: tpu7x:2x2x1
jax: 0.10.0
libtpu: 0.0.40
codegen_flags: <defaults>
</compile_context>

<pallas_src>
import jax
import jax.numpy as jnp
from jax.experimental import pallas as pl
from jax.experimental.pallas import tpu as pltpu


# ----------------------------------------------------------------------------
# helpers
# ----------------------------------------------------------------------------
def _round_up(n, m):
    return ((n + m - 1) // m) * m


def _device_kind():
    try:
        return jax.devices()[0].device_kind.lower()
    except Exception:
        return ""


def _preferred_row_tile():
    kind = _device_kind()
    if "v5 lite" in kind or "v5lite" in kind or "v5e" in kind:
        return 128          # v5e MXU is 4x(128x128)
    return 256              # v6e / v7x MXU is 256x256


def _vmem_limit_bytes():
    kind = _device_kind()
    if "v5 lite" in kind or "v5lite" in kind or "v5e" in kind:
        return 96 * 1024 * 1024   # 128 MiB physical, default scoped only 16 MiB
    if "v7" in kind:
        return 48 * 1024 * 1024   # 64 MiB physical on v7x -> leave headroom
    return 64 * 1024 * 1024       # v6e (128 MiB physical)


# ----------------------------------------------------------------------------
# kernels
# ----------------------------------------------------------------------------
def _upcast_adj(a_ref):
    # int8 -> f32 -> bf16 (guaranteed lowering path); VPU work hidden under MXU.
    return a_ref[...].astype(jnp.float32).astype(jnp.bfloat16)


def _mlp(agg_f32, w1_ref, b1_ref, w2_ref, b2_ref):
    # GINConv MLP (Linear -> ReLU -> Linear) followed by GIN.forward ReLU.
    z = jnp.dot(agg_f32.astype(jnp.bfloat16), w1_ref[...],
                preferred_element_type=jnp.float32) + b1_ref[...]
    z = jnp.maximum(z, 0.0)
    z = jnp.dot(z.astype(jnp.bfloat16), w2_ref[...],
                preferred_element_type=jnp.float32) + b2_ref[...]
    return jnp.maximum(z, 0.0)


def _gin_layer_kernel(a_ref, x_ref, w1_ref, b1_ref, w2_ref, b2_ref,
                      o_ref, acc_ref):
    """One GINConv layer, K-tiled aggregation: grid = (row_tiles, k_tiles)."""
    k = pl.program_id(1)

    @pl.when(k == 0)
    def _():
        acc_ref[...] = jnp.zeros_like(acc_ref)

    acc_ref[...] += jnp.dot(_upcast_adj(a_ref), x_ref[...],
                            preferred_element_type=jnp.float32)

    @pl.when(k == pl.num_programs(1) - 1)
    def _():
        h = _mlp(acc_ref[...], w1_ref, b1_ref, w2_ref, b2_ref)
        o_ref[...] = h.astype(o_ref.dtype)   # dropout(p=0.1) identity in eval


def _gin_layer_final_kernel(a_ref, x_ref, w1_ref, b1_ref, w2_ref, b2_ref,
                            wl_ref, bl_ref, o_ref, acc_ref):
    """Second GINConv layer + fused final classifier Linear, K-tiled."""
    k = pl.program_id(1)

    @pl.when(k == 0)
    def _():
        acc_ref[...] = jnp.zeros_like(acc_ref)

    acc_ref[...] += jnp.dot(_upcast_adj(a_ref), x_ref[...],
                            preferred_element_type=jnp.float32)

    @pl.when(k == pl.num_programs(1) - 1)
    def _():
        h = _mlp(acc_ref[...], w1_ref, b1_ref, w2_ref, b2_ref)
        out = jnp.dot(h.astype(jnp.bfloat16), wl_ref[...],
                      preferred_element_type=jnp.float32) + bl_ref[...]
        o_ref[...] = out.astype(o_ref.dtype)


def _gin_fused_kernel(a_ref, x_ref, w1a, b1a, w2a, b2a, w1b, b1b, w2b, b2b,
                      wl, bl, o_ref):
    """Whole forward fused for small graphs: A loaded once, both layers +
    classifier in a single pallas_call."""
    a = _upcast_adj(a_ref)
    agg1 = jnp.dot(a, x_ref[...], preferred_element_type=jnp.float32)
    h1 = _mlp(agg1, w1a, b1a, w2a, b2a).astype(jnp.bfloat16)
    agg2 = jnp.dot(a, h1, preferred_element_type=jnp.float32)
    h2 = _mlp(agg2, w1b, b1b, w2b, b2b)
    out = jnp.dot(h2.astype(jnp.bfloat16), wl[...],
                  preferred_element_type=jnp.float32) + bl[...]
    o_ref[...] = out.astype(o_ref.dtype)


# ----------------------------------------------------------------------------
# pallas_call wrappers
# ----------------------------------------------------------------------------
def _fused_call(adj, x, weights, out_cols, vmem_limit):
    NP = adj.shape[0]

    def build(use_buffered):
        def resident(arr):
            kw = {"pipeline_mode": pl.Buffered(1)} if use_buffered else {}
            return pl.BlockSpec(arr.shape, lambda i, nd=arr.ndim: (0,) * nd, **kw)

        return pl.pallas_call(
            _gin_fused_kernel,
            out_shape=jax.ShapeDtypeStruct((NP, out_cols), jnp.float32),
            grid=(1,),
            in_specs=[resident(adj), resident(x)] + [resident(w) for w in weights],
            out_specs=pl.BlockSpec((NP, out_cols), lambda i: (0, 0)),
            compiler_params=pltpu.CompilerParams(
                dimension_semantics=("arbitrary",),
                vmem_limit_bytes=vmem_limit),
        )(adj, x, *weights)

    try:
        return jax.block_until_ready(build(True))
    except Exception:
        # pipeline_mode=pl.Buffered unsupported in this JAX build -> default.
        return build(False)


def _layer_call(kernel, adj, x, weights, out_dtype, out_cols, tm, tk, vmem_limit):
    """One GIN layer: grid = (row tiles, K tiles); agg accumulates in VMEM."""
    NP = adj.shape[0]
    xcols = x.shape[1]

    def build(use_buffered):
        def resident(arr):   # grid-invariant weights/biases
            kw = {"pipeline_mode": pl.Buffered(1)} if use_buffered else {}
            return pl.BlockSpec(arr.shape, lambda i, k, nd=arr.ndim: (0,) * nd, **kw)

        a_kw = {"pipeline_mode": pl.Buffered(3)} if use_buffered else {}
        in_specs = ([pl.BlockSpec((tm, tk), lambda i, k: (i, k), **a_kw),   # A tile
                     pl.BlockSpec((tk, xcols), lambda i, k: (k, 0))]        # x K-slab
                    + [resident(w) for w in weights])

        return pl.pallas_call(
            kernel,
            out_shape=jax.ShapeDtypeStruct((NP, out_cols), out_dtype),
            grid=(NP // tm, NP // tk),
            in_specs=in_specs,
            out_specs=pl.BlockSpec((tm, out_cols), lambda i, k: (i, 0)),
            scratch_shapes=[pltpu.VMEM((tm, xcols), jnp.float32)],
            compiler_params=pltpu.CompilerParams(
                dimension_semantics=("parallel", "arbitrary"),
                vmem_limit_bytes=vmem_limit),
        )(adj, x, *weights)

    try:
        return jax.block_until_ready(build(True))
    except Exception:
        return build(False)


# ----------------------------------------------------------------------------
# forward
# ----------------------------------------------------------------------------
def gin_forward(x, edge_index, params, *, fused_max_nodes=1024):
    """x: (N, in_channels) float32, edge_index: (2, E) int32 (row0=src, row1=dst)."""
    N, in_ch = x.shape
    hid = params["w1a"].shape[1]
    out_ch = params["wl"].shape[1]

    LANE = 128
    in_p = _round_up(in_ch, LANE)
    hid_p = _round_up(hid, LANE)
    out_p = _round_up(out_ch, LANE)

    vmem_limit = _vmem_limit_bytes()

    fuse = N <= fused_max_nodes
    if fuse:
        NP = _round_up(max(N, LANE), LANE)     # lane-dense even for tiny N
        TM = TK = NP
    else:
        tm_pref = _preferred_row_tile()
        TM = tm_pref if _round_up(N, LANE) >= tm_pref else LANE
        TK_MAX = 512                            # multiple of both 128 and 256
        if _round_up(N, TM) <= TK_MAX:
            NP = _round_up(N, TM)
            TK = NP
        else:
            TK = TK_MAX
            NP = _round_up(N, TK)

    # Dense adjacency with the eps=0 self term folded in, built directly as
    # small integers and stored int8 in HBM (half the bytes of bf16).
    # Padded node columns are zero, so real rows never see padding garbage.
    # TODO(synk): for sparse graphs (E << N^2) replace the O(N^2)
    # densification with a CSR scalar-prefetch gather path.
    src, dst = edge_index[0], edge_index[1]
    adj = jnp.zeros((NP, NP), jnp.int32)
    adj = adj.at[dst, src].add(1)
    diag = jnp.arange(N)
    adj = adj.at[diag, diag].add(1)
    adj = adj.astype(jnp.int8)                  # edge multiplicity must stay <= 127

    def pad2(a, rows, cols, dtype):
        out = jnp.zeros((rows, cols), dtype)
        return out.at[: a.shape[0], : a.shape[1]].set(a.astype(dtype))

    xp = pad2(x, NP, in_p, jnp.bfloat16)

    w1a = pad2(params["w1a"], in_p, hid_p, jnp.bfloat16)
    b1a = pad2(params["b1a"], 1, hid_p, jnp.float32)
    w2a = pad2(params["w2a"], hid_p, hid_p, jnp.bfloat16)
    b2a = pad2(params["b2a"], 1, hid_p, jnp.float32)
    w1b = pad2(params["w1b"], hid_p, hid_p, jnp.bfloat16)
    b1b = pad2(params["b1b"], 1, hid_p, jnp.float32)
    w2b = pad2(params["w2b"], hid_p, hid_p, jnp.bfloat16)
    b2b = pad2(params["b2b"], 1, hid_p, jnp.float32)
    wl = pad2(params["wl"], hid_p, out_p, jnp.bfloat16)
    bl = pad2(params["bl"], 1, out_p, jnp.float32)

    if fuse:
        out = _fused_call(adj, xp,
                          (w1a, b1a, w2a, b2a, w1b, b1b, w2b, b2b, wl, bl),
                          out_p, vmem_limit)
    else:
        h = _layer_call(_gin_layer_kernel, adj, xp, (w1a, b1a, w2a, b2a),
                        jnp.bfloat16, hid_p, TM, TK, vmem_limit)
        out = _layer_call(_gin_layer_final_kernel, adj, h,
                          (w1b, b1b, w2b, b2b, wl, bl),
                          jnp.float32, out_p, TM, TK, vmem_limit)
    return out[:N, :out_ch]


# ----------------------------------------------------------------------------
# params + pure-JAX reference
# ----------------------------------------------------------------------------
def init_params(key, in_channels, hidden_channels, out_channels):
    """Linear weights stored transposed (in, out) so kernels compute x @ W + b
    (matches PyTorch y = x @ W.T + b)."""
    ks = jax.random.split(key, 10)

    def lin(kw, kb, fan_in, fan_out):
        bound = 1.0 / jnp.sqrt(float(fan_in))
        w = jax.random.uniform(kw, (fan_in, fan_out), jnp.float32, -bound, bound)
        b = jax.random.uniform(kb, (1, fan_out), jnp.float32, -bound, bound)
        return w, b

    w1a, b1a = lin(ks[0], ks[1], in_channels, hidden_channels)
    w2a, b2a = lin(ks[2], ks[3], hidden_channels, hidden_channels)
    w1b, b1b = lin(ks[4], ks[5], hidden_channels, hidden_channels)
    w2b, b2b = lin(ks[6], ks[7], hidden_channels, hidden_channels)
    wl, bl = lin(ks[8], ks[9], hidden_channels, out_channels)
    return dict(w1a=w1a, b1a=b1a, w2a=w2a, b2a=b2a,
                w1b=w1b, b1b=b1b, w2b=w2b, b2b=b2b, wl=wl, bl=bl)


def gin_reference(x, edge_index, params):
    """Pure-JAX f32 reference of the PyTorch forward (eval mode)."""
    N = x.shape[0]
    adj = jnp.zeros((N, N), jnp.float32)
    adj = adj.at[edge_index[1], edge_index[0]].add(1.0)
    adj = adj + jnp.eye(N, dtype=jnp.float32)

    def conv(h, w1, b1, w2, b2):
        agg = adj @ h
        z = jnp.maximum(agg @ w1 + b1, 0.0)
        z = z @ w2 + b2
        return jnp.maximum(z, 0.0)

    h = conv(x, params["w1a"], params["b1a"], params["w2a"], params["b2a"])
    h = conv(h, params["w1b"], params["b1b"], params["w2b"], params["b2b"])
    return h @ params["wl"] + params["bl"]


# ----------------------------------------------------------------------------
# test
# ----------------------------------------------------------------------------
if __name__ == "__main__":
    IN_CH, HID, OUT_CH = 8, 32, 4
    key = jax.random.PRNGKey(0)
    k_p, k1, k2, k3, k4 = jax.random.split(key, 5)
    params = init_params(k_p, IN_CH, HID, OUT_CH)

    def check(n_nodes, n_edges, kx, ke, **kwargs):
        x = jax.random.normal(kx, (n_nodes, IN_CH), jnp.float32)
        edge_index = jax.random.randint(ke, (2, n_edges), 0, n_nodes, dtype=jnp.int32)
        out = gin_forward(x, edge_index, params, **kwargs)
        jax.block_until_ready(out)
        assert out.shape == (n_nodes, OUT_CH) and out.dtype == jnp.float32
        ref = gin_reference(x, edge_index, params)
        err = float(jnp.max(jnp.abs(out - ref)) / (jnp.max(jnp.abs(ref)) + 1e-6))
        assert err < 0.08, f"normalized max error too large: {err:.4f}"

    # Small graph -> single fused pallas_call (A read once from HBM).
    check(16, 48, k1, k2)
    # Same graph forced through the row/K-tiled two-call path (grid 1x1).
    check(16, 48, k1, k2, fused_max_nodes=0)
    # Larger graph exercising multi-step K-accumulation in the tiled path.
    check(700, 2048, k3, k4, fused_max_nodes=0)

    print("KERNEL_OK")
</pallas_src>

<mosaic_0001>
module attributes {stable_mosaic.version = 11 : i64} {
  func.func @_gin_fused_kernel(%arg0: i32, %arg1: memref<128x128xi8, #tpu.memory_space<vmem>>, %arg2: memref<128x128xbf16, #tpu.memory_space<vmem>>, %arg3: memref<128x128xbf16, #tpu.memory_space<vmem>>, %arg4: memref<1x128xf32, #tpu.memory_space<vmem>>, %arg5: memref<128x128xbf16, #tpu.memory_space<vmem>>, %arg6: memref<1x128xf32, #tpu.memory_space<vmem>>, %arg7: memref<128x128xbf16, #tpu.memory_space<vmem>>, %arg8: memref<1x128xf32, #tpu.memory_space<vmem>>, %arg9: memref<128x128xbf16, #tpu.memory_space<vmem>>, %arg10: memref<1x128xf32, #tpu.memory_space<vmem>>, %arg11: memref<128x128xbf16, #tpu.memory_space<vmem>>, %arg12: memref<1x128xf32, #tpu.memory_space<vmem>>, %arg13: memref<128x128xf32, #tpu.memory_space<vmem>>) attributes {dimension_semantics = [#tpu.dimension_semantics<arbitrary>], iteration_bounds = array<i64: 1>, scalar_prefetch = 0 : i64, scratch_operands = 0 : i64, tpu.core_type = #tpu.core_type<tc>, window_params = [{pipeline_mode = #tpu.pipeline_mode<synchronous>, transform_indices = @transform_0, window_bounds = array<i64: 128, 128>}, {pipeline_mode = #tpu.pipeline_mode<synchronous>, transform_indices = @transform_1, window_bounds = array<i64: 128, 128>}, {pipeline_mode = #tpu.pipeline_mode<synchronous>, transform_indices = @transform_2, window_bounds = array<i64: 128, 128>}, {pipeline_mode = #tpu.pipeline_mode<synchronous>, transform_indices = @transform_3, window_bounds = array<i64: 1, 128>}, {pipeline_mode = #tpu.pipeline_mode<synchronous>, transform_indices = @transform_4, window_bounds = array<i64: 128, 128>}, {pipeline_mode = #tpu.pipeline_mode<synchronous>, transform_indices = @transform_5, window_bounds = array<i64: 1, 128>}, {pipeline_mode = #tpu.pipeline_mode<synchronous>, transform_indices = @transform_6, window_bounds = array<i64: 128, 128>}, {pipeline_mode = #tpu.pipeline_mode<synchronous>, transform_indices = @transform_7, window_bounds = array<i64: 1, 128>}, {pipeline_mode = #tpu.pipeline_mode<synchronous>, transform_indices = @transform_8, window_bounds = array<i64: 128, 128>}, {pipeline_mode = #tpu.pipeline_mode<synchronous>, transform_indices = @transform_9, window_bounds = array<i64: 1, 128>}, {pipeline_mode = #tpu.pipeline_mode<synchronous>, transform_indices = @transform_10, window_bounds = array<i64: 128, 128>}, {pipeline_mode = #tpu.pipeline_mode<synchronous>, transform_indices = @transform_11, window_bounds = array<i64: 1, 128>}, {pipeline_mode = #tpu.pipeline_mode<synchronous>, transform_indices = @transform_12, window_bounds = array<i64: 128, 128>}]} {
    %c0 = arith.constant 0 : index
    %c0_0 = arith.constant 0 : index
    %0 = vector.load %arg1[%c0, %c0_0] : memref<128x128xi8, #tpu.memory_space<vmem>>, vector<128x128xi8>
    %1 = arith.sitofp %0 : vector<128x128xi8> to vector<128x128xf32>
    %2 = arith.truncf %1 : vector<128x128xf32> to vector<128x128xbf16>
    %c0_1 = arith.constant 0 : index
    %c0_2 = arith.constant 0 : index
    %3 = vector.load %arg2[%c0_1, %c0_2] : memref<128x128xbf16, #tpu.memory_space<vmem>>, vector<128x128xbf16>
    %cst = arith.constant dense<0.000000e+00> : vector<128x128xf32>
    %4 = tpu.matmul %2, %3, %cst {dimension_numbers = #tpu.dot_dimension_numbers<[1], [0], [0], [1], [0, 0, 1, 1], [], []>} : vector<128x128xbf16>, vector<128x128xbf16>, vector<128x128xf32> -> vector<128x128xf32>
    %5 = arith.truncf %4 : vector<128x128xf32> to vector<128x128xbf16>
    %c0_3 = arith.constant 0 : index
    %c0_4 = arith.constant 0 : index
    %6 = vector.load %arg3[%c0_3, %c0_4] : memref<128x128xbf16, #tpu.memory_space<vmem>>, vector<128x128xbf16>
    %cst_5 = arith.constant dense<0.000000e+00> : vector<128x128xf32>
    %7 = tpu.matmul %5, %6, %cst_5 {dimension_numbers = #tpu.dot_dimension_numbers<[1], [0], [0], [1], [0, 0, 1, 1], [], []>} : vector<128x128xbf16>, vector<128x128xbf16>, vector<128x128xf32> -> vector<128x128xf32>
    %c0_6 = arith.constant 0 : index
    %c0_7 = arith.constant 0 : index
    %8 = vector.load %arg4[%c0_6, %c0_7] : memref<1x128xf32, #tpu.memory_space<vmem>>, vector<1x128xf32>
    %9 = vector.broadcast %8 : vector<1x128xf32> to vector<128x128xf32>
    %10 = arith.addf %7, %9 : vector<128x128xf32>
    %cst_8 = arith.constant 0.000000e+00 : f32
    %11 = vector.broadcast %cst_8 : f32 to vector<128x128xf32>
    %12 = arith.maximumf %10, %11 : vector<128x128xf32>
    %13 = arith.truncf %12 : vector<128x128xf32> to vector<128x128xbf16>
    %c0_9 = arith.constant 0 : index
    %c0_10 = arith.constant 0 : index
    %14 = vector.load %arg5[%c0_9, %c0_10] : memref<128x128xbf16, #tpu.memory_space<vmem>>, vector<128x128xbf16>
    %cst_11 = arith.constant dense<0.000000e+00> : vector<128x128xf32>
    %15 = tpu.matmul %13, %14, %cst_11 {dimension_numbers = #tpu.dot_dimension_numbers<[1], [0], [0], [1], [0, 0, 1, 1], [], []>} : vector<128x128xbf16>, vector<128x128xbf16>, vector<128x128xf32> -> vector<128x128xf32>
    %c0_12 = arith.constant 0 : index
    %c0_13 = arith.constant 0 : index
    %16 = vector.load %arg6[%c0_12, %c0_13] : memref<1x128xf32, #tpu.memory_space<vmem>>, vector<1x128xf32>
    %17 = vector.broadcast %16 : vector<1x128xf32> to vector<128x128xf32>
    %18 = arith.addf %15, %17 : vector<128x128xf32>
    %cst_14 = arith.constant 0.000000e+00 : f32
    %19 = vector.broadcast %cst_14 : f32 to vector<128x128xf32>
    %20 = arith.maximumf %18, %19 : vector<128x128xf32>
    %21 = arith.truncf %20 : vector<128x128xf32> to vector<128x128xbf16>
    %cst_15 = arith.constant dense<0.000000e+00> : vector<128x128xf32>
    %22 = tpu.matmul %2, %21, %cst_15 {dimension_numbers = #tpu.dot_dimension_numbers<[1], [0], [0], [1], [0, 0, 1, 1], [], []>} : vector<128x128xbf16>, vector<128x128xbf16>, vector<128x128xf32> -> vector<128x128xf32>
    %23 = arith.truncf %22 : vector<128x128xf32> to vector<128x128xbf16>
    %c0_16 = arith.constant 0 : index
    %c0_17 = arith.constant 0 : index
    %24 = vector.load %arg7[%c0_16, %c0_17] : memref<128x128xbf16, #tpu.memory_space<vmem>>, vector<128x128xbf16>
    %cst_18 = arith.constant dense<0.000000e+00> : vector<128x128xf32>
    %25 = tpu.matmul %23, %24, %cst_18 {dimension_numbers = #tpu.dot_dimension_numbers<[1], [0], [0], [1], [0, 0, 1, 1], [], []>} : vector<128x128xbf16>, vector<128x128xbf16>, vector<128x128xf32> -> vector<128x128xf32>
    %c0_19 = arith.constant 0 : index
    %c0_20 = arith.constant 0 : index
    %26 = vector.load %arg8[%c0_19, %c0_20] : memref<1x128xf32, #tpu.memory_space<vmem>>, vector<1x128xf32>
    %27 = vector.broadcast %26 : vector<1x128xf32> to vector<128x128xf32>
    %28 = arith.addf %25, %27 : vector<128x128xf32>
    %cst_21 = arith.constant 0.000000e+00 : f32
    %29 = vector.broadcast %cst_21 : f32 to vector<128x128xf32>
    %30 = arith.maximumf %28, %29 : vector<128x128xf32>
    %31 = arith.truncf %30 : vector<128x128xf32> to vector<128x128xbf16>
    %c0_22 = arith.constant 0 : index
    %c0_23 = arith.constant 0 : index
    %32 = vector.load %arg9[%c0_22, %c0_23] : memref<128x128xbf16, #tpu.memory_space<vmem>>, vector<128x128xbf16>
    %cst_24 = arith.constant dense<0.000000e+00> : vector<128x128xf32>
    %33 = tpu.matmul %31, %32, %cst_24 {dimension_numbers = #tpu.dot_dimension_numbers<[1], [0], [0], [1], [0, 0, 1, 1], [], []>} : vector<128x128xbf16>, vector<128x128xbf16>, vector<128x128xf32> -> vector<128x128xf32>
    %c0_25 = arith.constant 0 : index
    %c0_26 = arith.constant 0 : index
    %34 = vector.load %arg10[%c0_25, %c0_26] : memref<1x128xf32, #tpu.memory_space<vmem>>, vector<1x128xf32>
    %35 = vector.broadcast %34 : vector<1x128xf32> to vector<128x128xf32>
    %36 = arith.addf %33, %35 : vector<128x128xf32>
    %cst_27 = arith.constant 0.000000e+00 : f32
    %37 = vector.broadcast %cst_27 : f32 to vector<128x128xf32>
    %38 = arith.maximumf %36, %37 : vector<128x128xf32>
    %39 = arith.truncf %38 : vector<128x128xf32> to vector<128x128xbf16>
    %c0_28 = arith.constant 0 : index
    %c0_29 = arith.constant 0 : index
    %40 = vector.load %arg11[%c0_28, %c0_29] : memref<128x128xbf16, #tpu.memory_space<vmem>>, vector<128x128xbf16>
    %cst_30 = arith.constant dense<0.000000e+00> : vector<128x128xf32>
    %41 = tpu.matmul %39, %40, %cst_30 {dimension_numbers = #tpu.dot_dimension_numbers<[1], [0], [0], [1], [0, 0, 1, 1], [], []>} : vector<128x128xbf16>, vector<128x128xbf16>, vector<128x128xf32> -> vector<128x128xf32>
    %c0_31 = arith.constant 0 : index
    %c0_32 = arith.constant 0 : index
    %42 = vector.load %arg12[%c0_31, %c0_32] : memref<1x128xf32, #tpu.memory_space<vmem>>, vector<1x128xf32>
    %43 = vector.broadcast %42 : vector<1x128xf32> to vector<128x128xf32>
    %44 = arith.addf %41, %43 : vector<128x128xf32>
    %c0_33 = arith.constant 0 : index
    %c0_34 = arith.constant 0 : index
    %45 = vector.load %arg13[%c0_33, %c0_34] : memref<128x128xf32, #tpu.memory_space<vmem>>, vector<128x128xf32>
    tpu.vector_store %arg13[%c0_33, %c0_34], %44 {strides = array<i32>} : memref<128x128xf32, #tpu.memory_space<vmem>>, vector<128x128xf32>,
    return
  }
  func.func @transform_0(%arg0: i32) -> (i32, i32) {
    %c0_i32 = arith.constant 0 : i32
    %c0_i32_0 = arith.constant 0 : i32
    %c0_i32_1 = arith.constant 0 : i32
    return %c0_i32, %c0_i32_0 : i32, i32
  }
  func.func @transform_1(%arg0: i32) -> (i32, i32) {
    %c0_i32 = arith.constant 0 : i32
    %c0_i32_0 = arith.constant 0 : i32
    %c0_i32_1 = arith.constant 0 : i32
    return %c0_i32, %c0_i32_0 : i32, i32
  }
  func.func @transform_2(%arg0: i32) -> (i32, i32) {
    %c0_i32 = arith.constant 0 : i32
    %c0_i32_0 = arith.constant 0 : i32
    %c0_i32_1 = arith.constant 0 : i32
    return %c0_i32, %c0_i32_0 : i32, i32
  }
  func.func @transform_3(%arg0: i32) -> (i32, i32) {
    %c0_i32 = arith.constant 0 : i32
    %c0_i32_0 = arith.constant 0 : i32
    %c0_i32_1 = arith.constant 0 : i32
    return %c0_i32, %c0_i32_0 : i32, i32
  }
  func.func @transform_4(%arg0: i32) -> (i32, i32) {
    %c0_i32 = arith.constant 0 : i32
    %c0_i32_0 = arith.constant 0 : i32
    %c0_i32_1 = arith.constant 0 : i32
    return %c0_i32, %c0_i32_0 : i32, i32
  }
  func.func @transform_5(%arg0: i32) -> (i32, i32) {
    %c0_i32 = arith.constant 0 : i32
    %c0_i32_0 = arith.constant 0 : i32
    %c0_i32_1 = arith.constant 0 : i32
    return %c0_i32, %c0_i32_0 : i32, i32
  }
  func.func @transform_6(%arg0: i32) -> (i32, i32) {
    %c0_i32 = arith.constant 0 : i32
    %c0_i32_0 = arith.constant 0 : i32
    %c0_i32_1 = arith.constant 0 : i32
    return %c0_i32, %c0_i32_0 : i32, i32
  }
  func.func @transform_7(%arg0: i32) -> (i32, i32) {
    %c0_i32 = arith.constant 0 : i32
    %c0_i32_0 = arith.constant 0 : i32
    %c0_i32_1 = arith.constant 0 : i32
    return %c0_i32, %c0_i32_0 : i32, i32
  }
  func.func @transform_8(%arg0: i32) -> (i32, i32) {
    %c0_i32 = arith.constant 0 : i32
    %c0_i32_0 = arith.constant 0 : i32
    %c0_i32_1 = arith.constant 0 : i32
    return %c0_i32, %c0_i32_0 : i32, i32
  }
  func.func @transform_9(%arg0: i32) -> (i32, i32) {
    %c0_i32 = arith.constant 0 : i32
    %c0_i32_0 = arith.constant 0 : i32
    %c0_i32_1 = arith.constant 0 : i32
    return %c0_i32, %c0_i32_0 : i32, i32
  }
  func.func @transform_10(%arg0: i32) -> (i32, i32) {
    %c0_i32 = arith.constant 0 : i32
    %c0_i32_0 = arith.constant 0 : i32
    %c0_i32_1 = arith.constant 0 : i32
    return %c0_i32, %c0_i32_0 : i32, i32
  }
  func.func @transform_11(%arg0: i32) -> (i32, i32) {
    %c0_i32 = arith.constant 0 : i32
    %c0_i32_0 = arith.constant 0 : i32
    %c0_i32_1 = arith.constant 0 : i32
    return %c0_i32, %c0_i32_0 : i32, i32
  }
  func.func @transform_12(%arg0: i32) -> (i32, i32) {
    %c0_i32 = arith.constant 0 : i32
    %c0_i32_0 = arith.constant 0 : i32
    %c0_i32_1 = arith.constant 0 : i32
    return %c0_i32, %c0_i32_0 : i32, i32
  }
}

module attributes {stable_mosaic.version = 11 : i64} {
  func.func @_gin_fused_kernel(%arg0: i32, %arg1: memref<128x128xi8, #tpu.memory_space<vmem>>, %arg2: memref<128x128xbf16, #tpu.memory_space<vmem>>, %arg3: memref<128x128xbf16, #tpu.memory_space<vmem>>, %arg4: memref<1x128xf32, #tpu.memory_space<vmem>>, %arg5: memref<128x128xbf16, #tpu.memory_space<vmem>>, %arg6: memref<1x128xf32, #tpu.memory_space<vmem>>, %arg7: memref<128x128xbf16, #tpu.memory_space<vmem>>, %arg8: memref<1x128xf32, #tpu.memory_space<vmem>>, %arg9: memref<128x128xbf16, #tpu.memory_space<vmem>>, %arg10: memref<1x128xf32, #tpu.memory_space<vmem>>, %arg11: memref<128x128xbf16, #tpu.memory_space<vmem>>, %arg12: memref<1x128xf32, #tpu.memory_space<vmem>>, %arg13: memref<128x128xf32, #tpu.memory_space<vmem>>) attributes {dimension_semantics = [#tpu.dimension_semantics<arbitrary>], iteration_bounds = array<i64: 1>, scalar_prefetch = 0 : i64, scratch_operands = 0 : i64, tpu.core_type = #tpu.core_type<tc>, window_params = [{pipeline_mode = #tpu.pipeline_mode<synchronous>, transform_indices = @transform_0, window_bounds = array<i64: 128, 128>}, {pipeline_mode = #tpu.pipeline_mode<synchronous>, transform_indices = @transform_1, window_bounds = array<i64: 128, 128>}, {pipeline_mode = #tpu.pipeline_mode<synchronous>, transform_indices = @transform_2, window_bounds = array<i64: 128, 128>}, {pipeline_mode = #tpu.pipeline_mode<synchronous>, transform_indices = @transform_3, window_bounds = array<i64: 1, 128>}, {pipeline_mode = #tpu.pipeline_mode<synchronous>, transform_indices = @transform_4, window_bounds = array<i64: 128, 128>}, {pipeline_mode = #tpu.pipeline_mode<synchronous>, transform_indices = @transform_5, window_bounds = array<i64: 1, 128>}, {pipeline_mode = #tpu.pipeline_mode<synchronous>, transform_indices = @transform_6, window_bounds = array<i64: 128, 128>}, {pipeline_mode = #tpu.pipeline_mode<synchronous>, transform_indices = @transform_7, window_bounds = array<i64: 1, 128>}, {pipeline_mode = #tpu.pipeline_mode<synchronous>, transform_indices = @transform_8, window_bounds = array<i64: 128, 128>}, {pipeline_mode = #tpu.pipeline_mode<synchronous>, transform_indices = @transform_9, window_bounds = array<i64: 1, 128>}, {pipeline_mode = #tpu.pipeline_mode<synchronous>, transform_indices = @transform_10, window_bounds = array<i64: 128, 128>}, {pipeline_mode = #tpu.pipeline_mode<synchronous>, transform_indices = @transform_11, window_bounds = array<i64: 1, 128>}, {pipeline_mode = #tpu.pipeline_mode<synchronous>, transform_indices = @transform_12, window_bounds = array<i64: 128, 128>}]} {
    %c0 = arith.constant 0 : index
    %c0_0 = arith.constant 0 : index
    %0 = vector.load %arg1[%c0, %c0_0] : memref<128x128xi8, #tpu.memory_space<vmem>>, vector<128x128xi8>
    %1 = arith.sitofp %0 : vector<128x128xi8> to vector<128x128xf32>
    %2 = arith.truncf %1 : vector<128x128xf32> to vector<128x128xbf16>
    %c0_1 = arith.constant 0 : index
    %c0_2 = arith.constant 0 : index
    %3 = vector.load %arg2[%c0_1, %c0_2] : memref<128x128xbf16, #tpu.memory_space<vmem>>, vector<128x128xbf16>
    %cst = arith.constant dense<0.000000e+00> : vector<128x128xf32>
    %4 = tpu.matmul %2, %3, %cst {dimension_numbers = #tpu.dot_dimension_numbers<[1], [0], [0], [1], [0, 0, 1, 1], [], []>} : vector<128x128xbf16>, vector<128x128xbf16>, vector<128x128xf32> -> vector<128x128xf32>
    %5 = arith.truncf %4 : vector<128x128xf32> to vector<128x128xbf16>
    %c0_3 = arith.constant 0 : index
    %c0_4 = arith.constant 0 : index
    %6 = vector.load %arg3[%c0_3, %c0_4] : memref<128x128xbf16, #tpu.memory_space<vmem>>, vector<128x128xbf16>
    %cst_5 = arith.constant dense<0.000000e+00> : vector<128x128xf32>
    %7 = tpu.matmul %5, %6, %cst_5 {dimension_numbers = #tpu.dot_dimension_numbers<[1], [0], [0], [1], [0, 0, 1, 1], [], []>} : vector<128x128xbf16>, vector<128x128xbf16>, vector<128x128xf32> -> vector<128x128xf32>
    %c0_6 = arith.constant 0 : index
    %c0_7 = arith.constant 0 : index
    %8 = vector.load %arg4[%c0_6, %c0_7] : memref<1x128xf32, #tpu.memory_space<vmem>>, vector<1x128xf32>
    %9 = vector.broadcast %8 : vector<1x128xf32> to vector<128x128xf32>
    %10 = arith.addf %7, %9 : vector<128x128xf32>
    %cst_8 = arith.constant 0.000000e+00 : f32
    %11 = vector.broadcast %cst_8 : f32 to vector<128x128xf32>
    %12 = arith.maximumf %10, %11 : vector<128x128xf32>
    %13 = arith.truncf %12 : vector<128x128xf32> to vector<128x128xbf16>
    %c0_9 = arith.constant 0 : index
    %c0_10 = arith.constant 0 : index
    %14 = vector.load %arg5[%c0_9, %c0_10] : memref<128x128xbf16, #tpu.memory_space<vmem>>, vector<128x128xbf16>
    %cst_11 = arith.constant dense<0.000000e+00> : vector<128x128xf32>
    %15 = tpu.matmul %13, %14, %cst_11 {dimension_numbers = #tpu.dot_dimension_numbers<[1], [0], [0], [1], [0, 0, 1, 1], [], []>} : vector<128x128xbf16>, vector<128x128xbf16>, vector<128x128xf32> -> vector<128x128xf32>
    %c0_12 = arith.constant 0 : index
    %c0_13 = arith.constant 0 : index
    %16 = vector.load %arg6[%c0_12, %c0_13] : memref<1x128xf32, #tpu.memory_space<vmem>>, vector<1x128xf32>
    %17 = vector.broadcast %16 : vector<1x128xf32> to vector<128x128xf32>
    %18 = arith.addf %15, %17 : vector<128x128xf32>
    %cst_14 = arith.constant 0.000000e+00 : f32
    %19 = vector.broadcast %cst_14 : f32 to vector<128x128xf32>
    %20 = arith.maximumf %18, %19 : vector<128x128xf32>
    %21 = arith.truncf %20 : vector<128x128xf32> to vector<128x128xbf16>
    %cst_15 = arith.constant dense<0.000000e+00> : vector<128x128xf32>
    %22 = tpu.matmul %2, %21, %cst_15 {dimension_numbers = #tpu.dot_dimension_numbers<[1], [0], [0], [1], [0, 0, 1, 1], [], []>} : vector<128x128xbf16>, vector<128x128xbf16>, vector<128x128xf32> -> vector<128x128xf32>
    %23 = arith.truncf %22 : vector<128x128xf32> to vector<128x128xbf16>
    %c0_16 = arith.constant 0 : index
    %c0_17 = arith.constant 0 : index
    %24 = vector.load %arg7[%c0_16, %c0_17] : memref<128x128xbf16, #tpu.memory_space<vmem>>, vector<128x128xbf16>
    %cst_18 = arith.constant dense<0.000000e+00> : vector<128x128xf32>
    %25 = tpu.matmul %23, %24, %cst_18 {dimension_numbers = #tpu.dot_dimension_numbers<[1], [0], [0], [1], [0, 0, 1, 1], [], []>} : vector<128x128xbf16>, vector<128x128xbf16>, vector<128x128xf32> -> vector<128x128xf32>
    %c0_19 = arith.constant 0 : index
    %c0_20 = arith.constant 0 : index
    %26 = vector.load %arg8[%c0_19, %c0_20] : memref<1x128xf32, #tpu.memory_space<vmem>>, vector<1x128xf32>
    %27 = vector.broadcast %26 : vector<1x128xf32> to vector<128x128xf32>
    %28 = arith.addf %25, %27 : vector<128x128xf32>
    %cst_21 = arith.constant 0.000000e+00 : f32
    %29 = vector.broadcast %cst_21 : f32 to vector<128x128xf32>
    %30 = arith.maximumf %28, %29 : vector<128x128xf32>
    %31 = arith.truncf %30 : vector<128x128xf32> to vector<128x128xbf16>
    %c0_22 = arith.constant 0 : index
    %c0_23 = arith.constant 0 : index
    %32 = vector.load %arg9[%c0_22, %c0_23] : memref<128x128xbf16, #tpu.memory_space<vmem>>, vector<128x128xbf16>
    %cst_24 = arith.constant dense<0.000000e+00> : vector<128x128xf32>
    %33 = tpu.matmul %31, %32, %cst_24 {dimension_numbers = #tpu.dot_dimension_numbers<[1], [0], [0], [1], [0, 0, 1, 1], [], []>} : vector<128x128xbf16>, vector<128x128xbf16>, vector<128x128xf32> -> vector<128x128xf32>
    %c0_25 = arith.constant 0 : index
    %c0_26 = arith.constant 0 : index
    %34 = vector.load %arg10[%c0_25, %c0_26] : memref<1x128xf32, #tpu.memory_space<vmem>>, vector<1x128xf32>
    %35 = vector.broadcast %34 : vector<1x128xf32> to vector<128x128xf32>
    %36 = arith.addf %33, %35 : vector<128x128xf32>
    %cst_27 = arith.constant 0.000000e+00 : f32
    %37 = vector.broadcast %cst_27 : f32 to vector<128x128xf32>
    %38 = arith.maximumf %36, %37 : vector<128x128xf32>
    %39 = arith.truncf %38 : vector<128x128xf32> to vector<128x128xbf16>
    %c0_28 = arith.constant 0 : index
    %c0_29 = arith.constant 0 : index
    %40 = vector.load %arg11[%c0_28, %c0_29] : memref<128x128xbf16, #tpu.memory_space<vmem>>, vector<128x128xbf16>
    %cst_30 = arith.constant dense<0.000000e+00> : vector<128x128xf32>
    %41 = tpu.matmul %39, %40, %cst_30 {dimension_numbers = #tpu.dot_dimension_numbers<[1], [0], [0], [1], [0, 0, 1, 1], [], []>} : vector<128x128xbf16>, vector<128x128xbf16>, vector<128x128xf32> -> vector<128x128xf32>
    %c0_31 = arith.constant 0 : index
    %c0_32 = arith.constant 0 : index
    %42 = vector.load %arg12[%c0_31, %c0_32] : memref<1x128xf32, #tpu.memory_space<vmem>>, vector<1x128xf32>
    %43 = vector.broadcast %42 : vector<1x128xf32> to vector<128x128xf32>
    %44 = arith.addf %41, %43 : vector<128x128xf32>
    %c0_33 = arith.constant 0 : index
    %c0_34 = arith.constant 0 : index
    %45 = vector.load %arg13[%c0_33, %c0_34] : memref<128x128xf32, #tpu.memory_space<vmem>>, vector<128x128xf32>
    tpu.vector_store %arg13[%c0_33, %c0_34], %44 {strides = array<i32>} : memref<128x128xf32, #tpu.memory_space<vmem>>, vector<128x128xf32>,
    return
  }
  func.func @transform_0(%arg0: i32) -> (i32, i32) {
    %c0_i32 = arith.constant 0 : i32
    %c0_i32_0 = arith.constant 0 : i32
    %c0_i32_1 = arith.constant 0 : i32
    return %c0_i32, %c0_i32_0 : i32, i32
  }
  func.func @transform_1(%arg0: i32) -> (i32, i32) {
    %c0_i32 = arith.constant 0 : i32
    %c0_i32_0 = arith.constant 0 : i32
    %c0_i32_1 = arith.constant 0 : i32
    return %c0_i32, %c0_i32_0 : i32, i32
  }
  func.func @transform_2(%arg0: i32) -> (i32, i32) {
    %c0_i32 = arith.constant 0 : i32
    %c0_i32_0 = arith.constant 0 : i32
    %c0_i32_1 = arith.constant 0 : i32
    return %c0_i32, %c0_i32_0 : i32, i32
  }
  func.func @transform_3(%arg0: i32) -> (i32, i32) {
    %c0_i32 = arith.constant 0 : i32
    %c0_i32_0 = arith.constant 0 : i32
    %c0_i32_1 = arith.constant 0 : i32
    return %c0_i32, %c0_i32_0 : i32, i32
  }
  func.func @transform_4(%arg0: i32) -> (i32, i32) {
    %c0_i32 = arith.constant 0 : i32
    %c0_i32_0 = arith.constant 0 : i32
    %c0_i32_1 = arith.constant 0 : i32
    return %c0_i32, %c0_i32_0 : i32, i32
  }
  func.func @transform_5(%arg0: i32) -> (i32, i32) {
    %c0_i32 = arith.constant 0 : i32
    %c0_i32_0 = arith.constant 0 : i32
    %c0_i32_1 = arith.constant 0 : i32
    return %c0_i32, %c0_i32_0 : i32, i32
  }
  func.func @transform_6(%arg0: i32) -> (i32, i32) {
    %c0_i32 = arith.constant 0 : i32
    %c0_i32_0 = arith.constant 0 : i32
    %c0_i32_1 = arith.constant 0 : i32
    return %c0_i32, %c0_i32_0 : i32, i32
  }
  func.func @transform_7(%arg0: i32) -> (i32, i32) {
    %c0_i32 = arith.constant 0 : i32
    %c0_i32_0 = arith.constant 0 : i32
    %c0_i32_1 = arith.constant 0 : i32
    return %c0_i32, %c0_i32_0 : i32, i32
  }
  func.func @transform_8(%arg0: i32) -> (i32, i32) {
    %c0_i32 = arith.constant 0 : i32
    %c0_i32_0 = arith.constant 0 : i32
    %c0_i32_1 = arith.constant 0 : i32
    return %c0_i32, %c0_i32_0 : i32, i32
  }
  func.func @transform_9(%arg0: i32) -> (i32, i32) {
    %c0_i32 = arith.constant 0 : i32
    %c0_i32_0 = arith.constant 0 : i32
    %c0_i32_1 = arith.constant 0 : i32
    return %c0_i32, %c0_i32_0 : i32, i32
  }
  func.func @transform_10(%arg0: i32) -> (i32, i32) {
    %c0_i32 = arith.constant 0 : i32
    %c0_i32_0 = arith.constant 0 : i32
    %c0_i32_1 = arith.constant 0 : i32
    return %c0_i32, %c0_i32_0 : i32, i32
  }
  func.func @transform_11(%arg0: i32) -> (i32, i32) {
    %c0_i32 = arith.constant 0 : i32
    %c0_i32_0 = arith.constant 0 : i32
    %c0_i32_1 = arith.constant 0 : i32
    return %c0_i32, %c0_i32_0 : i32, i32
  }
  func.func @transform_12(%arg0: i32) -> (i32, i32) {
    %c0_i32 = arith.constant 0 : i32
    %c0_i32_0 = arith.constant 0 : i32
    %c0_i32_1 = arith.constant 0 : i32
    return %c0_i32, %c0_i32_0 : i32, i32
  }
}

</mosaic_0001>

<bundles_post_ra>
// kernel: tpu_custom_call.1
= control target key start
LH: loop header
LB: loop body
LE: loop exit
PB: predicated region body
PF: predicated region fallthrough
CT: control target
= control target key end

     0   :  { %17 = vsyncpa [#allocation3], 0  ;;  %s2589_s0 = inlined_call_operand.hbm [shape: s8[128,128], index: 0, kind: input, shape index: {}]   ;;  %s2590_s1 = inlined_call_operand.hbm [shape: bf16[128,128], index: 1, kind: input, shape index: {}]   ;;  %s2591_s2 = inlined_call_operand.hbm [shape: bf16[128,128], index: 2, kind: input, shape index: {}]   ;;  %s2592_s3 = inlined_call_operand.hbm [shape: f32[1,128], index: 3, kind: input, shape index: {}]   ;;  %s2593_s4 = inlined_call_operand.hbm [shape: bf16[128,128], index: 4, kind: input, shape index: {}]   ;;  %s2594_s5 = inlined_call_operand.hbm [shape: f32[1,128], index: 5, kind: input, shape index: {}]   ;;  %s2595_s6 = inlined_call_operand.hbm [shape: bf16[128,128], index: 6, kind: input, shape index: {}]   ;;  %s2596_s7 = inlined_call_operand.hbm [shape: f32[1,128], index: 7, kind: input, shape index: {}]   ;;  %s2597_s8 = inlined_call_operand.hbm [shape: bf16[128,128], index: 8, kind: input, shape index: {}]   ;;  %s2598_s9 = inlined_call_operand.hbm [shape: f32[1,128], index: 9, kind: input, shape index: {}]   ;;  %s2599_s10 = inlined_call_operand.hbm [shape: bf16[128,128], index: 10, kind: input, shape index: {}]   ;;  %s2600_s11 = inlined_call_operand.hbm [shape: f32[1,128], index: 11, kind: input, shape index: {}]   ;;  %s2601_s12 = inlined_call_operand.hbm [shape: f32[128,128], index: 12, kind: output, shape index: {}]  }
   0x1   :  { %18 = vsyncpa [#allocation6], 0 }
   0x2   :  { %19 = vsyncpa [#allocation9], 0 }
   0x3   :  { %20 = vsyncpa [#allocation12], 0 }
   0x4   :  { %21 = vsyncpa [#allocation15], 0 }
   0x5   :  { %22 = vsyncpa [#allocation18], 0 }
   0x6   :  { %23 = vsyncpa [#allocation21], 0 }
   0x7   :  { %24 = vsyncpa [#allocation4], 0  ;;  %s2229_s21 = smov [#allocation5]   ;;  %s1927_s25 = scalar_lea.hbm %s2590_s1, 1024 }
   0x8   :  { %s42_s22 = sshll.u32 %s2229_s21, 4  ;;  %p1928_p0 = scmp.ne.s32.totalorder %s2590_s1, %s1927_s25  ;;  %s43_s22 = int_to_ptr.vmem [resolvable:$true] %s42_s22 }
   0x9   :  { %p1931_p1 = scmp.lt.u32.totalorder %s1927_s25, %s2590_s1 }
   0xb   :  { %p1933_p2 = pnand %p1931_p1, %p1928_p0 }
   0xd   :  { %1936 = shalt.err (!%p1933_p2)
}
   0xe   :  { %s1937_s30 = scalar_lea.vmem %s43_s22, 1024  ;;  %p1942_p4 = scmp.lt.s32.totalorder %s43_s22, %s43_s22 }
   0xf   :  { %p1938_p3 = scmp.ne.s32.totalorder %s43_s22, %s1937_s30  ;;  %p1943_p5 = scmp.lt.s32.totalorder %s1937_s30, %s1937_s30 }
  0x11   :  { %p1944_p6 = por %p1943_p5, %p1942_p4 }
  0x13   :  { %p1945_p7 = pnand %p1944_p6, %p1938_p3 }
  0x15   :  { %1948 = shalt.err (!%p1945_p7)
}
  0x16   :  { %s2230_s13 = smov 64   ;;  %s2231_s14 = smov 4  }
  0x17   :  { %48 = dma.hbm_to_vmem [thread:$0]  %s2590_s1, 1024, %s43_s22, [#allocation6], %s2230_s13, %s2230_s13, %s2231_s14  }
  0x18   :  { %s2232_s17 = smov [#allocation8]   ;;  %s2233_s19 = smov [#allocation11]  }
  0x19   :  { %s67_s18 = sshll.u32 %s2232_s17, 4  ;;  %s89_s20 = sshll.u32 %s2233_s19, 4  ;;  %s68_s18 = int_to_ptr.vmem [resolvable:$true] %s67_s18  ;;  %s90_s20 = int_to_ptr.vmem [resolvable:$true] %s89_s20 }
  0x1a   :  { %s1949_s24 = scalar_lea.hbm %s2592_s3, 16 }
  0x1b   :  { %p1950_p8 = scmp.ne.s32.totalorder %s2592_s3, %s1949_s24  ;;  %p1953_p9 = scmp.lt.u32.totalorder %s1949_s24, %s2592_s3 }
  0x1d   :  { %p1955_p10 = pnand %p1953_p9, %p1950_p8 }
  0x1f   :  { %1958 = shalt.err (!%p1955_p10)
}
  0x20   :  { %s1959_s1 = scalar_lea.vmem %s68_s18, 16  ;;  %s1963_s22 = scalar_lea.vmem %s68_s18, 32 }
  0x21   :  { %p1960_p11 = scmp.ne.s32.totalorder %s68_s18, %s1959_s1  ;;  %p1964_p12 = scmp.lt.s32.totalorder %s68_s18, %s68_s18 }
  0x22   :  { %p1965_p13 = scmp.lt.s32.totalorder %s1963_s22, %s1959_s1 }
  0x24   :  { %p1966_p0 = por %p1965_p13, %p1964_p12 }
  0x26   :  { %p1967_p1 = pnand %p1966_p0, %p1960_p11 }
  0x28   :  { %1970 = shalt.err (!%p1967_p1)
}
  0x29   :  { %70 = dma.hbm_to_vmem [thread:$0]  %s2592_s3, 16, %s68_s18, [#allocation9]  }
  0x2a   :  { %s1971_s17 = scalar_lea.hbm %s2594_s5, 16 }
  0x2b   :  { %p1972_p2 = scmp.ne.s32.totalorder %s2594_s5, %s1971_s17  ;;  %p1975_p3 = scmp.lt.u32.totalorder %s1971_s17, %s2594_s5 }
  0x2d   :  { %p1977_p4 = pnand %p1975_p3, %p1972_p2 }
  0x2f   :  { %1980 = shalt.err (!%p1977_p4)
}
  0x30   :  { %s1981_s25 = scalar_lea.vmem %s90_s20, 16  ;;  %s1985_s26 = scalar_lea.vmem %s90_s20, 32 }
  0x31   :  { %p1982_p5 = scmp.ne.s32.totalorder %s90_s20, %s1981_s25  ;;  %p1986_p6 = scmp.lt.s32.totalorder %s90_s20, %s90_s20 }
  0x32   :  { %p1987_p7 = scmp.lt.s32.totalorder %s1985_s26, %s1981_s25 }
  0x34   :  { %p1988_p8 = por %p1987_p7, %p1986_p6 }
  0x36   :  { %p1989_p9 = pnand %p1988_p8, %p1982_p5 }
  0x38   :  { %1992 = shalt.err (!%p1989_p9)
}
  0x39   :  { %92 = dma.hbm_to_vmem [thread:$0]  %s2594_s5, 16, %s90_s20, [#allocation12]  }
  0x3a   :  { %s2234_s27 = smov [#allocation14]   ;;  %s2235_s1 = smov [#allocation17]  }
  0x3b   :  { %s111_s28 = sshll.u32 %s2234_s27, 4  ;;  %s133_s22 = sshll.u32 %s2235_s1, 4  ;;  %s112_s28 = int_to_ptr.vmem [resolvable:$true] %s111_s28  ;;  %s134_s22 = int_to_ptr.vmem [resolvable:$true] %s133_s22 }
  0x3c   :  { %s1993_s15 = scalar_lea.hbm %s2596_s7, 16 }
  0x3d   :  { %p1994_p10 = scmp.ne.s32.totalorder %s2596_s7, %s1993_s15  ;;  %p1997_p11 = scmp.lt.u32.totalorder %s1993_s15, %s2596_s7 }
  0x3f   :  { %p1999_p12 = pnand %p1997_p11, %p1994_p10 }
  0x41   :  { %2002 = shalt.err (!%p1999_p12)
}
  0x42   :  { %s2003_s5 = scalar_lea.vmem %s112_s28, 16  ;;  %s2007_s20 = scalar_lea.vmem %s112_s28, 32 }
  0x43   :  { %p2004_p13 = scmp.ne.s32.totalorder %s112_s28, %s2003_s5  ;;  %p2008_p0 = scmp.lt.s32.totalorder %s112_s28, %s112_s28 }
  0x44   :  { %p2009_p1 = scmp.lt.s32.totalorder %s2007_s20, %s2003_s5 }
  0x46   :  { %p2010_p2 = por %p2009_p1, %p2008_p0 }
  0x48   :  { %p2011_p3 = pnand %p2010_p2, %p2004_p13 }
  0x4a   :  { %2014 = shalt.err (!%p2011_p3)
}
  0x4b   :  { %114 = dma.hbm_to_vmem [thread:$0]  %s2596_s7, 16, %s112_s28, [#allocation15]  }
  0x4c   :  { %s2015_s3 = scalar_lea.hbm %s2598_s9, 16 }
  0x4d   :  { %p2016_p4 = scmp.ne.s32.totalorder %s2598_s9, %s2015_s3  ;;  %p2019_p5 = scmp.lt.u32.totalorder %s2015_s3, %s2598_s9 }
  0x4f   :  { %p2021_p6 = pnand %p2019_p5, %p2016_p4 }
  0x51   :  { %2024 = shalt.err (!%p2021_p6)
}
  0x52   :  { %s2025_s30 = scalar_lea.vmem %s134_s22, 16  ;;  %s2029_s15 = scalar_lea.vmem %s134_s22, 32 }
  0x53   :  { %p2026_p7 = scmp.ne.s32.totalorder %s134_s22, %s2025_s30  ;;  %p2030_p8 = scmp.lt.s32.totalorder %s134_s22, %s134_s22 }
  0x54   :  { %p2031_p9 = scmp.lt.s32.totalorder %s2029_s15, %s2025_s30 }
  0x56   :  { %p2032_p10 = por %p2031_p9, %p2030_p8 }
  0x58   :  { %p2033_p11 = pnand %p2032_p10, %p2026_p7 }
  0x5a   :  { %2036 = shalt.err (!%p2033_p11)
}
  0x5b   :  { %136 = dma.hbm_to_vmem [thread:$0]  %s2598_s9, 16, %s134_s22, [#allocation18]  }
  0x5c   :  { %s2236_s16 = smov [#allocation2]   ;;  %s2037_s5 = scalar_lea.hbm %s2589_s0, 512 }
  0x5d   :  { %s30_s17 = sshll.u32 %s2236_s16, 4  ;;  %p2038_p12 = scmp.ne.s32.totalorder %s2589_s0, %s2037_s5  ;;  %s31_s17 = int_to_ptr.vmem [resolvable:$true] %s30_s17 }
  0x5e   :  { %p2041_p13 = scmp.lt.u32.totalorder %s2037_s5, %s2589_s0 }
  0x60   :  { %p2043_p0 = pnand %p2041_p13, %p2038_p12 }
  0x62   :  { %2046 = shalt.err (!%p2043_p0)
}
  0x63   :  { %s2047_s26 = scalar_lea.vmem %s31_s17, 512  ;;  %p2052_p2 = scmp.lt.s32.totalorder %s31_s17, %s31_s17 }
  0x64   :  { %p2048_p1 = scmp.ne.s32.totalorder %s31_s17, %s2047_s26  ;;  %p2053_p3 = scmp.lt.s32.totalorder %s2047_s26, %s2047_s26 }
  0x66   :  { %p2054_p4 = por %p2053_p3, %p2052_p2 }
  0x68   :  { %p2055_p5 = pnand %p2054_p4, %p2048_p1 }
  0x6a   :  { %2058 = shalt.err (!%p2055_p5)
}
  0x6b   :  { %s2237_s9 = smov 128   ;;  %s2238_s22 = smov 8  }
  0x6c   :  { %36 = dma.hbm_to_vmem [thread:$0]  %s2589_s0, 512, %s31_s17, [#allocation3], %s2237_s9, %s2237_s9, %s2238_s22  }
  0x6d   :  { %s2239_s27 = smov [#allocation7]   ;;  %s2240_s29 = smov [#allocation10]  }
  0x6e   :  { %s54_s1 = sshll.u32 %s2239_s27, 4  ;;  %s76_s30 = sshll.u32 %s2240_s29, 4  ;;  %s55_s1 = int_to_ptr.vmem [resolvable:$true] %s54_s1  ;;  %s2389_s30 = int_to_ptr.vmem [resolvable:$true] %s76_s30 }
  0x6f   :  { %s2059_s28 = scalar_lea.hbm %s2591_s2, 1024 }
  0x70   :  { %p2060_p6 = scmp.ne.s32.totalorder %s2591_s2, %s2059_s28  ;;  %p2063_p7 = scmp.lt.u32.totalorder %s2059_s28, %s2591_s2 }
  0x72   :  { %p2065_p8 = pnand %p2063_p7, %p2060_p6 }
  0x74   :  { %2068 = shalt.err (!%p2065_p8)
}
  0x75   :  { %s2069_s0 = scalar_lea.vmem %s55_s1, 1024  ;;  %p2074_p10 = scmp.lt.s32.totalorder %s55_s1, %s55_s1 }
  0x76   :  { %p2070_p9 = scmp.ne.s32.totalorder %s55_s1, %s2069_s0  ;;  %p2075_p11 = scmp.lt.s32.totalorder %s2069_s0, %s2069_s0 }
  0x78   :  { %p2076_p12 = por %p2075_p11, %p2074_p10 }
  0x7a   :  { %p2077_p13 = pnand %p2076_p12, %p2070_p9 }
  0x7c   :  { %2080 = shalt.err (!%p2077_p13)
}
  0x7d   :  { %60 = dma.hbm_to_vmem [thread:$0]  %s2591_s2, 1024, %s55_s1, [#allocation6], %s2230_s13, %s2230_s13, %s2231_s14  }
  0x7e   :  { %s2081_s25 = scalar_lea.hbm %s2593_s4, 1024 }
  0x7f   :  { %p2082_p0 = scmp.ne.s32.totalorder %s2593_s4, %s2081_s25  ;;  %p2085_p1 = scmp.lt.u32.totalorder %s2081_s25, %s2593_s4 }
  0x81   :  { %p2087_p2 = pnand %p2085_p1, %p2082_p0 }
  0x83   :  { %2090 = shalt.err (!%p2087_p2)
}
  0x84   :  { %s2091_s29 = scalar_lea.vmem %s2389_s30, 1024  ;;  %p2096_p4 = scmp.lt.s32.totalorder %s2389_s30, %s2389_s30 }
  0x85   :  { %p2092_p3 = scmp.ne.s32.totalorder %s2389_s30, %s2091_s29  ;;  %p2097_p5 = scmp.lt.s32.totalorder %s2091_s29, %s2091_s29 }
  0x87   :  { %p2098_p6 = por %p2097_p5, %p2096_p4 }
  0x89   :  { %p2099_p7 = pnand %p2098_p6, %p2092_p3 }
  0x8b   :  { %2102 = shalt.err (!%p2099_p7)
}
  0x8c   :  { %82 = dma.hbm_to_vmem [thread:$0]  %s2593_s4, 1024, %s2389_s30, [#allocation9], %s2230_s13, %s2230_s13, %s2231_s14  }
  0x8d   :  { %s2241_s15 = smov [#allocation13]   ;;  %s2242_s28 = smov [#allocation16]  }
  0x8e   :  { %s98_s7 = sshll.u32 %s2241_s15, 4  ;;  %s120_s16 = sshll.u32 %s2242_s28, 4  ;;  %s99_s7 = int_to_ptr.vmem [resolvable:$true] %s98_s7  ;;  %s2426_s16 = int_to_ptr.vmem [resolvable:$true] %s120_s16 }
  0x8f   :  { %s2103_s5 = scalar_lea.hbm %s2595_s6, 1024 }
  0x90   :  { %p2104_p8 = scmp.ne.s32.totalorder %s2595_s6, %s2103_s5  ;;  %p2107_p9 = scmp.lt.u32.totalorder %s2103_s5, %s2595_s6 }
  0x92   :  { %p2109_p10 = pnand %p2107_p9, %p2104_p8 }
  0x94   :  { %2112 = shalt.err (!%p2109_p10)
}
  0x95   :  { %s2113_s4 = scalar_lea.vmem %s99_s7, 1024  ;;  %p2118_p12 = scmp.lt.s32.totalorder %s99_s7, %s99_s7 }
  0x96   :  { %p2114_p11 = scmp.ne.s32.totalorder %s99_s7, %s2113_s4  ;;  %p2119_p13 = scmp.lt.s32.totalorder %s2113_s4, %s2113_s4 }
  0x98   :  { %p2120_p0 = por %p2119_p13, %p2118_p12 }
  0x9a   :  { %p2121_p1 = pnand %p2120_p0, %p2114_p11 }
  0x9c   :  { %2124 = shalt.err (!%p2121_p1)
}
  0x9d   :  { %104 = dma.hbm_to_vmem [thread:$0]  %s2595_s6, 1024, %s99_s7, [#allocation12], %s2230_s13, %s2230_s13, %s2231_s14  }
  0x9e   :  { %s2125_s3 = scalar_lea.hbm %s2597_s8, 1024 }
  0x9f   :  { %p2126_p2 = scmp.ne.s32.totalorder %s2597_s8, %s2125_s3  ;;  %p2129_p3 = scmp.lt.u32.totalorder %s2125_s3, %s2597_s8 }
  0xa1   :  { %p2131_p4 = pnand %p2129_p3, %p2126_p2 }
  0xa3   :  { %2134 = shalt.err (!%p2131_p4)
}
  0xa4   :  { %s2135_s1 = scalar_lea.vmem %s2426_s16, 1024  ;;  %p2140_p6 = scmp.lt.s32.totalorder %s2426_s16, %s2426_s16 }
  0xa5   :  { %p2136_p5 = scmp.ne.s32.totalorder %s2426_s16, %s2135_s1  ;;  %p2141_p7 = scmp.lt.s32.totalorder %s2135_s1, %s2135_s1 }
  0xa7   :  { %p2142_p8 = por %p2141_p7, %p2140_p6 }
  0xa9   :  { %p2143_p9 = pnand %p2142_p8, %p2136_p5 }
  0xab   :  { %2146 = shalt.err (!%p2143_p9)
}
  0xac   :  { %126 = dma.hbm_to_vmem [thread:$0]  %s2597_s8, 1024, %s2426_s16, [#allocation15], %s2230_s13, %s2230_s13, %s2231_s14  }
  0xad   :  { %s2243_s7 = smov [#allocation19]   ;;  %s2244_s19 = smov [#allocation20]  }
  0xae   :  { %s142_s28 = sshll.u32 %s2243_s7, 4  ;;  %s155_s21 = sshll.u32 %s2244_s19, 4  ;;  %s143_s28 = int_to_ptr.vmem [resolvable:$true] %s142_s28  ;;  %s156_s21 = int_to_ptr.vmem [resolvable:$true] %s155_s21 }
  0xaf   :  { %s2147_s17 = scalar_lea.hbm %s2599_s10, 1024 }
  0xb0   :  { %p2148_p10 = scmp.ne.s32.totalorder %s2599_s10, %s2147_s17  ;;  %p2151_p11 = scmp.lt.u32.totalorder %s2147_s17, %s2599_s10 }
  0xb2   :  { %p2153_p12 = pnand %p2151_p11, %p2148_p10 }
  0xb4   :  { %2156 = shalt.err (!%p2153_p12)
}
  0xb5   :  { %s2157_s8 = scalar_lea.vmem %s143_s28, 1024  ;;  %p2162_p0 = scmp.lt.s32.totalorder %s143_s28, %s143_s28 }
  0xb6   :  { %p2158_p13 = scmp.ne.s32.totalorder %s143_s28, %s2157_s8  ;;  %p2163_p1 = scmp.lt.s32.totalorder %s2157_s8, %s2157_s8 }
  0xb8   :  { %p2164_p2 = por %p2163_p1, %p2162_p0 }
  0xba   :  { %p2165_p3 = pnand %p2164_p2, %p2158_p13 }
  0xbc   :  { %2168 = shalt.err (!%p2165_p3)
}
  0xbd   :  { %148 = dma.hbm_to_vmem [thread:$0]  %s2599_s10, 1024, %s143_s28, [#allocation18], %s2230_s13, %s2230_s13, %s2231_s14  }
  0xbe   :  { %s2169_s3 = scalar_lea.hbm %s2600_s11, 16 }
  0xbf   :  { %p2170_p4 = scmp.ne.s32.totalorder %s2600_s11, %s2169_s3  ;;  %p2173_p5 = scmp.lt.u32.totalorder %s2169_s3, %s2600_s11 }
  0xc1   :  { %p2175_p6 = pnand %p2173_p5, %p2170_p4 }
  0xc3   :  { %2178 = shalt.err (!%p2175_p6)
}
  0xc4   :  { %s2179_s1 = scalar_lea.vmem %s156_s21, 16  ;;  %s2183_s6 = scalar_lea.vmem %s156_s21, 32 }
  0xc5   :  { %p2180_p7 = scmp.ne.s32.totalorder %s156_s21, %s2179_s1  ;;  %p2184_p8 = scmp.lt.s32.totalorder %s156_s21, %s156_s21 }
  0xc6   :  { %p2185_p9 = scmp.lt.s32.totalorder %s2183_s6, %s2179_s1 }
  0xc8   :  { %p2186_p10 = por %p2185_p9, %p2184_p8 }
  0xca   :  { %p2187_p11 = pnand %p2186_p10, %p2180_p7 }
  0xcc   :  { %2190 = shalt.err (!%p2187_p11)
}
  0xcd   :  { %158 = dma.hbm_to_vmem [thread:$0]  %s2600_s11, 16, %s156_s21, [#allocation21]  }
  0xce   :  { %2213 = dma.done.wait [#allocation3], 512  }
  0xcf   :  { %2214 = vsyncadd [#allocation3], 4294966784 }
  0xd0   :  { %2215 = dma.done.wait [#allocation6], 2048  }
  0xd1   :  { %2216 = vsyncadd [#allocation6], 4294965248 }
  0xd2   :  { %2217 = dma.done.wait [#allocation9], 1040  }
  0xd3   :  { %2218 = vsyncadd [#allocation9], 4294966256 }
  0xd4   :  { %2219 = dma.done.wait [#allocation12], 1040  }
  0xd5   :  { %2220 = vsyncadd [#allocation12], 4294966256 }
  0xd6   :  { %2221 = dma.done.wait [#allocation15], 1040  }
  0xd7   :  { %2222 = vsyncadd [#allocation15], 4294966256 }
  0xd8   :  { %2223 = dma.done.wait [#allocation18], 1040  }
  0xd9   :  { %2224 = vsyncadd [#allocation18], 4294966256 }
  0xda   :  { %2225 = dma.done.wait [#allocation21], 16  }
  0xdb   :  { %2226 = vsyncadd [#allocation21], 4294967280  ;;  %v1879_v0 = vld [vmem:[#allocation5] sm:$0xff]   ;;  %v1880_v1 = vld [vmem:[#allocation5 + $0x8] sm:$0xff]   ;;  %s2245_s11 = smov [#allocation22]  }
  0xdc   :  { %1622 = vmatprep.subr.bf16.mxu0 %v1879_v0  ;;  %v1881_v2 = vld [vmem:[#allocation5 + $0x10] sm:$0xff]   ;;  %v1882_v3 = vld [vmem:[#allocation5 + $0x18] sm:$0xff]   ;;  %v2490_v4 = vld [vmem:[#allocation2] sm:$0xff]  ;;  %s1439_s14 = sshll.u32 %s2245_s11, 4  ;;  %s1440_s14 = int_to_ptr.vmem [resolvable:$true] %s1439_s14 }
  0xdd   :  { %1623 = vmatpush3.bf16.msra.mxu0 %v1879_v0  ;;  %v200_v5 = vunpack.c.l.s8.bf16 %v2490_v4  ;;  %v1887_v6 = vld [vmem:[#allocation7] sm:$0xff]   ;;  %v1888_v7 = vld [vmem:[#allocation7 + $0x8] sm:$0xff]   ;;  %v1889_v9 = vld [vmem:[#allocation7 + $0x10] sm:$0xff]   ;;  %v201_v18 = vunpack.c.h.s8.bf16 %v2490_v4  ;;  %s2191_s15 = scalar_lea.vmem %s1440_s14, 2048  ;;  %p2196_p13 = scmp.lt.s32.totalorder %s1440_s14, %s1440_s14 }
  0xde   :  { %1624 = vmatprep.subr.bf16.mxu0 %v1880_v1  ;;  %v1883_v8 = vld [vmem:[#allocation5 + $0x20] sm:$0xff]   ;;  %1654 = vmatprep.subr.bf16.mxu1 %v1887_v6  ;;  %v1884_v10 = vld [vmem:[#allocation5 + $0x28] sm:$0xff]   ;;  %v1890_v11 = vld [vmem:[#allocation7 + $0x18] sm:$0xff]   ;;  %p2192_p12 = scmp.ne.s32.totalorder %s1440_s14, %s2191_s15  ;;  %p2197_p0 = scmp.lt.s32.totalorder %s2191_s15, %s2191_s15 }
  0xdf   :  { %1638 = vmatprep.mubr.bf16.mxu0 %v200_v5  ;;  %1655 = vmatpush3.bf16.msra.mxu1 %v1887_v6  ;;  %v1885_v12 = vld [vmem:[#allocation5 + $0x30] sm:$0xff]   ;;  %v1891_v13 = vld [vmem:[#allocation7 + $0x20] sm:$0xff]   ;;  %v1886_v14 = vld [vmem:[#allocation5 + $0x38] sm:$0xff]  }
  0xe0   :  { %1656 = vmatprep.subr.bf16.mxu1 %v1888_v7  ;;  %v1892_v15 = vld [vmem:[#allocation7 + $0x28] sm:$0xff]   ;;  %v1893_v17 = vld [vmem:[#allocation7 + $0x30] sm:$0xff]   ;;  %v2511_v23 = vld [vmem:[#allocation2 + $0x18] sm:$0xff]  ;;  %p2198_p1 = por %p2197_p0, %p2196_p13 }
  0xe1   :  { %1625 = vmatpush3.bf16.msra.mxu0 %v1880_v1  ;;  %v2495_v16 = vld [vmem:[#allocation2 + $0x8] sm:$0xff]  ;;  %v2501_v20 = vld [vmem:[#allocation2 + $0x10] sm:$0xff]  ;;  %v206_v25 = vunpack.c.l.s8.bf16 %v2511_v23  ;;  %v207_v26 = vunpack.c.h.s8.bf16 %v2511_v23  ;;  %v1894_v27 = vld [vmem:[#allocation7 + $0x38] sm:$0xff]  }
  0xe2   :  { %1626 = vmatprep.subr.bf16.mxu0 %v1881_v2  ;;  %v202_v19 = vunpack.c.l.s8.bf16 %v2495_v16  ;;  %v203_v21 = vunpack.c.h.s8.bf16 %v2495_v16  ;;  %v204_v22 = vunpack.c.l.s8.bf16 %v2501_v20  ;;  %v205_v24 = vunpack.c.h.s8.bf16 %v2501_v20  ;;  %v1895_v28 = vld [vmem:[#allocation10] sm:$0xff]   ;;  %v1896_v29 = vld [vmem:[#allocation10 + $0x8] sm:$0xff]   ;;  %v1897_v30 = vld [vmem:[#allocation10 + $0x10] sm:$0xff]   ;;  %p2199_p2 = pnand %p2198_p1, %p2192_p12 }
  0xe3   :  { %1657 = vmatpush3.bf16.msra.mxu1 %v1888_v7  ;;  %v1898_v31 = vld [vmem:[#allocation10 + $0x18] sm:$0xff]   ;;  %v1899_v32 = vld [vmem:[#allocation10 + $0x20] sm:$0xff]   ;;  %v1900_v33 = vld [vmem:[#allocation10 + $0x28] sm:$0xff]  }
  0xe4   :  { %1658 = vmatprep.subr.bf16.mxu1 %v1889_v9  ;;  %v1901_v58 = vld [vmem:[#allocation10 + $0x30] sm:$0xff]   ;;  %v1902_v59 = vld [vmem:[#allocation10 + $0x38] sm:$0xff]   ;;  %v1915_v20 = vld [vmem:[#allocation16 + $0x20] sm:$0xff]  }
  0xe5   :  { %1627 = vmatpush3.bf16.msra.mxu0 %v1881_v2  ;;  %v1465_v60 = vld [vmem:[#allocation8] ss:$0 sm:$0xff]  ;;  %v1913_v16 = vld [vmem:[#allocation16 + $0x10] sm:$0xff]  }
  0xe6   :  { %1628 = vmatprep.subr.bf16.mxu0 %v1882_v3  ;;  %v1910_v4 = vld [vmem:[#allocation13 + $0x38] sm:$0xff]  }
  0xe7   :  { %1659 = vmatpush3.bf16.msra.mxu1 %v1889_v9 }
  0xe8   :  { %1660 = vmatprep.subr.bf16.mxu1 %v1890_v11 }
  0xe9   :  { %1629 = vmatpush3.bf16.msra.mxu0 %v1882_v3 }
  0xea   :  { %1630 = vmatprep.subr.bf16.mxu0 %v1883_v8 }
  0xeb   :  { %1661 = vmatpush3.bf16.msra.mxu1 %v1890_v11 }
  0xec   :  { %1662 = vmatprep.subr.bf16.mxu1 %v1891_v13 }
  0xed   :  { %1631 = vmatpush3.bf16.msra.mxu0 %v1883_v8 }
  0xee   :  { %1632 = vmatprep.subr.bf16.mxu0 %v1884_v10 }
  0xef   :  { %1663 = vmatpush3.bf16.msra.mxu1 %v1891_v13 }
  0xf0   :  { %1664 = vmatprep.subr.bf16.mxu1 %v1892_v15 }
  0xf1   :  { %1633 = vmatpush3.bf16.msra.mxu0 %v1884_v10 }
  0xf2   :  { %1634 = vmatprep.subr.bf16.mxu0 %v1885_v12 }
  0xf3   :  { %1665 = vmatpush3.bf16.msra.mxu1 %v1892_v15 }
  0xf4   :  { %1666 = vmatprep.subr.bf16.mxu1 %v1893_v17 }
  0xf5   :  { %1635 = vmatpush3.bf16.msra.mxu0 %v1885_v12 }
  0xf6   :  { %1636 = vmatprep.subr.bf16.mxu0 %v1886_v14 }
  0xf7   :  { %1667 = vmatpush3.bf16.msra.mxu1 %v1893_v17 }
  0xf8   :  { %1668 = vmatprep.subr.bf16.mxu1 %v1894_v27 }
  0xf9   :  { %1637 = vmatpush3.bf16.msra.mxu0 %v1886_v14 }
  0xfa   :  { %1686 = vmatprep.subr.bf16.mxu0 %v1895_v28 }
  0xfb   :  { %1669 = vmatpush3.bf16.msra.mxu1 %v1894_v27 }
  0xfc   :  { %1639 = vmatmul.mubr.bf16.vlgmr.msra.gmra.mrb[0].mxu0 %v201_v18 }
  0xfd   :  { %1642 = vmatprep.mubr.bf16.mxu0 %v202_v19  ;;  %1687 = vmatpush3.bf16.msra.mxu0 %v1895_v28 }
  0xfe   :  { %1688 = vmatprep.subr.bf16.mxu0 %v1896_v29 }
 0x101   :  { %1689 = vmatpush3.bf16.msra.mxu0 %v1896_v29 }
 0x102   :  { %1690 = vmatprep.subr.bf16.mxu0 %v1897_v30 }
 0x104   :  { %1643 = vmatmul.mubr.bf16.gmra.mrb[4].mxu0 %v203_v21 }
 0x105   :  { %1646 = vmatprep.mubr.bf16.mxu0 %v204_v22  ;;  %1691 = vmatpush3.bf16.msra.mxu0 %v1897_v30 }
 0x106   :  { %1692 = vmatprep.subr.bf16.mxu0 %v1898_v31 }
 0x109   :  { %1693 = vmatpush3.bf16.msra.mxu0 %v1898_v31 }
 0x10a   :  { %1694 = vmatprep.subr.bf16.mxu0 %v1899_v32 }
 0x10c   :  { %1647 = vmatmul.mubr.bf16.gmra.mrb[8].mxu0 %v205_v24 }
 0x10d   :  { %1650 = vmatprep.mubr.bf16.mxu0 %v206_v25  ;;  %1695 = vmatpush3.bf16.msra.mxu0 %v1899_v32 }
 0x10e   :  { %1696 = vmatprep.subr.bf16.mxu0 %v1900_v33 }
 0x111   :  { %1697 = vmatpush3.bf16.msra.mxu0 %v1900_v33 }
 0x112   :  { %1698 = vmatprep.subr.bf16.mxu0 %v1901_v58 }
 0x114   :  { %1651 = vmatmul.mubr.bf16.gmra.mrb[12].mxu0 %v207_v26 }
 0x115   :  { %1699 = vmatpush3.bf16.msra.mxu0 %v1901_v58 }
 0x116   :  { %1700 = vmatprep.subr.bf16.mxu0 %v1902_v59 }
 0x119   :  { %1701 = vmatpush3.bf16.msra.mxu0 %v1902_v59 }
 0x1cf   :  { %v1640_v34 = vpop.f32.mrb[0].mxu0 }
 0x1d0   :  { %v306_v35 = vpop.f32.mrb[1].mxu0 }
 0x1d1   :  { %v1641_v36 = vpop.f32.mrb[2].mxu0 }
 0x1d2   :  { %v370_v37 = vpack.c.bf16 %v1641_v36, %v1640_v34  ;;  %v309_v38 = vpop.f32.mrb[3].mxu0 }
 0x1d3   :  { %v369_v39 = vpack.c.bf16 %v309_v38, %v306_v35 }
 0x1d5   :  { %1670 = vmatprep.mubr.bf16.mxu1 %v369_v39 }
 0x1d6   :  { %1671 = vmatmul.mubr.bf16.vlgmr.msra.gmra.mrb[0].mxu1 %v370_v37 }
 0x1d7   :  { %v1644_v40 = vpop.f32.mrb[4].mxu0 }
 0x1d8   :  { %v322_v41 = vpop.f32.mrb[5].mxu0 }
 0x1d9   :  { %v1645_v42 = vpop.f32.mrb[6].mxu0 }
 0x1da   :  { %v372_v43 = vpack.c.bf16 %v1645_v42, %v1644_v40  ;;  %v325_v44 = vpop.f32.mrb[7].mxu0 }
 0x1db   :  { %v371_v45 = vpack.c.bf16 %v325_v44, %v322_v41 }
 0x1dd   :  { %1674 = vmatprep.mubr.bf16.mxu1 %v371_v45 }
 0x1de   :  { %1675 = vmatmul.mubr.bf16.gmra.mrb[4].mxu1 %v372_v43 }
 0x1df   :  { %v1648_v46 = vpop.f32.mrb[8].mxu0 }
 0x1e0   :  { %v338_v47 = vpop.f32.mrb[9].mxu0 }
 0x1e1   :  { %v1649_v48 = vpop.f32.mrb[10].mxu0 }
 0x1e2   :  { %v374_v49 = vpack.c.bf16 %v1649_v48, %v1648_v46  ;;  %v341_v50 = vpop.f32.mrb[11].mxu0 }
 0x1e3   :  { %v373_v51 = vpack.c.bf16 %v341_v50, %v338_v47 }
 0x1e5   :  { %1678 = vmatprep.mubr.bf16.mxu1 %v373_v51 }
 0x1e6   :  { %1679 = vmatmul.mubr.bf16.gmra.mrb[8].mxu1 %v374_v49 }
 0x1e7   :  { %v1652_v52 = vpop.f32.mrb[12].mxu0 }
 0x1e8   :  { %v354_v53 = vpop.f32.mrb[13].mxu0 }
 0x1e9   :  { %v1653_v54 = vpop.f32.mrb[14].mxu0 }
 0x1ea   :  { %v376_v55 = vpack.c.bf16 %v1653_v54, %v1652_v52  ;;  %v357_v56 = vpop.f32.mrb[15].mxu0 }
 0x1eb   :  { %v375_v57 = vpack.c.bf16 %v357_v56, %v354_v53 }
 0x1ed   :  { %1682 = vmatprep.mubr.bf16.mxu1 %v375_v57 }
 0x1ee   :  { %1683 = vmatmul.mubr.bf16.gmra.mrb[12].mxu1 %v376_v55 }
 0x1ef   :  { %1734 = vmatprep.mubr.bf16.mxu1 %v200_v5 }
 0x2a9   :  { %v1672_v61 = vpop.f32.mrb[0].mxu1 }
 0x2aa   :  { %v491_v62 = vadd.f32 %v1672_v61, %v1465_v60  ;;  %v482_v63 = vpop.f32.mrb[1].mxu1 }
 0x2ab   :  { %v483_v0 = vadd.f32 %v1465_v60, %v482_v63  ;;  %v1673_v1 = vpop.f32.mrb[2].mxu1 }
 0x2ac   :  { %v494_v2 = vadd.f32 %v1673_v1, %v1465_v60  ;;  %v485_v3 = vpop.f32.mrb[3].mxu1  ;;  %v547_v7 = vmax.f32 %v491_v62, 0.0  ;;  %v1903_v1 = vld [vmem:[#allocation13] sm:$0xff]  }
 0x2ad   :  { %v486_v6 = vadd.f32 %v1465_v60, %v485_v3  ;;  %v545_v9 = vmax.f32 %v483_v0, 0.0  ;;  %1750 = vmatprep.subr.bf16.mxu0 %v1903_v1  ;;  %v1905_v3 = vld [vmem:[#allocation13 + $0x10] sm:$0xff]  }
 0x2ae   :  { %v548_v8 = vmax.f32 %v494_v2, 0.0  ;;  %v1904_v2 = vld [vmem:[#allocation13 + $0x8] sm:$0xff]  }
 0x2af   :  { %v546_v10 = vmax.f32 %v486_v6, 0.0  ;;  %v1906_v6 = vld [vmem:[#allocation13 + $0x18] sm:$0xff]  }
 0x2b0   :  { %v562_v5 = vpack.c.bf16 %v548_v8, %v547_v7  ;;  %v1908_v7 = vld [vmem:[#allocation13 + $0x28] sm:$0xff]   ;;  %v1909_v8 = vld [vmem:[#allocation13 + $0x30] sm:$0xff]  }
 0x2b1   :  { %v561_v11 = vpack.c.bf16 %v546_v10, %v545_v9  ;;  %v1676_v12 = vpop.f32.mrb[4].mxu1  ;;  %v1474_v9 = vld [vmem:[#allocation11] ss:$0 sm:$0xff] }
 0x2b2   :  { %v507_v13 = vadd.f32 %v1676_v12, %v1465_v60  ;;  %v498_v14 = vpop.f32.mrb[5].mxu1 }
 0x2b3   :  { %v499_v15 = vadd.f32 %v1465_v60, %v498_v14  ;;  %v1677_v17 = vpop.f32.mrb[6].mxu1  ;;  %1702 = vmatprep.mubr.bf16.mxu0 %v561_v11 }
 0x2b4   :  { %v510_v27 = vadd.f32 %v1677_v17, %v1465_v60  ;;  %v501_v28 = vpop.f32.mrb[7].mxu1  ;;  %1703 = vmatmul.mubr.bf16.vlgmr.msra.gmra.mrb[16].mxu0 %v562_v5  ;;  %v551_v30 = vmax.f32 %v507_v13, 0.0 }
 0x2b5   :  { %v502_v29 = vadd.f32 %v1465_v60, %v501_v28  ;;  %v549_v32 = vmax.f32 %v499_v15, 0.0  ;;  %1751 = vmatpush3.bf16.msra.mxu0 %v1903_v1 }
 0x2b6   :  { %v552_v31 = vmax.f32 %v510_v27, 0.0  ;;  %1752 = vmatprep.subr.bf16.mxu0 %v1904_v2 }
 0x2b7   :  { %v550_v33 = vmax.f32 %v502_v29, 0.0 }
 0x2b8   :  { %v564_v34 = vpack.c.bf16 %v552_v31, %v551_v30 }
 0x2b9   :  { %v563_v35 = vpack.c.bf16 %v550_v33, %v549_v32  ;;  %v1680_v36 = vpop.f32.mrb[8].mxu1  ;;  %1753 = vmatpush3.bf16.msra.mxu0 %v1904_v2 }
 0x2ba   :  { %v523_v37 = vadd.f32 %v1680_v36, %v1465_v60  ;;  %v514_v38 = vpop.f32.mrb[9].mxu1  ;;  %1754 = vmatprep.subr.bf16.mxu0 %v1905_v3 }
 0x2bb   :  { %v515_v39 = vadd.f32 %v1465_v60, %v514_v38  ;;  %v1681_v40 = vpop.f32.mrb[10].mxu1  ;;  %1706 = vmatprep.mubr.bf16.mxu0 %v563_v35 }
 0x2bc   :  { %v526_v41 = vadd.f32 %v1681_v40, %v1465_v60  ;;  %v517_v42 = vpop.f32.mrb[11].mxu1  ;;  %1707 = vmatmul.mubr.bf16.gmra.mrb[20].mxu0 %v564_v34  ;;  %v555_v44 = vmax.f32 %v523_v37, 0.0 }
 0x2bd   :  { %v518_v43 = vadd.f32 %v1465_v60, %v517_v42  ;;  %v553_v46 = vmax.f32 %v515_v39, 0.0  ;;  %1755 = vmatpush3.bf16.msra.mxu0 %v1905_v3 }
 0x2be   :  { %v556_v45 = vmax.f32 %v526_v41, 0.0  ;;  %1756 = vmatprep.subr.bf16.mxu0 %v1906_v6 }
 0x2bf   :  { %v554_v47 = vmax.f32 %v518_v43, 0.0 }
 0x2c0   :  { %v566_v48 = vpack.c.bf16 %v556_v45, %v555_v44 }
 0x2c1   :  { %v565_v49 = vpack.c.bf16 %v554_v47, %v553_v46  ;;  %v1684_v50 = vpop.f32.mrb[12].mxu1  ;;  %1757 = vmatpush3.bf16.msra.mxu0 %v1906_v6 }
 0x2c2   :  { %v539_v51 = vadd.f32 %v1684_v50, %v1465_v60  ;;  %v530_v52 = vpop.f32.mrb[13].mxu1 }
 0x2c3   :  { %v531_v53 = vadd.f32 %v1465_v60, %v530_v52  ;;  %v1685_v54 = vpop.f32.mrb[14].mxu1  ;;  %1710 = vmatprep.mubr.bf16.mxu0 %v565_v49 }
 0x2c4   :  { %v542_v55 = vadd.f32 %v1685_v54, %v1465_v60  ;;  %v533_v56 = vpop.f32.mrb[15].mxu1  ;;  %1711 = vmatmul.mubr.bf16.gmra.mrb[24].mxu0 %v566_v48  ;;  %v559_v58 = vmax.f32 %v539_v51, 0.0 }
 0x2c5   :  { %v534_v57 = vadd.f32 %v1465_v60, %v533_v56  ;;  %v557_v61 = vmax.f32 %v531_v53, 0.0  ;;  %v1907_v60 = vld [vmem:[#allocation13 + $0x20] sm:$0xff]  }
 0x2c6   :  { %v560_v59 = vmax.f32 %v542_v55, 0.0  ;;  %1758 = vmatprep.subr.bf16.mxu0 %v1907_v60 }
 0x2c7   :  { %v558_v62 = vmax.f32 %v534_v57, 0.0  ;;  %1759 = vmatpush3.bf16.msra.mxu0 %v1907_v60 }
 0x2c8   :  { %v568_v63 = vpack.c.bf16 %v560_v59, %v559_v58  ;;  %1760 = vmatprep.subr.bf16.mxu0 %v1908_v7 }
 0x2c9   :  { %v567_v0 = vpack.c.bf16 %v558_v62, %v557_v61 }
 0x2cb   :  { %1714 = vmatprep.mubr.bf16.mxu0 %v567_v0  ;;  %1761 = vmatpush3.bf16.msra.mxu0 %v1908_v7 }
 0x2cc   :  { %1715 = vmatmul.mubr.bf16.gmra.mrb[28].mxu0 %v568_v63  ;;  %1762 = vmatprep.subr.bf16.mxu0 %v1909_v8 }
 0x2cf   :  { %1763 = vmatpush3.bf16.msra.mxu0 %v1909_v8 }
 0x2d0   :  { %1764 = vmatprep.subr.bf16.mxu0 %v1910_v4 }
 0x2d3   :  { %1765 = vmatpush3.bf16.msra.mxu0 %v1910_v4 }
 0x387   :  { %v1704_v10 = vpop.f32.mrb[16].mxu0 }
 0x388   :  { %v683_v5 = vadd.f32 %v1704_v10, %v1474_v9  ;;  %v674_v11 = vpop.f32.mrb[17].mxu0 }
 0x389   :  { %v675_v12 = vadd.f32 %v1474_v9, %v674_v11  ;;  %v1705_v13 = vpop.f32.mrb[18].mxu0 }
 0x38a   :  { %v686_v14 = vadd.f32 %v1705_v13, %v1474_v9  ;;  %v677_v15 = vpop.f32.mrb[19].mxu0  ;;  %v739_v27 = vmax.f32 %v683_v5, 0.0 }
 0x38b   :  { %v678_v17 = vadd.f32 %v1474_v9, %v677_v15  ;;  %v737_v29 = vmax.f32 %v675_v12, 0.0 }
 0x38c   :  { %v740_v28 = vmax.f32 %v686_v14, 0.0 }
 0x38d   :  { %v738_v30 = vmax.f32 %v678_v17, 0.0 }
 0x38e   :  { %v754_v31 = vpack.c.bf16 %v740_v28, %v739_v27 }
 0x38f   :  { %v753_v32 = vpack.c.bf16 %v738_v30, %v737_v29  ;;  %v1708_v33 = vpop.f32.mrb[20].mxu0 }
 0x390   :  { %v699_v34 = vadd.f32 %v1708_v33, %v1474_v9  ;;  %v690_v35 = vpop.f32.mrb[21].mxu0 }
 0x391   :  { %v691_v36 = vadd.f32 %v1474_v9, %v690_v35  ;;  %v1709_v37 = vpop.f32.mrb[22].mxu0  ;;  %1718 = vmatprep.subr.bf16.mxu1 %v753_v32 }
 0x392   :  { %v702_v38 = vadd.f32 %v1709_v37, %v1474_v9  ;;  %v693_v39 = vpop.f32.mrb[23].mxu0  ;;  %1719 = vmatpush3.bf16.msra.mxu1 %v753_v32  ;;  %v743_v41 = vmax.f32 %v699_v34, 0.0 }
 0x393   :  { %v694_v40 = vadd.f32 %v1474_v9, %v693_v39  ;;  %1720 = vmatprep.subr.bf16.mxu1 %v754_v31  ;;  %v741_v43 = vmax.f32 %v691_v36, 0.0 }
 0x394   :  { %v744_v42 = vmax.f32 %v702_v38, 0.0 }
 0x395   :  { %v742_v44 = vmax.f32 %v694_v40, 0.0 }
 0x396   :  { %v756_v45 = vpack.c.bf16 %v744_v42, %v743_v41  ;;  %1721 = vmatpush3.bf16.msra.mxu1 %v754_v31  ;;  %v1917_v42 = vld [vmem:[#allocation16 + $0x30] sm:$0xff]  }
 0x397   :  { %v755_v46 = vpack.c.bf16 %v742_v44, %v741_v43  ;;  %v1712_v47 = vpop.f32.mrb[24].mxu0  ;;  %v1918_v43 = vld [vmem:[#allocation16 + $0x38] sm:$0xff]   ;;  %v1919_v44 = vld [vmem:[#allocation19] sm:$0xff]  }
 0x398   :  { %v715_v48 = vadd.f32 %v1712_v47, %v1474_v9  ;;  %v706_v49 = vpop.f32.mrb[25].mxu0  ;;  %1814 = vmatprep.subr.bf16.mxu0 %v1919_v44  ;;  %v2538_v47 = vld [vmem:[#allocation19 + $0x18] sm:$0xff]  }
 0x399   :  { %v707_v50 = vadd.f32 %v1474_v9, %v706_v49  ;;  %v1713_v51 = vpop.f32.mrb[26].mxu0  ;;  %1722 = vmatprep.subr.bf16.mxu1 %v755_v46  ;;  %v2545_v49 = vld [vmem:[#allocation19 + $0x28] sm:$0xff]  }
 0x39a   :  { %v718_v52 = vadd.f32 %v1713_v51, %v1474_v9  ;;  %v709_v53 = vpop.f32.mrb[27].mxu0  ;;  %1723 = vmatpush3.bf16.msra.mxu1 %v755_v46  ;;  %v747_v55 = vmax.f32 %v715_v48, 0.0  ;;  %v1921_v46 = vld [vmem:[#allocation19 + $0x10] sm:$0xff]   ;;  %v2541_v48 = vld [vmem:[#allocation19 + $0x20] sm:$0xff]  }
 0x39b   :  { %v710_v54 = vadd.f32 %v1474_v9, %v709_v53  ;;  %1724 = vmatprep.subr.bf16.mxu1 %v756_v45  ;;  %v745_v57 = vmax.f32 %v707_v50, 0.0  ;;  %v2550_v50 = vld [vmem:[#allocation14] ss:$0 sm:$0xff] }
 0x39c   :  { %v748_v56 = vmax.f32 %v718_v52, 0.0 }
 0x39d   :  { %v746_v58 = vmax.f32 %v710_v54, 0.0 }
 0x39e   :  { %v758_v59 = vpack.c.bf16 %v748_v56, %v747_v55  ;;  %1725 = vmatpush3.bf16.msra.mxu1 %v756_v45  ;;  %v1920_v45 = vld [vmem:[#allocation19 + $0x8] sm:$0xff]  }
 0x39f   :  { %v757_v61 = vpack.c.bf16 %v746_v58, %v745_v57  ;;  %v1716_v62 = vpop.f32.mrb[28].mxu0 }
 0x3a0   :  { %v731_v63 = vadd.f32 %v1716_v62, %v1474_v9  ;;  %v722_v0 = vpop.f32.mrb[29].mxu0 }
 0x3a1   :  { %v723_v1 = vadd.f32 %v1474_v9, %v722_v0  ;;  %v1717_v2 = vpop.f32.mrb[30].mxu0  ;;  %1726 = vmatprep.subr.bf16.mxu1 %v757_v61 }
 0x3a2   :  { %v734_v3 = vadd.f32 %v1717_v2, %v1474_v9  ;;  %v725_v6 = vpop.f32.mrb[31].mxu0  ;;  %1727 = vmatpush3.bf16.msra.mxu1 %v757_v61  ;;  %v751_v7 = vmax.f32 %v731_v63, 0.0 }
 0x3a3   :  { %v726_v60 = vadd.f32 %v1474_v9, %v725_v6  ;;  %1728 = vmatprep.subr.bf16.mxu1 %v758_v59  ;;  %v749_v10 = vmax.f32 %v723_v1, 0.0 }
 0x3a4   :  { %v752_v8 = vmax.f32 %v734_v3, 0.0 }
 0x3a5   :  { %v750_v5 = vmax.f32 %v726_v60, 0.0 }
 0x3a6   :  { %v760_v11 = vpack.c.bf16 %v752_v8, %v751_v7  ;;  %1729 = vmatpush3.bf16.msra.mxu1 %v758_v59 }
 0x3a7   :  { %v759_v12 = vpack.c.bf16 %v750_v5, %v749_v10 }
 0x3a9   :  { %1730 = vmatprep.subr.bf16.mxu1 %v759_v12 }
 0x3aa   :  { %1731 = vmatpush3.bf16.msra.mxu1 %v759_v12 }
 0x3ab   :  { %1732 = vmatprep.subr.bf16.mxu1 %v760_v11 }
 0x3ae   :  { %1733 = vmatpush3.bf16.msra.mxu1 %v760_v11 }
 0x3b1   :  { %1735 = vmatmul.mubr.bf16.vlgmr.msra.gmra.mrb[16].mxu1 %v201_v18  ;;  %v1911_v18 = vld [vmem:[#allocation16] sm:$0xff]  }
 0x3b2   :  { %1738 = vmatprep.mubr.bf16.mxu1 %v202_v19  ;;  %v1912_v19 = vld [vmem:[#allocation16 + $0x8] sm:$0xff]   ;;  %1782 = vmatprep.subr.bf16.mxu1 %v1911_v18 }
 0x3b3   :  { %1783 = vmatpush3.bf16.msra.mxu1 %v1911_v18 }
 0x3b4   :  { %1784 = vmatprep.subr.bf16.mxu1 %v1912_v19 }
 0x3b7   :  { %1785 = vmatpush3.bf16.msra.mxu1 %v1912_v19 }
 0x3b8   :  { %1786 = vmatprep.subr.bf16.mxu1 %v1913_v16 }
 0x3b9   :  { %1739 = vmatmul.mubr.bf16.gmra.mrb[20].mxu1 %v203_v21  ;;  %v1914_v21 = vld [vmem:[#allocation16 + $0x18] sm:$0xff]  }
 0x3ba   :  { %1742 = vmatprep.mubr.bf16.mxu1 %v204_v22  ;;  %v1916_v22 = vld [vmem:[#allocation16 + $0x28] sm:$0xff]  }
 0x3bb   :  { %1787 = vmatpush3.bf16.msra.mxu1 %v1913_v16 }
 0x3bc   :  { %1788 = vmatprep.subr.bf16.mxu1 %v1914_v21 }
 0x3bf   :  { %1789 = vmatpush3.bf16.msra.mxu1 %v1914_v21 }
 0x3c0   :  { %1790 = vmatprep.subr.bf16.mxu1 %v1915_v20 }
 0x3c1   :  { %1743 = vmatmul.mubr.bf16.gmra.mrb[24].mxu1 %v205_v24 }
 0x3c2   :  { %1746 = vmatprep.mubr.bf16.mxu1 %v206_v25 }
 0x3c3   :  { %1791 = vmatpush3.bf16.msra.mxu1 %v1915_v20 }
 0x3c4   :  { %1792 = vmatprep.subr.bf16.mxu1 %v1916_v22 }
 0x3c7   :  { %1793 = vmatpush3.bf16.msra.mxu1 %v1916_v22 }
 0x3c8   :  { %1794 = vmatprep.subr.bf16.mxu1 %v1917_v42 }
 0x3c9   :  { %1747 = vmatmul.mubr.bf16.gmra.mrb[28].mxu1 %v207_v26 }
 0x3cb   :  { %1795 = vmatpush3.bf16.msra.mxu1 %v1917_v42 }
 0x3cc   :  { %1796 = vmatprep.subr.bf16.mxu1 %v1918_v43 }
 0x3cf   :  { %1797 = vmatpush3.bf16.msra.mxu1 %v1918_v43  ;;  %v1925_v43 = vld [vmem:[#allocation19 + $0x30] sm:$0xff]  }
 0x3d0   :  { %1846 = vmatprep.subr.bf16.mxu1 %v1919_v44 }
 0x484   :  { %v1736_v23 = vpop.f32.mrb[16].mxu1 }
 0x485   :  { %v795_v24 = vpop.f32.mrb[17].mxu1 }
 0x486   :  { %v1737_v25 = vpop.f32.mrb[18].mxu1 }
 0x487   :  { %v859_v26 = vpack.c.bf16 %v1737_v25, %v1736_v23  ;;  %v798_v9 = vpop.f32.mrb[19].mxu1 }
 0x488   :  { %v858_v13 = vpack.c.bf16 %v798_v9, %v795_v24 }
 0x48a   :  { %1766 = vmatprep.mubr.bf16.mxu0 %v858_v13 }
 0x48b   :  { %1767 = vmatmul.mubr.bf16.vlgmr.msra.gmra.mrb[32].mxu0 %v859_v26 }
 0x48c   :  { %v1740_v14 = vpop.f32.mrb[20].mxu1  ;;  %1815 = vmatpush3.bf16.msra.mxu0 %v1919_v44 }
 0x48d   :  { %v811_v15 = vpop.f32.mrb[21].mxu1  ;;  %1816 = vmatprep.subr.bf16.mxu0 %v1920_v45 }
 0x48e   :  { %v1741_v17 = vpop.f32.mrb[22].mxu1 }
 0x48f   :  { %v861_v27 = vpack.c.bf16 %v1741_v17, %v1740_v14  ;;  %v814_v28 = vpop.f32.mrb[23].mxu1 }
 0x490   :  { %v860_v29 = vpack.c.bf16 %v814_v28, %v811_v15  ;;  %1817 = vmatpush3.bf16.msra.mxu0 %v1920_v45 }
 0x491   :  { %1818 = vmatprep.subr.bf16.mxu0 %v1921_v46 }
 0x492   :  { %1770 = vmatprep.mubr.bf16.mxu0 %v860_v29 }
 0x493   :  { %1771 = vmatmul.mubr.bf16.gmra.mrb[36].mxu0 %v861_v27 }
 0x494   :  { %v1744_v30 = vpop.f32.mrb[24].mxu1  ;;  %1819 = vmatpush3.bf16.msra.mxu0 %v1921_v46 }
 0x495   :  { %v827_v31 = vpop.f32.mrb[25].mxu1  ;;  %1820 = vmatprep.subr.bf16.mxu0 %v2538_v47 }
 0x496   :  { %v1745_v32 = vpop.f32.mrb[26].mxu1 }
 0x497   :  { %v863_v33 = vpack.c.bf16 %v1745_v32, %v1744_v30  ;;  %v830_v34 = vpop.f32.mrb[27].mxu1 }
 0x498   :  { %v862_v35 = vpack.c.bf16 %v830_v34, %v827_v31  ;;  %1821 = vmatpush3.bf16.msra.mxu0 %v2538_v47 }
 0x499   :  { %1822 = vmatprep.subr.bf16.mxu0 %v2541_v48 }
 0x49a   :  { %1774 = vmatprep.mubr.bf16.mxu0 %v862_v35 }
 0x49b   :  { %1775 = vmatmul.mubr.bf16.gmra.mrb[40].mxu0 %v863_v33 }
 0x49c   :  { %v1748_v36 = vpop.f32.mrb[28].mxu1  ;;  %1823 = vmatpush3.bf16.msra.mxu0 %v2541_v48 }
 0x49d   :  { %v843_v37 = vpop.f32.mrb[29].mxu1  ;;  %1824 = vmatprep.subr.bf16.mxu0 %v2545_v49 }
 0x49e   :  { %v1749_v38 = vpop.f32.mrb[30].mxu1 }
 0x49f   :  { %v865_v39 = vpack.c.bf16 %v1749_v38, %v1748_v36  ;;  %v846_v40 = vpop.f32.mrb[31].mxu1 }
 0x4a0   :  { %v864_v41 = vpack.c.bf16 %v846_v40, %v843_v37  ;;  %1825 = vmatpush3.bf16.msra.mxu0 %v2545_v49 }
 0x4a1   :  { %1826 = vmatprep.subr.bf16.mxu0 %v1925_v43 }
 0x4a2   :  { %1778 = vmatprep.mubr.bf16.mxu0 %v864_v41 }
 0x4a3   :  { %1779 = vmatmul.mubr.bf16.gmra.mrb[44].mxu0 %v865_v39 }
 0x4a4   :  { %1827 = vmatpush3.bf16.msra.mxu0 %v1925_v43 }
 0x55e   :  { %v1768_v51 = vpop.f32.mrb[32].mxu0 }
 0x55f   :  { %v980_v52 = vadd.f32 %v1768_v51, %v2550_v50  ;;  %v971_v53 = vpop.f32.mrb[33].mxu0 }
 0x560   :  { %v972_v54 = vadd.f32 %v2550_v50, %v971_v53  ;;  %v1769_v55 = vpop.f32.mrb[34].mxu0 }
 0x561   :  { %v983_v56 = vadd.f32 %v1769_v55, %v2550_v50  ;;  %v974_v57 = vpop.f32.mrb[35].mxu0  ;;  %v1036_v59 = vmax.f32 %v980_v52, 0.0 }
 0x562   :  { %v975_v58 = vadd.f32 %v2550_v50, %v974_v57  ;;  %v1034_v62 = vmax.f32 %v972_v54, 0.0 }
 0x563   :  { %v1037_v61 = vmax.f32 %v983_v56, 0.0 }
 0x564   :  { %v1035_v63 = vmax.f32 %v975_v58, 0.0 }
 0x565   :  { %v1051_v0 = vpack.c.bf16 %v1037_v61, %v1036_v59 }
 0x566   :  { %v1050_v1 = vpack.c.bf16 %v1035_v63, %v1034_v62  ;;  %v1772_v2 = vpop.f32.mrb[36].mxu0 }
 0x567   :  { %v996_v3 = vadd.f32 %v1772_v2, %v2550_v50  ;;  %v987_v6 = vpop.f32.mrb[37].mxu0 }
 0x568   :  { %v988_v60 = vadd.f32 %v2550_v50, %v987_v6  ;;  %v1773_v7 = vpop.f32.mrb[38].mxu0  ;;  %1798 = vmatprep.mubr.bf16.mxu1 %v1050_v1 }
 0x569   :  { %v999_v8 = vadd.f32 %v1773_v7, %v2550_v50  ;;  %v990_v10 = vpop.f32.mrb[39].mxu0  ;;  %1799 = vmatmul.mubr.bf16.vlgmr.msra.gmra.mrb[32].mxu1 %v1051_v0  ;;  %v1040_v11 = vmax.f32 %v996_v3, 0.0 }
 0x56a   :  { %v991_v5 = vadd.f32 %v2550_v50, %v990_v10  ;;  %1854 = vmatpush3.bf16.msra.mxu1 %v1919_v44  ;;  %v1038_v4 = vmax.f32 %v988_v60, 0.0  ;;  %v1926_v44 = vld [vmem:[#allocation19 + $0x38] sm:$0xff]  }
 0x56b   :  { %v1041_v12 = vmax.f32 %v999_v8, 0.0  ;;  %1847 = vmatprep.subr.bf16.mxu1 %v1920_v45  ;;  %1828 = vmatprep.subr.bf16.mxu0 %v1926_v44 }
 0x56c   :  { %v1039_v18 = vmax.f32 %v991_v5, 0.0  ;;  %1829 = vmatpush3.bf16.msra.mxu0 %v1926_v44 }
 0x56d   :  { %v1053_v19 = vpack.c.bf16 %v1041_v12, %v1040_v11 }
 0x56e   :  { %v1052_v16 = vpack.c.bf16 %v1039_v18, %v1038_v4  ;;  %v1776_v21 = vpop.f32.mrb[40].mxu0  ;;  %1855 = vmatpush3.bf16.msra.mxu1 %v1920_v45  ;;  %v1492_v45 = vld [vmem:[#allocation17] ss:$0 sm:$0xff] }
 0x56f   :  { %v1012_v20 = vadd.f32 %v1776_v21, %v2550_v50  ;;  %v1003_v22 = vpop.f32.mrb[41].mxu0  ;;  %1848 = vmatprep.subr.bf16.mxu1 %v1921_v46 }
 0x570   :  { %v1004_v23 = vadd.f32 %v2550_v50, %v1003_v22  ;;  %v1777_v24 = vpop.f32.mrb[42].mxu0  ;;  %1802 = vmatprep.mubr.bf16.mxu1 %v1052_v16 }
 0x571   :  { %v1015_v25 = vadd.f32 %v1777_v24, %v2550_v50  ;;  %v1006_v26 = vpop.f32.mrb[43].mxu0  ;;  %1803 = vmatmul.mubr.bf16.gmra.mrb[36].mxu1 %v1053_v19  ;;  %v1044_v13 = vmax.f32 %v1012_v20, 0.0 }
 0x572   :  { %v1007_v9 = vadd.f32 %v2550_v50, %v1006_v26  ;;  %1856 = vmatpush3.bf16.msra.mxu1 %v1921_v46  ;;  %v1042_v15 = vmax.f32 %v1004_v23, 0.0 }
 0x573   :  { %v1045_v14 = vmax.f32 %v1015_v25, 0.0  ;;  %1849 = vmatprep.subr.bf16.mxu1 %v2538_v47 }
 0x574   :  { %v1043_v17 = vmax.f32 %v1007_v9, 0.0 }
 0x575   :  { %v1055_v27 = vpack.c.bf16 %v1045_v14, %v1044_v13 }
 0x576   :  { %v1054_v28 = vpack.c.bf16 %v1043_v17, %v1042_v15  ;;  %v1780_v29 = vpop.f32.mrb[44].mxu0  ;;  %1857 = vmatpush3.bf16.msra.mxu1 %v2538_v47 }
 0x577   :  { %v1028_v30 = vadd.f32 %v1780_v29, %v2550_v50  ;;  %v1019_v31 = vpop.f32.mrb[45].mxu0  ;;  %1850 = vmatprep.subr.bf16.mxu1 %v2541_v48 }
 0x578   :  { %v1020_v32 = vadd.f32 %v2550_v50, %v1019_v31  ;;  %v1781_v33 = vpop.f32.mrb[46].mxu0  ;;  %1806 = vmatprep.mubr.bf16.mxu1 %v1054_v28 }
 0x579   :  { %v1031_v34 = vadd.f32 %v1781_v33, %v2550_v50  ;;  %v1022_v35 = vpop.f32.mrb[47].mxu0  ;;  %1807 = vmatmul.mubr.bf16.gmra.mrb[40].mxu1 %v1055_v27  ;;  %v1048_v37 = vmax.f32 %v1028_v30, 0.0 }
 0x57a   :  { %v1023_v36 = vadd.f32 %v2550_v50, %v1022_v35  ;;  %1858 = vmatpush3.bf16.msra.mxu1 %v2541_v48  ;;  %v1046_v39 = vmax.f32 %v1020_v32, 0.0 }
 0x57b   :  { %v1049_v38 = vmax.f32 %v1031_v34, 0.0  ;;  %1851 = vmatprep.subr.bf16.mxu1 %v2545_v49 }
 0x57c   :  { %v1047_v40 = vmax.f32 %v1023_v36, 0.0 }
 0x57d   :  { %v1057_v41 = vpack.c.bf16 %v1049_v38, %v1048_v37  ;;  %v1501_v38 = vld [vmem:[#allocation20] ss:$0 sm:$0xff] }
 0x57e   :  { %v1056_v42 = vpack.c.bf16 %v1047_v40, %v1046_v39  ;;  %1859 = vmatpush3.bf16.msra.mxu1 %v2545_v49 }
 0x57f   :  { %1852 = vmatprep.subr.bf16.mxu1 %v1925_v43 }
 0x580   :  { %1810 = vmatprep.mubr.bf16.mxu1 %v1056_v42 }
 0x581   :  { %1811 = vmatmul.mubr.bf16.gmra.mrb[44].mxu1 %v1057_v41 }
 0x582   :  { %1860 = vmatpush3.bf16.msra.mxu1 %v1925_v43 }
 0x583   :  { %1853 = vmatprep.subr.bf16.mxu1 %v1926_v44 }
 0x586   :  { %1861 = vmatpush3.bf16.msra.mxu1 %v1926_v44 }
 0x63c   :  { %v1800_v46 = vpop.f32.mrb[32].mxu1 }
 0x63d   :  { %v1172_v47 = vadd.f32 %v1800_v46, %v1492_v45  ;;  %v1163_v48 = vpop.f32.mrb[33].mxu1 }
 0x63e   :  { %v1164_v50 = vadd.f32 %v1492_v45, %v1163_v48  ;;  %v1801_v51 = vpop.f32.mrb[34].mxu1 }
 0x63f   :  { %v1175_v52 = vadd.f32 %v1801_v51, %v1492_v45  ;;  %v1166_v49 = vpop.f32.mrb[35].mxu1  ;;  %v1228_v54 = vmax.f32 %v1172_v47, 0.0 }
 0x640   :  { %v1167_v53 = vadd.f32 %v1492_v45, %v1166_v49  ;;  %v1226_v56 = vmax.f32 %v1164_v50, 0.0 }
 0x641   :  { %v1229_v55 = vmax.f32 %v1175_v52, 0.0 }
 0x642   :  { %v1227_v57 = vmax.f32 %v1167_v53, 0.0 }
 0x643   :  { %v1243_v58 = vpack.c.bf16 %v1229_v55, %v1228_v54 }
 0x644   :  { %v1242_v59 = vpack.c.bf16 %v1227_v57, %v1226_v56  ;;  %v1804_v61 = vpop.f32.mrb[36].mxu1 }
 0x645   :  { %v1188_v62 = vadd.f32 %v1804_v61, %v1492_v45  ;;  %v1179_v63 = vpop.f32.mrb[37].mxu1 }
 0x646   :  { %v1180_v0 = vadd.f32 %v1492_v45, %v1179_v63  ;;  %v1805_v1 = vpop.f32.mrb[38].mxu1  ;;  %1830 = vmatprep.mubr.bf16.mxu0 %v1242_v59 }
 0x647   :  { %v1191_v2 = vadd.f32 %v1805_v1, %v1492_v45  ;;  %v1182_v3 = vpop.f32.mrb[39].mxu1  ;;  %1831 = vmatmul.mubr.bf16.vlgmr.msra.gmra.mrb[48].mxu0 %v1243_v58  ;;  %v1232_v60 = vmax.f32 %v1188_v62, 0.0 }
 0x648   :  { %v1183_v6 = vadd.f32 %v1492_v45, %v1182_v3  ;;  %v1230_v8 = vmax.f32 %v1180_v0, 0.0 }
 0x649   :  { %v1233_v7 = vmax.f32 %v1191_v2, 0.0 }
 0x64a   :  { %v1231_v10 = vmax.f32 %v1183_v6, 0.0 }
 0x64b   :  { %v1245_v5 = vpack.c.bf16 %v1233_v7, %v1232_v60 }
 0x64c   :  { %v1244_v11 = vpack.c.bf16 %v1231_v10, %v1230_v8  ;;  %v1808_v12 = vpop.f32.mrb[40].mxu1 }
 0x64d   :  { %v1204_v4 = vadd.f32 %v1808_v12, %v1492_v45  ;;  %v1195_v18 = vpop.f32.mrb[41].mxu1 }
 0x64e   :  { %v1196_v19 = vadd.f32 %v1492_v45, %v1195_v18  ;;  %v1809_v16 = vpop.f32.mrb[42].mxu1  ;;  %1834 = vmatprep.mubr.bf16.mxu0 %v1244_v11 }
 0x64f   :  { %v1207_v21 = vadd.f32 %v1809_v16, %v1492_v45  ;;  %v1198_v20 = vpop.f32.mrb[43].mxu1  ;;  %1835 = vmatmul.mubr.bf16.gmra.mrb[52].mxu0 %v1245_v5  ;;  %v1236_v23 = vmax.f32 %v1204_v4, 0.0 }
 0x650   :  { %v1199_v22 = vadd.f32 %v1492_v45, %v1198_v20  ;;  %v1234_v25 = vmax.f32 %v1196_v19, 0.0 }
 0x651   :  { %v1237_v24 = vmax.f32 %v1207_v21, 0.0 }
 0x652   :  { %v1235_v26 = vmax.f32 %v1199_v22, 0.0 }
 0x653   :  { %v1247_v9 = vpack.c.bf16 %v1237_v24, %v1236_v23 }
 0x654   :  { %v1246_v13 = vpack.c.bf16 %v1235_v26, %v1234_v25  ;;  %v1812_v14 = vpop.f32.mrb[44].mxu1 }
 0x655   :  { %v1220_v15 = vadd.f32 %v1812_v14, %v1492_v45  ;;  %v1211_v17 = vpop.f32.mrb[45].mxu1 }
 0x656   :  { %v1212_v27 = vadd.f32 %v1492_v45, %v1211_v17  ;;  %v1813_v28 = vpop.f32.mrb[46].mxu1  ;;  %1838 = vmatprep.mubr.bf16.mxu1 %v1246_v13 }
 0x657   :  { %v1223_v29 = vadd.f32 %v1813_v28, %v1492_v45  ;;  %v1214_v30 = vpop.f32.mrb[47].mxu1  ;;  %1839 = vmatmul.mubr.bf16.vlgmr.msra.gmra.mrb[48].mxu1 %v1247_v9  ;;  %v1240_v32 = vmax.f32 %v1220_v15, 0.0 }
 0x658   :  { %v1215_v31 = vadd.f32 %v1492_v45, %v1214_v30  ;;  %v1238_v34 = vmax.f32 %v1212_v27, 0.0 }
 0x659   :  { %v1241_v33 = vmax.f32 %v1223_v29, 0.0 }
 0x65a   :  { %v1239_v35 = vmax.f32 %v1215_v31, 0.0 }
 0x65b   :  { %v1249_v36 = vpack.c.bf16 %v1241_v33, %v1240_v32 }
 0x65c   :  { %v1248_v37 = vpack.c.bf16 %v1239_v35, %v1238_v34 }
 0x65e   :  { %1842 = vmatprep.mubr.bf16.mxu1 %v1248_v37 }
 0x65f   :  { %1843 = vmatmul.mubr.bf16.gmra.mrb[52].mxu1 %v1249_v36 }
 0x71a   :  { %v1832_v39 = vpop.f32.mrb[48].mxu0 }
 0x71b   :  { %v1364_v40 = vadd.f32 %v1832_v39, %v1501_v38  ;;  %v1355_v41 = vpop.f32.mrb[49].mxu0 }
 0x71c   :  { %v1356_v42 = vadd.f32 %v1501_v38, %v1355_v41  ;;  %v1833_v43 = vpop.f32.mrb[50].mxu0 }
 0x71d   :  { %1420 = vst [vmem:[#allocation22 + $0x10] sm:$0xff] %v1364_v40  ;;  %v1367_v44 = vadd.f32 %v1833_v43, %v1501_v38  ;;  %v1358_v46 = vpop.f32.mrb[51].mxu0 }
 0x71e   :  { %1418 = vst [vmem:[#allocation22] sm:$0xff] %v1356_v42  ;;  %v1359_v47 = vadd.f32 %v1501_v38, %v1358_v46 }
 0x71f   :  { %1421 = vst [vmem:[#allocation22 + $0x18] sm:$0xff] %v1367_v44 }
 0x720   :  { %1419 = vst [vmem:[#allocation22 + $0x8] sm:$0xff] %v1359_v47 }
 0x722   :  { %v1836_v45 = vpop.f32.mrb[52].mxu0 }
 0x723   :  { %v1380_v48 = vadd.f32 %v1836_v45, %v1501_v38  ;;  %v1371_v50 = vpop.f32.mrb[53].mxu0 }
 0x724   :  { %v1372_v51 = vadd.f32 %v1501_v38, %v1371_v50  ;;  %v1837_v52 = vpop.f32.mrb[54].mxu0 }
 0x725   :  { %1424 = vst [vmem:[#allocation22 + $0x30] sm:$0xff] %v1380_v48  ;;  %v1383_v49 = vadd.f32 %v1837_v52, %v1501_v38  ;;  %v1374_v53 = vpop.f32.mrb[55].mxu0 }
 0x726   :  { %1422 = vst [vmem:[#allocation22 + $0x20] sm:$0xff] %v1372_v51  ;;  %v1375_v54 = vadd.f32 %v1501_v38, %v1374_v53 }
 0x727   :  { %1425 = vst [vmem:[#allocation22 + $0x38] sm:$0xff] %v1383_v49 }
 0x728   :  { %1423 = vst [vmem:[#allocation22 + $0x28] sm:$0xff] %v1375_v54 }
 0x72a   :  { %v1840_v55 = vpop.f32.mrb[48].mxu1 }
 0x72b   :  { %v1396_v56 = vadd.f32 %v1840_v55, %v1501_v38  ;;  %v1387_v57 = vpop.f32.mrb[49].mxu1 }
 0x72c   :  { %v1388_v58 = vadd.f32 %v1501_v38, %v1387_v57  ;;  %v1841_v59 = vpop.f32.mrb[50].mxu1 }
 0x72d   :  { %1428 = vst [vmem:[#allocation22 + $0x50] sm:$0xff] %v1396_v56  ;;  %v1399_v61 = vadd.f32 %v1841_v59, %v1501_v38  ;;  %v1390_v62 = vpop.f32.mrb[51].mxu1 }
 0x72e   :  { %1426 = vst [vmem:[#allocation22 + $0x40] sm:$0xff] %v1388_v58  ;;  %v1391_v63 = vadd.f32 %v1501_v38, %v1390_v62 }
 0x72f   :  { %1429 = vst [vmem:[#allocation22 + $0x58] sm:$0xff] %v1399_v61 }
 0x730   :  { %1427 = vst [vmem:[#allocation22 + $0x48] sm:$0xff] %v1391_v63 }
 0x732   :  { %v1844_v0 = vpop.f32.mrb[52].mxu1 }
 0x733   :  { %v1412_v1 = vadd.f32 %v1844_v0, %v1501_v38  ;;  %v1403_v2 = vpop.f32.mrb[53].mxu1 }
 0x734   :  { %v1404_v3 = vadd.f32 %v1501_v38, %v1403_v2  ;;  %v1845_v6 = vpop.f32.mrb[54].mxu1 }
 0x735   :  { %1432 = vst [vmem:[#allocation22 + $0x70] sm:$0xff] %v1412_v1  ;;  %v1415_v60 = vadd.f32 %v1845_v6, %v1501_v38  ;;  %v1406_v7 = vpop.f32.mrb[55].mxu1 }
 0x736   :  { %1430 = vst [vmem:[#allocation22 + $0x60] sm:$0xff] %v1404_v3  ;;  %v1407_v8 = vadd.f32 %v1501_v38, %v1406_v7 }
 0x737   :  { %1433 = vst [vmem:[#allocation22 + $0x78] sm:$0xff] %v1415_v60 }
 0x738   :  { %1431 = vst [vmem:[#allocation22 + $0x68] sm:$0xff] %v1407_v8 }
 0x739   :  { %2202 = shalt.err (!%p2199_p2)
}
 0x73a   :  { %s2203_s19 = scalar_lea.hbm %s2601_s12, 2048 }
 0x73b   :  { %p2204_p3 = scmp.ne.s32.totalorder %s2601_s12, %s2203_s19  ;;  %p2207_p4 = scmp.lt.u32.totalorder %s2203_s19, %s2601_s12 }
 0x73d   :  { %p2209_p5 = pnand %p2207_p4, %p2204_p3 }
 0x73f   :  { %2212 = shalt.err (!%p2209_p5)
}
 0x740   :  { %1445 = dma.vmem_to_hbm [thread:$0]  %s1440_s14, 2048, %s2601_s12, [#allocation4], %s2237_s9, %s2237_s9, %s2238_s22  }
 0x741   :  { %2227 = dma.done.wait [#allocation4], 2048  }
 0x742   :  { %2228 = vsyncadd [#allocation4], 4294965248 }
 0x743   :  { %1449 = vsyncpa [#allocation3], 1 }
 0x744   :  { %1450 = vsyncpa [#allocation6], 1 }
 0x745   :  { %1451 = vsyncpa [#allocation9], 1 }
 0x746   :  { %1452 = vsyncpa [#allocation12], 1 }
 0x747   :  { %1453 = vsyncpa [#allocation15], 1 }
 0x748   :  { %1454 = vsyncpa [#allocation18], 1 }
 0x749   :  { %1455 = vsyncpa [#allocation21], 1 }
 0x74a   :  { %1456 = vsyncpa [#allocation4], 1 }

// kernel: tpu_custom_call.1
= control target key start
LH: loop header
LB: loop body
LE: loop exit
PB: predicated region body
PF: predicated region fallthrough
CT: control target
= control target key end

     0   :  { %17 = vsyncpa [#allocation3], 0  ;;  %s2589_s0 = inlined_call_operand.hbm [shape: s8[128,128], index: 0, kind: input, shape index: {}]   ;;  %s2590_s1 = inlined_call_operand.hbm [shape: bf16[128,128], index: 1, kind: input, shape index: {}]   ;;  %s2591_s2 = inlined_call_operand.hbm [shape: bf16[128,128], index: 2, kind: input, shape index: {}]   ;;  %s2592_s3 = inlined_call_operand.hbm [shape: f32[1,128], index: 3, kind: input, shape index: {}]   ;;  %s2593_s4 = inlined_call_operand.hbm [shape: bf16[128,128], index: 4, kind: input, shape index: {}]   ;;  %s2594_s5 = inlined_call_operand.hbm [shape: f32[1,128], index: 5, kind: input, shape index: {}]   ;;  %s2595_s6 = inlined_call_operand.hbm [shape: bf16[128,128], index: 6, kind: input, shape index: {}]   ;;  %s2596_s7 = inlined_call_operand.hbm [shape: f32[1,128], index: 7, kind: input, shape index: {}]   ;;  %s2597_s8 = inlined_call_operand.hbm [shape: bf16[128,128], index: 8, kind: input, shape index: {}]   ;;  %s2598_s9 = inlined_call_operand.hbm [shape: f32[1,128], index: 9, kind: input, shape index: {}]   ;;  %s2599_s10 = inlined_call_operand.hbm [shape: bf16[128,128], index: 10, kind: input, shape index: {}]   ;;  %s2600_s11 = inlined_call_operand.hbm [shape: f32[1,128], index: 11, kind: input, shape index: {}]   ;;  %s2601_s12 = inlined_call_operand.hbm [shape: f32[128,128], index: 12, kind: output, shape index: {}]  }
   0x1   :  { %18 = vsyncpa [#allocation6], 0 }
   0x2   :  { %19 = vsyncpa [#allocation9], 0 }
   0x3   :  { %20 = vsyncpa [#allocation12], 0 }
   0x4   :  { %21 = vsyncpa [#allocation15], 0 }
   0x5   :  { %22 = vsyncpa [#allocation18], 0 }
   0x6   :  { %23 = vsyncpa [#allocation21], 0 }
   0x7   :  { %24 = vsyncpa [#allocation4], 0  ;;  %s2229_s21 = smov [#allocation5]   ;;  %s1927_s25 = scalar_lea.hbm %s2590_s1, 1024 }
   0x8   :  { %s42_s22 = sshll.u32 %s2229_s21, 4  ;;  %p1928_p0 = scmp.ne.s32.totalorder %s2590_s1, %s1927_s25  ;;  %s43_s22 = int_to_ptr.vmem [resolvable:$true] %s42_s22 }
   0x9   :  { %p1931_p1 = scmp.lt.u32.totalorder %s1927_s25, %s2590_s1 }
   0xb   :  { %p1933_p2 = pnand %p1931_p1, %p1928_p0 }
   0xd   :  { %1936 = shalt.err (!%p1933_p2)
}
   0xe   :  { %s1937_s30 = scalar_lea.vmem %s43_s22, 1024  ;;  %p1942_p4 = scmp.lt.s32.totalorder %s43_s22, %s43_s22 }
   0xf   :  { %p1938_p3 = scmp.ne.s32.totalorder %s43_s22, %s1937_s30  ;;  %p1943_p5 = scmp.lt.s32.totalorder %s1937_s30, %s1937_s30 }
  0x11   :  { %p1944_p6 = por %p1943_p5, %p1942_p4 }
  0x13   :  { %p1945_p7 = pnand %p1944_p6, %p1938_p3 }
  0x15   :  { %1948 = shalt.err (!%p1945_p7)
}
  0x16   :  { %s2230_s13 = smov 64   ;;  %s2231_s14 = smov 4  }
  0x17   :  { %48 = dma.hbm_to_vmem [thread:$0]  %s2590_s1, 1024, %s43_s22, [#allocation6], %s2230_s13, %s2230_s13, %s2231_s14  }
  0x18   :  { %s2232_s17 = smov [#allocation8]   ;;  %s2233_s19 = smov [#allocation11]  }
  0x19   :  { %s67_s18 = sshll.u32 %s2232_s17, 4  ;;  %s89_s20 = sshll.u32 %s2233_s19, 4  ;;  %s68_s18 = int_to_ptr.vmem [resolvable:$true] %s67_s18  ;;  %s90_s20 = int_to_ptr.vmem [resolvable:$true] %s89_s20 }
  0x1a   :  { %s1949_s24 = scalar_lea.hbm %s2592_s3, 16 }
  0x1b   :  { %p1950_p8 = scmp.ne.s32.totalorder %s2592_s3, %s1949_s24  ;;  %p1953_p9 = scmp.lt.u32.totalorder %s1949_s24, %s2592_s3 }
  0x1d   :  { %p1955_p10 = pnand %p1953_p9, %p1950_p8 }
  0x1f   :  { %1958 = shalt.err (!%p1955_p10)
}
  0x20   :  { %s1959_s1 = scalar_lea.vmem %s68_s18, 16  ;;  %s1963_s22 = scalar_lea.vmem %s68_s18, 32 }
  0x21   :  { %p1960_p11 = scmp.ne.s32.totalorder %s68_s18, %s1959_s1  ;;  %p1964_p12 = scmp.lt.s32.totalorder %s68_s18, %s68_s18 }
  0x22   :  { %p1965_p13 = scmp.lt.s32.totalorder %s1963_s22, %s1959_s1 }
  0x24   :  { %p1966_p0 = por %p1965_p13, %p1964_p12 }
  0x26   :  { %p1967_p1 = pnand %p1966_p0, %p1960_p11 }
  0x28   :  { %1970 = shalt.err (!%p1967_p1)
}
  0x29   :  { %70 = dma.hbm_to_vmem [thread:$0]  %s2592_s3, 16, %s68_s18, [#allocation9]  }
  0x2a   :  { %s1971_s17 = scalar_lea.hbm %s2594_s5, 16 }
  0x2b   :  { %p1972_p2 = scmp.ne.s32.totalorder %s2594_s5, %s1971_s17  ;;  %p1975_p3 = scmp.lt.u32.totalorder %s1971_s17, %s2594_s5 }
  0x2d   :  { %p1977_p4 = pnand %p1975_p3, %p1972_p2 }
  0x2f   :  { %1980 = shalt.err (!%p1977_p4)
}
  0x30   :  { %s1981_s25 = scalar_lea.vmem %s90_s20, 16  ;;  %s1985_s26 = scalar_lea.vmem %s90_s20, 32 }
  0x31   :  { %p1982_p5 = scmp.ne.s32.totalorder %s90_s20, %s1981_s25  ;;  %p1986_p6 = scmp.lt.s32.totalorder %s90_s20, %s90_s20 }
  0x32   :  { %p1987_p7 = scmp.lt.s32.totalorder %s1985_s26, %s1981_s25 }
  0x34   :  { %p1988_p8 = por %p1987_p7, %p1986_p6 }
  0x36   :  { %p1989_p9 = pnand %p1988_p8, %p1982_p5 }
  0x38   :  { %1992 = shalt.err (!%p1989_p9)
}
  0x39   :  { %92 = dma.hbm_to_vmem [thread:$0]  %s2594_s5, 16, %s90_s20, [#allocation12]  }
  0x3a   :  { %s2234_s27 = smov [#allocation14]   ;;  %s2235_s1 = smov [#allocation17]  }
  0x3b   :  { %s111_s28 = sshll.u32 %s2234_s27, 4  ;;  %s133_s22 = sshll.u32 %s2235_s1, 4  ;;  %s112_s28 = int_to_ptr.vmem [resolvable:$true] %s111_s28  ;;  %s134_s22 = int_to_ptr.vmem [resolvable:$true] %s133_s22 }
  0x3c   :  { %s1993_s15 = scalar_lea.hbm %s2596_s7, 16 }
  0x3d   :  { %p1994_p10 = scmp.ne.s32.totalorder %s2596_s7, %s1993_s15  ;;  %p1997_p11 = scmp.lt.u32.totalorder %s1993_s15, %s2596_s7 }
  0x3f   :  { %p1999_p12 = pnand %p1997_p11, %p1994_p10 }
  0x41   :  { %2002 = shalt.err (!%p1999_p12)
}
  0x42   :  { %s2003_s5 = scalar_lea.vmem %s112_s28, 16  ;;  %s2007_s20 = scalar_lea.vmem %s112_s28, 32 }
  0x43   :  { %p2004_p13 = scmp.ne.s32.totalorder %s112_s28, %s2003_s5  ;;  %p2008_p0 = scmp.lt.s32.totalorder %s112_s28, %s112_s28 }
  0x44   :  { %p2009_p1 = scmp.lt.s32.totalorder %s2007_s20, %s2003_s5 }
  0x46   :  { %p2010_p2 = por %p2009_p1, %p2008_p0 }
  0x48   :  { %p2011_p3 = pnand %p2010_p2, %p2004_p13 }
  0x4a   :  { %2014 = shalt.err (!%p2011_p3)
}
  0x4b   :  { %114 = dma.hbm_to_vmem [thread:$0]  %s2596_s7, 16, %s112_s28, [#allocation15]  }
  0x4c   :  { %s2015_s3 = scalar_lea.hbm %s2598_s9, 16 }
  0x4d   :  { %p2016_p4 = scmp.ne.s32.totalorder %s2598_s9, %s2015_s3  ;;  %p2019_p5 = scmp.lt.u32.totalorder %s2015_s3, %s2598_s9 }
  0x4f   :  { %p2021_p6 = pnand %p2019_p5, %p2016_p4 }
  0x51   :  { %2024 = shalt.err (!%p2021_p6)
}
  0x52   :  { %s2025_s30 = scalar_lea.vmem %s134_s22, 16  ;;  %s2029_s15 = scalar_lea.vmem %s134_s22, 32 }
  0x53   :  { %p2026_p7 = scmp.ne.s32.totalorder %s134_s22, %s2025_s30  ;;  %p2030_p8 = scmp.lt.s32.totalorder %s134_s22, %s134_s22 }
  0x54   :  { %p2031_p9 = scmp.lt.s32.totalorder %s2029_s15, %s2025_s30 }
  0x56   :  { %p2032_p10 = por %p2031_p9, %p2030_p8 }
  0x58   :  { %p2033_p11 = pnand %p2032_p10, %p2026_p7 }
  0x5a   :  { %2036 = shalt.err (!%p2033_p11)
}
  0x5b   :  { %136 = dma.hbm_to_vmem [thread:$0]  %s2598_s9, 16, %s134_s22, [#allocation18]  }
  0x5c   :  { %s2236_s16 = smov [#allocation2]   ;;  %s2037_s5 = scalar_lea.hbm %s2589_s0, 512 }
  0x5d   :  { %s30_s17 = sshll.u32 %s2236_s16, 4  ;;  %p2038_p12 = scmp.ne.s32.totalorder %s2589_s0, %s2037_s5  ;;  %s31_s17 = int_to_ptr.vmem [resolvable:$true] %s30_s17 }
  0x5e   :  { %p2041_p13 = scmp.lt.u32.totalorder %s2037_s5, %s2589_s0 }
  0x60   :  { %p2043_p0 = pnand %p2041_p13, %p2038_p12 }
  0x62   :  { %2046 = shalt.err (!%p2043_p0)
}
  0x63   :  { %s2047_s26 = scalar_lea.vmem %s31_s17, 512  ;;  %p2052_p2 = scmp.lt.s32.totalorder %s31_s17, %s31_s17 }
  0x64   :  { %p2048_p1 = scmp.ne.s32.totalorder %s31_s17, %s2047_s26  ;;  %p2053_p3 = scmp.lt.s32.totalorder %s2047_s26, %s2047_s26 }
  0x66   :  { %p2054_p4 = por %p2053_p3, %p2052_p2 }
  0x68   :  { %p2055_p5 = pnand %p2054_p4, %p2048_p1 }
  0x6a   :  { %2058 = shalt.err (!%p2055_p5)
}
  0x6b   :  { %s2237_s9 = smov 128   ;;  %s2238_s22 = smov 8  }
  0x6c   :  { %36 = dma.hbm_to_vmem [thread:$0]  %s2589_s0, 512, %s31_s17, [#allocation3], %s2237_s9, %s2237_s9, %s2238_s22  }
  0x6d   :  { %s2239_s27 = smov [#allocation7]   ;;  %s2240_s29 = smov [#allocation10]  }
  0x6e   :  { %s54_s1 = sshll.u32 %s2239_s27, 4  ;;  %s76_s30 = sshll.u32 %s2240_s29, 4  ;;  %s55_s1 = int_to_ptr.vmem [resolvable:$true] %s54_s1  ;;  %s2389_s30 = int_to_ptr.vmem [resolvable:$true] %s76_s30 }
  0x6f   :  { %s2059_s28 = scalar_lea.hbm %s2591_s2, 1024 }
  0x70   :  { %p2060_p6 = scmp.ne.s32.totalorder %s2591_s2, %s2059_s28  ;;  %p2063_p7 = scmp.lt.u32.totalorder %s2059_s28, %s2591_s2 }
  0x72   :  { %p2065_p8 = pnand %p2063_p7, %p2060_p6 }
  0x74   :  { %2068 = shalt.err (!%p2065_p8)
}
  0x75   :  { %s2069_s0 = scalar_lea.vmem %s55_s1, 1024  ;;  %p2074_p10 = scmp.lt.s32.totalorder %s55_s1, %s55_s1 }
  0x76   :  { %p2070_p9 = scmp.ne.s32.totalorder %s55_s1, %s2069_s0  ;;  %p2075_p11 = scmp.lt.s32.totalorder %s2069_s0, %s2069_s0 }
  0x78   :  { %p2076_p12 = por %p2075_p11, %p2074_p10 }
  0x7a   :  { %p2077_p13 = pnand %p2076_p12, %p2070_p9 }
  0x7c   :  { %2080 = shalt.err (!%p2077_p13)
}
  0x7d   :  { %60 = dma.hbm_to_vmem [thread:$0]  %s2591_s2, 1024, %s55_s1, [#allocation6], %s2230_s13, %s2230_s13, %s2231_s14  }
  0x7e   :  { %s2081_s25 = scalar_lea.hbm %s2593_s4, 1024 }
  0x7f   :  { %p2082_p0 = scmp.ne.s32.totalorder %s2593_s4, %s2081_s25  ;;  %p2085_p1 = scmp.lt.u32.totalorder %s2081_s25, %s2593_s4 }
  0x81   :  { %p2087_p2 = pnand %p2085_p1, %p2082_p0 }
  0x83   :  { %2090 = shalt.err (!%p2087_p2)
}
  0x84   :  { %s2091_s29 = scalar_lea.vmem %s2389_s30, 1024  ;;  %p2096_p4 = scmp.lt.s32.totalorder %s2389_s30, %s2389_s30 }
  0x85   :  { %p2092_p3 = scmp.ne.s32.totalorder %s2389_s30, %s2091_s29  ;;  %p2097_p5 = scmp.lt.s32.totalorder %s2091_s29, %s2091_s29 }
  0x87   :  { %p2098_p6 = por %p2097_p5, %p2096_p4 }
  0x89   :  { %p2099_p7 = pnand %p2098_p6, %p2092_p3 }
  0x8b   :  { %2102 = shalt.err (!%p2099_p7)
}
  0x8c   :  { %82 = dma.hbm_to_vmem [thread:$0]  %s2593_s4, 1024, %s2389_s30, [#allocation9], %s2230_s13, %s2230_s13, %s2231_s14  }
  0x8d   :  { %s2241_s15 = smov [#allocation13]   ;;  %s2242_s28 = smov [#allocation16]  }
  0x8e   :  { %s98_s7 = sshll.u32 %s2241_s15, 4  ;;  %s120_s16 = sshll.u32 %s2242_s28, 4  ;;  %s99_s7 = int_to_ptr.vmem [resolvable:$true] %s98_s7  ;;  %s2426_s16 = int_to_ptr.vmem [resolvable:$true] %s120_s16 }
  0x8f   :  { %s2103_s5 = scalar_lea.hbm %s2595_s6, 1024 }
  0x90   :  { %p2104_p8 = scmp.ne.s32.totalorder %s2595_s6, %s2103_s5  ;;  %p2107_p9 = scmp.lt.u32.totalorder %s2103_s5, %s2595_s6 }
  0x92   :  { %p2109_p10 = pnand %p2107_p9, %p2104_p8 }
  0x94   :  { %2112 = shalt.err (!%p2109_p10)
}
  0x95   :  { %s2113_s4 = scalar_lea.vmem %s99_s7, 1024  ;;  %p2118_p12 = scmp.lt.s32.totalorder %s99_s7, %s99_s7 }
  0x96   :  { %p2114_p11 = scmp.ne.s32.totalorder %s99_s7, %s2113_s4  ;;  %p2119_p13 = scmp.lt.s32.totalorder %s2113_s4, %s2113_s4 }
  0x98   :  { %p2120_p0 = por %p2119_p13, %p2118_p12 }
  0x9a   :  { %p2121_p1 = pnand %p2120_p0, %p2114_p11 }
  0x9c   :  { %2124 = shalt.err (!%p2121_p1)
}
  0x9d   :  { %104 = dma.hbm_to_vmem [thread:$0]  %s2595_s6, 1024, %s99_s7, [#allocation12], %s2230_s13, %s2230_s13, %s2231_s14  }
  0x9e   :  { %s2125_s3 = scalar_lea.hbm %s2597_s8, 1024 }
  0x9f   :  { %p2126_p2 = scmp.ne.s32.totalorder %s2597_s8, %s2125_s3  ;;  %p2129_p3 = scmp.lt.u32.totalorder %s2125_s3, %s2597_s8 }
  0xa1   :  { %p2131_p4 = pnand %p2129_p3, %p2126_p2 }
  0xa3   :  { %2134 = shalt.err (!%p2131_p4)
}
  0xa4   :  { %s2135_s1 = scalar_lea.vmem %s2426_s16, 1024  ;;  %p2140_p6 = scmp.lt.s32.totalorder %s2426_s16, %s2426_s16 }
  0xa5   :  { %p2136_p5 = scmp.ne.s32.totalorder %s2426_s16, %s2135_s1  ;;  %p2141_p7 = scmp.lt.s32.totalorder %s2135_s1, %s2135_s1 }
  0xa7   :  { %p2142_p8 = por %p2141_p7, %p2140_p6 }
  0xa9   :  { %p2143_p9 = pnand %p2142_p8, %p2136_p5 }
  0xab   :  { %2146 = shalt.err (!%p2143_p9)
}
  0xac   :  { %126 = dma.hbm_to_vmem [thread:$0]  %s2597_s8, 1024, %s2426_s16, [#allocation15], %s2230_s13, %s2230_s13, %s2231_s14  }
  0xad   :  { %s2243_s7 = smov [#allocation19]   ;;  %s2244_s19 = smov [#allocation20]  }
  0xae   :  { %s142_s28 = sshll.u32 %s2243_s7, 4  ;;  %s155_s21 = sshll.u32 %s2244_s19, 4  ;;  %s143_s28 = int_to_ptr.vmem [resolvable:$true] %s142_s28  ;;  %s156_s21 = int_to_ptr.vmem [resolvable:$true] %s155_s21 }
  0xaf   :  { %s2147_s17 = scalar_lea.hbm %s2599_s10, 1024 }
  0xb0   :  { %p2148_p10 = scmp.ne.s32.totalorder %s2599_s10, %s2147_s17  ;;  %p2151_p11 = scmp.lt.u32.totalorder %s2147_s17, %s2599_s10 }
  0xb2   :  { %p2153_p12 = pnand %p2151_p11, %p2148_p10 }
  0xb4   :  { %2156 = shalt.err (!%p2153_p12)
}
  0xb5   :  { %s2157_s8 = scalar_lea.vmem %s143_s28, 1024  ;;  %p2162_p0 = scmp.lt.s32.totalorder %s143_s28, %s143_s28 }
  0xb6   :  { %p2158_p13 = scmp.ne.s32.totalorder %s143_s28, %s2157_s8  ;;  %p2163_p1 = scmp.lt.s32.totalorder %s2157_s8, %s2157_s8 }
  0xb8   :  { %p2164_p2 = por %p2163_p1, %p2162_p0 }
  0xba   :  { %p2165_p3 = pnand %p2164_p2, %p2158_p13 }
  0xbc   :  { %2168 = shalt.err (!%p2165_p3)
}
  0xbd   :  { %148 = dma.hbm_to_vmem [thread:$0]  %s2599_s10, 1024, %s143_s28, [#allocation18], %s2230_s13, %s2230_s13, %s2231_s14  }
  0xbe   :  { %s2169_s3 = scalar_lea.hbm %s2600_s11, 16 }
  0xbf   :  { %p2170_p4 = scmp.ne.s32.totalorder %s2600_s11, %s2169_s3  ;;  %p2173_p5 = scmp.lt.u32.totalorder %s2169_s3, %s2600_s11 }
  0xc1   :  { %p2175_p6 = pnand %p2173_p5, %p2170_p4 }
  0xc3   :  { %2178 = shalt.err (!%p2175_p6)
}
  0xc4   :  { %s2179_s1 = scalar_lea.vmem %s156_s21, 16  ;;  %s2183_s6 = scalar_lea.vmem %s156_s21, 32 }
  0xc5   :  { %p2180_p7 = scmp.ne.s32.totalorder %s156_s21, %s2179_s1  ;;  %p2184_p8 = scmp.lt.s32.totalorder %s156_s21, %s156_s21 }
  0xc6   :  { %p2185_p9 = scmp.lt.s32.totalorder %s2183_s6, %s2179_s1 }
  0xc8   :  { %p2186_p10 = por %p2185_p9, %p2184_p8 }
  0xca   :  { %p2187_p11 = pnand %p2186_p10, %p2180_p7 }
  0xcc   :  { %2190 = shalt.err (!%p2187_p11)
}
  0xcd   :  { %158 = dma.hbm_to_vmem [thread:$0]  %s2600_s11, 16, %s156_s21, [#allocation21]  }
  0xce   :  { %2213 = dma.done.wait [#allocation3], 512  }
  0xcf   :  { %2214 = vsyncadd [#allocation3], 4294966784 }
  0xd0   :  { %2215 = dma.done.wait [#allocation6], 2048  }
  0xd1   :  { %2216 = vsyncadd [#allocation6], 4294965248 }
  0xd2   :  { %2217 = dma.done.wait [#allocation9], 1040  }
  0xd3   :  { %2218 = vsyncadd [#allocation9], 4294966256 }
  0xd4   :  { %2219 = dma.done.wait [#allocation12], 1040  }
  0xd5   :  { %2220 = vsyncadd [#allocation12], 4294966256 }
  0xd6   :  { %2221 = dma.done.wait [#allocation15], 1040  }
  0xd7   :  { %2222 = vsyncadd [#allocation15], 4294966256 }
  0xd8   :  { %2223 = dma.done.wait [#allocation18], 1040  }
  0xd9   :  { %2224 = vsyncadd [#allocation18], 4294966256 }
  0xda   :  { %2225 = dma.done.wait [#allocation21], 16  }
  0xdb   :  { %2226 = vsyncadd [#allocation21], 4294967280  ;;  %v1879_v0 = vld [vmem:[#allocation5] sm:$0xff]   ;;  %v1880_v1 = vld [vmem:[#allocation5 + $0x8] sm:$0xff]   ;;  %s2245_s11 = smov [#allocation22]  }
  0xdc   :  { %1622 = vmatprep.subr.bf16.mxu0 %v1879_v0  ;;  %v1881_v2 = vld [vmem:[#allocation5 + $0x10] sm:$0xff]   ;;  %v1882_v3 = vld [vmem:[#allocation5 + $0x18] sm:$0xff]   ;;  %v2490_v4 = vld [vmem:[#allocation2] sm:$0xff]  ;;  %s1439_s14 = sshll.u32 %s2245_s11, 4  ;;  %s1440_s14 = int_to_ptr.vmem [resolvable:$true] %s1439_s14 }
  0xdd   :  { %1623 = vmatpush3.bf16.msra.mxu0 %v1879_v0  ;;  %v200_v5 = vunpack.c.l.s8.bf16 %v2490_v4  ;;  %v1887_v6 = vld [vmem:[#allocation7] sm:$0xff]   ;;  %v1888_v7 = vld [vmem:[#allocation7 + $0x8] sm:$0xff]   ;;  %v1889_v9 = vld [vmem:[#allocation7 + $0x10] sm:$0xff]   ;;  %v201_v18 = vunpack.c.h.s8.bf16 %v2490_v4  ;;  %s2191_s15 = scalar_lea.vmem %s1440_s14, 2048  ;;  %p2196_p13 = scmp.lt.s32.totalorder %s1440_s14, %s1440_s14 }
  0xde   :  { %1624 = vmatprep.subr.bf16.mxu0 %v1880_v1  ;;  %v1883_v8 = vld [vmem:[#allocation5 + $0x20] sm:$0xff]   ;;  %1654 = vmatprep.subr.bf16.mxu1 %v1887_v6  ;;  %v1884_v10 = vld [vmem:[#allocation5 + $0x28] sm:$0xff]   ;;  %v1890_v11 = vld [vmem:[#allocation7 + $0x18] sm:$0xff]   ;;  %p2192_p12 = scmp.ne.s32.totalorder %s1440_s14, %s2191_s15  ;;  %p2197_p0 = scmp.lt.s32.totalorder %s2191_s15, %s2191_s15 }
  0xdf   :  { %1638 = vmatprep.mubr.bf16.mxu0 %v200_v5  ;;  %1655 = vmatpush3.bf16.msra.mxu1 %v1887_v6  ;;  %v1885_v12 = vld [vmem:[#allocation5 + $0x30] sm:$0xff]   ;;  %v1891_v13 = vld [vmem:[#allocation7 + $0x20] sm:$0xff]   ;;  %v1886_v14 = vld [vmem:[#allocation5 + $0x38] sm:$0xff]  }
  0xe0   :  { %1656 = vmatprep.subr.bf16.mxu1 %v1888_v7  ;;  %v1892_v15 = vld [vmem:[#allocation7 + $0x28] sm:$0xff]   ;;  %v1893_v17 = vld [vmem:[#allocation7 + $0x30] sm:$0xff]   ;;  %v2511_v23 = vld [vmem:[#allocation2 + $0x18] sm:$0xff]  ;;  %p2198_p1 = por %p2197_p0, %p2196_p13 }
  0xe1   :  { %1625 = vmatpush3.bf16.msra.mxu0 %v1880_v1  ;;  %v2495_v16 = vld [vmem:[#allocation2 + $0x8] sm:$0xff]  ;;  %v2501_v20 = vld [vmem:[#allocation2 + $0x10] sm:$0xff]  ;;  %v206_v25 = vunpack.c.l.s8.bf16 %v2511_v23  ;;  %v207_v26 = vunpack.c.h.s8.bf16 %v2511_v23  ;;  %v1894_v27 = vld [vmem:[#allocation7 + $0x38] sm:$0xff]  }
  0xe2   :  { %1626 = vmatprep.subr.bf16.mxu0 %v1881_v2  ;;  %v202_v19 = vunpack.c.l.s8.bf16 %v2495_v16  ;;  %v203_v21 = vunpack.c.h.s8.bf16 %v2495_v16  ;;  %v204_v22 = vunpack.c.l.s8.bf16 %v2501_v20  ;;  %v205_v24 = vunpack.c.h.s8.bf16 %v2501_v20  ;;  %v1895_v28 = vld [vmem:[#allocation10] sm:$0xff]   ;;  %v1896_v29 = vld [vmem:[#allocation10 + $0x8] sm:$0xff]   ;;  %v1897_v30 = vld [vmem:[#allocation10 + $0x10] sm:$0xff]   ;;  %p2199_p2 = pnand %p2198_p1, %p2192_p12 }
  0xe3   :  { %1657 = vmatpush3.bf16.msra.mxu1 %v1888_v7  ;;  %v1898_v31 = vld [vmem:[#allocation10 + $0x18] sm:$0xff]   ;;  %v1899_v32 = vld [vmem:[#allocation10 + $0x20] sm:$0xff]   ;;  %v1900_v33 = vld [vmem:[#allocation10 + $0x28] sm:$0xff]  }
  0xe4   :  { %1658 = vmatprep.subr.bf16.mxu1 %v1889_v9  ;;  %v1901_v58 = vld [vmem:[#allocation10 + $0x30] sm:$0xff]   ;;  %v1902_v59 = vld [vmem:[#allocation10 + $0x38] sm:$0xff]   ;;  %v1915_v20 = vld [vmem:[#allocation16 + $0x20] sm:$0xff]  }
  0xe5   :  { %1627 = vmatpush3.bf16.msra.mxu0 %v1881_v2  ;;  %v1465_v60 = vld [vmem:[#allocation8] ss:$0 sm:$0xff]  ;;  %v1913_v16 = vld [vmem:[#allocation16 + $0x10] sm:$0xff]  }
  0xe6   :  { %1628 = vmatprep.subr.bf16.mxu0 %v1882_v3  ;;  %v1910_v4 = vld [vmem:[#allocation13 + $0x38] sm:$0xff]  }
  0xe7   :  { %1659 = vmatpush3.bf16.msra.mxu1 %v1889_v9 }
  0xe8   :  { %1660 = vmatprep.subr.bf16.mxu1 %v1890_v11 }
  0xe9   :  { %1629 = vmatpush3.bf16.msra.mxu0 %v1882_v3 }
  0xea   :  { %1630 = vmatprep.subr.bf16.mxu0 %v1883_v8 }
  0xeb   :  { %1661 = vmatpush3.bf16.msra.mxu1 %v1890_v11 }
  0xec   :  { %1662 = vmatprep.subr.bf16.mxu1 %v1891_v13 }
  0xed   :  { %1631 = vmatpush3.bf16.msra.mxu0 %v1883_v8 }
  0xee   :  { %1632 = vmatprep.subr.bf16.mxu0 %v1884_v10 }
  0xef   :  { %1663 = vmatpush3.bf16.msra.mxu1 %v1891_v13 }
  0xf0   :  { %1664 = vmatprep.subr.bf16.mxu1 %v1892_v15 }
  0xf1   :  { %1633 = vmatpush3.bf16.msra.mxu0 %v1884_v10 }
  0xf2   :  { %1634 = vmatprep.subr.bf16.mxu0 %v1885_v12 }
  0xf3   :  { %1665 = vmatpush3.bf16.msra.mxu1 %v1892_v15 }
  0xf4   :  { %1666 = vmatprep.subr.bf16.mxu1 %v1893_v17 }
  0xf5   :  { %1635 = vmatpush3.bf16.msra.mxu0 %v1885_v12 }
  0xf6   :  { %1636 = vmatprep.subr.bf16.mxu0 %v1886_v14 }
  0xf7   :  { %1667 = vmatpush3.bf16.msra.mxu1 %v1893_v17 }
  0xf8   :  { %1668 = vmatprep.subr.bf16.mxu1 %v1894_v27 }
  0xf9   :  { %1637 = vmatpush3.bf16.msra.mxu0 %v1886_v14 }
  0xfa   :  { %1686 = vmatprep.subr.bf16.mxu0 %v1895_v28 }
  0xfb   :  { %1669 = vmatpush3.bf16.msra.mxu1 %v1894_v27 }
  0xfc   :  { %1639 = vmatmul.mubr.bf16.vlgmr.msra.gmra.mrb[0].mxu0 %v201_v18 }
  0xfd   :  { %1642 = vmatprep.mubr.bf16.mxu0 %v202_v19  ;;  %1687 = vmatpush3.bf16.msra.mxu0 %v1895_v28 }
  0xfe   :  { %1688 = vmatprep.subr.bf16.mxu0 %v1896_v29 }
 0x101   :  { %1689 = vmatpush3.bf16.msra.mxu0 %v1896_v29 }
 0x102   :  { %1690 = vmatprep.subr.bf16.mxu0 %v1897_v30 }
 0x104   :  { %1643 = vmatmul.mubr.bf16.gmra.mrb[4].mxu0 %v203_v21 }
 0x105   :  { %1646 = vmatprep.mubr.bf16.mxu0 %v204_v22  ;;  %1691 = vmatpush3.bf16.msra.mxu0 %v1897_v30 }
 0x106   :  { %1692 = vmatprep.subr.bf16.mxu0 %v1898_v31 }
 0x109   :  { %1693 = vmatpush3.bf16.msra.mxu0 %v1898_v31 }
 0x10a   :  { %1694 = vmatprep.subr.bf16.mxu0 %v1899_v32 }
 0x10c   :  { %1647 = vmatmul.mubr.bf16.gmra.mrb[8].mxu0 %v205_v24 }
 0x10d   :  { %1650 = vmatprep.mubr.bf16.mxu0 %v206_v25  ;;  %1695 = vmatpush3.bf16.msra.mxu0 %v1899_v32 }
 0x10e   :  { %1696 = vmatprep.subr.bf16.mxu0 %v1900_v33 }
 0x111   :  { %1697 = vmatpush3.bf16.msra.mxu0 %v1900_v33 }
 0x112   :  { %1698 = vmatprep.subr.bf16.mxu0 %v1901_v58 }
 0x114   :  { %1651 = vmatmul.mubr.bf16.gmra.mrb[12].mxu0 %v207_v26 }
 0x115   :  { %1699 = vmatpush3.bf16.msra.mxu0 %v1901_v58 }
 0x116   :  { %1700 = vmatprep.subr.bf16.mxu0 %v1902_v59 }
 0x119   :  { %1701 = vmatpush3.bf16.msra.mxu0 %v1902_v59 }
 0x1cf   :  { %v1640_v34 = vpop.f32.mrb[0].mxu0 }
 0x1d0   :  { %v306_v35 = vpop.f32.mrb[1].mxu0 }
 0x1d1   :  { %v1641_v36 = vpop.f32.mrb[2].mxu0 }
 0x1d2   :  { %v370_v37 = vpack.c.bf16 %v1641_v36, %v1640_v34  ;;  %v309_v38 = vpop.f32.mrb[3].mxu0 }
 0x1d3   :  { %v369_v39 = vpack.c.bf16 %v309_v38, %v306_v35 }
 0x1d5   :  { %1670 = vmatprep.mubr.bf16.mxu1 %v369_v39 }
 0x1d6   :  { %1671 = vmatmul.mubr.bf16.vlgmr.msra.gmra.mrb[0].mxu1 %v370_v37 }
 0x1d7   :  { %v1644_v40 = vpop.f32.mrb[4].mxu0 }
 0x1d8   :  { %v322_v41 = vpop.f32.mrb[5].mxu0 }
 0x1d9   :  { %v1645_v42 = vpop.f32.mrb[6].mxu0 }
 0x1da   :  { %v372_v43 = vpack.c.bf16 %v1645_v42, %v1644_v40  ;;  %v325_v44 = vpop.f32.mrb[7].mxu0 }
 0x1db   :  { %v371_v45 = vpack.c.bf16 %v325_v44, %v322_v41 }
 0x1dd   :  { %1674 = vmatprep.mubr.bf16.mxu1 %v371_v45 }
 0x1de   :  { %1675 = vmatmul.mubr.bf16.gmra.mrb[4].mxu1 %v372_v43 }
 0x1df   :  { %v1648_v46 = vpop.f32.mrb[8].mxu0 }
 0x1e0   :  { %v338_v47 = vpop.f32.mrb[9].mxu0 }
 0x1e1   :  { %v1649_v48 = vpop.f32.mrb[10].mxu0 }
 0x1e2   :  { %v374_v49 = vpack.c.bf16 %v1649_v48, %v1648_v46  ;;  %v341_v50 = vpop.f32.mrb[11].mxu0 }
 0x1e3   :  { %v373_v51 = vpack.c.bf16 %v341_v50, %v338_v47 }
 0x1e5   :  { %1678 = vmatprep.mubr.bf16.mxu1 %v373_v51 }
 0x1e6   :  { %1679 = vmatmul.mubr.bf16.gmra.mrb[8].mxu1 %v374_v49 }
 0x1e7   :  { %v1652_v52 = vpop.f32.mrb[12].mxu0 }
 0x1e8   :  { %v354_v53 = vpop.f32.mrb[13].mxu0 }
 0x1e9   :  { %v1653_v54 = vpop.f32.mrb[14].mxu0 }
 0x1ea   :  { %v376_v55 = vpack.c.bf16 %v1653_v54, %v1652_v52  ;;  %v357_v56 = vpop.f32.mrb[15].mxu0 }
 0x1eb   :  { %v375_v57 = vpack.c.bf16 %v357_v56, %v354_v53 }
 0x1ed   :  { %1682 = vmatprep.mubr.bf16.mxu1 %v375_v57 }
 0x1ee   :  { %1683 = vmatmul.mubr.bf16.gmra.mrb[12].mxu1 %v376_v55 }
 0x1ef   :  { %1734 = vmatprep.mubr.bf16.mxu1 %v200_v5 }
 0x2a9   :  { %v1672_v61 = vpop.f32.mrb[0].mxu1 }
 0x2aa   :  { %v491_v62 = vadd.f32 %v1672_v61, %v1465_v60  ;;  %v482_v63 = vpop.f32.mrb[1].mxu1 }
 0x2ab   :  { %v483_v0 = vadd.f32 %v1465_v60, %v482_v63  ;;  %v1673_v1 = vpop.f32.mrb[2].mxu1 }
 0x2ac   :  { %v494_v2 = vadd.f32 %v1673_v1, %v1465_v60  ;;  %v485_v3 = vpop.f32.mrb[3].mxu1  ;;  %v547_v7 = vmax.f32 %v491_v62, 0.0  ;;  %v1903_v1 = vld [vmem:[#allocation13] sm:$0xff]  }
 0x2ad   :  { %v486_v6 = vadd.f32 %v1465_v60, %v485_v3  ;;  %v545_v9 = vmax.f32 %v483_v0, 0.0  ;;  %1750 = vmatprep.subr.bf16.mxu0 %v1903_v1  ;;  %v1905_v3 = vld [vmem:[#allocation13 + $0x10] sm:$0xff]  }
 0x2ae   :  { %v548_v8 = vmax.f32 %v494_v2, 0.0  ;;  %v1904_v2 = vld [vmem:[#allocation13 + $0x8] sm:$0xff]  }
 0x2af   :  { %v546_v10 = vmax.f32 %v486_v6, 0.0  ;;  %v1906_v6 = vld [vmem:[#allocation13 + $0x18] sm:$0xff]  }
 0x2b0   :  { %v562_v5 = vpack.c.bf16 %v548_v8, %v547_v7  ;;  %v1908_v7 = vld [vmem:[#allocation13 + $0x28] sm:$0xff]   ;;  %v1909_v8 = vld [vmem:[#allocation13 + $0x30] sm:$0xff]  }
 0x2b1   :  { %v561_v11 = vpack.c.bf16 %v546_v10, %v545_v9  ;;  %v1676_v12 = vpop.f32.mrb[4].mxu1  ;;  %v1474_v9 = vld [vmem:[#allocation11] ss:$0 sm:$0xff] }
 0x2b2   :  { %v507_v13 = vadd.f32 %v1676_v12, %v1465_v60  ;;  %v498_v14 = vpop.f32.mrb[5].mxu1 }
 0x2b3   :  { %v499_v15 = vadd.f32 %v1465_v60, %v498_v14  ;;  %v1677_v17 = vpop.f32.mrb[6].mxu1  ;;  %1702 = vmatprep.mubr.bf16.mxu0 %v561_v11 }
 0x2b4   :  { %v510_v27 = vadd.f32 %v1677_v17, %v1465_v60  ;;  %v501_v28 = vpop.f32.mrb[7].mxu1  ;;  %1703 = vmatmul.mubr.bf16.vlgmr.msra.gmra.mrb[16].mxu0 %v562_v5  ;;  %v551_v30 = vmax.f32 %v507_v13, 0.0 }
 0x2b5   :  { %v502_v29 = vadd.f32 %v1465_v60, %v501_v28  ;;  %v549_v32 = vmax.f32 %v499_v15, 0.0  ;;  %1751 = vmatpush3.bf16.msra.mxu0 %v1903_v1 }
 0x2b6   :  { %v552_v31 = vmax.f32 %v510_v27, 0.0  ;;  %1752 = vmatprep.subr.bf16.mxu0 %v1904_v2 }
 0x2b7   :  { %v550_v33 = vmax.f32 %v502_v29, 0.0 }
 0x2b8   :  { %v564_v34 = vpack.c.bf16 %v552_v31, %v551_v30 }
 0x2b9   :  { %v563_v35 = vpack.c.bf16 %v550_v33, %v549_v32  ;;  %v1680_v36 = vpop.f32.mrb[8].mxu1  ;;  %1753 = vmatpush3.bf16.msra.mxu0 %v1904_v2 }
 0x2ba   :  { %v523_v37 = vadd.f32 %v1680_v36, %v1465_v60  ;;  %v514_v38 = vpop.f32.mrb[9].mxu1  ;;  %1754 = vmatprep.subr.bf16.mxu0 %v1905_v3 }
 0x2bb   :  { %v515_v39 = vadd.f32 %v1465_v60, %v514_v38  ;;  %v1681_v40 = vpop.f32.mrb[10].mxu1  ;;  %1706 = vmatprep.mubr.bf16.mxu0 %v563_v35 }
 0x2bc   :  { %v526_v41 = vadd.f32 %v1681_v40, %v1465_v60  ;;  %v517_v42 = vpop.f32.mrb[11].mxu1  ;;  %1707 = vmatmul.mubr.bf16.gmra.mrb[20].mxu0 %v564_v34  ;;  %v555_v44 = vmax.f32 %v523_v37, 0.0 }
 0x2bd   :  { %v518_v43 = vadd.f32 %v1465_v60, %v517_v42  ;;  %v553_v46 = vmax.f32 %v515_v39, 0.0  ;;  %1755 = vmatpush3.bf16.msra.mxu0 %v1905_v3 }
 0x2be   :  { %v556_v45 = vmax.f32 %v526_v41, 0.0  ;;  %1756 = vmatprep.subr.bf16.mxu0 %v1906_v6 }
 0x2bf   :  { %v554_v47 = vmax.f32 %v518_v43, 0.0 }
 0x2c0   :  { %v566_v48 = vpack.c.bf16 %v556_v45, %v555_v44 }
 0x2c1   :  { %v565_v49 = vpack.c.bf16 %v554_v47, %v553_v46  ;;  %v1684_v50 = vpop.f32.mrb[12].mxu1  ;;  %1757 = vmatpush3.bf16.msra.mxu0 %v1906_v6 }
 0x2c2   :  { %v539_v51 = vadd.f32 %v1684_v50, %v1465_v60  ;;  %v530_v52 = vpop.f32.mrb[13].mxu1 }
 0x2c3   :  { %v531_v53 = vadd.f32 %v1465_v60, %v530_v52  ;;  %v1685_v54 = vpop.f32.mrb[14].mxu1  ;;  %1710 = vmatprep.mubr.bf16.mxu0 %v565_v49 }
 0x2c4   :  { %v542_v55 = vadd.f32 %v1685_v54, %v1465_v60  ;;  %v533_v56 = vpop.f32.mrb[15].mxu1  ;;  %1711 = vmatmul.mubr.bf16.gmra.mrb[24].mxu0 %v566_v48  ;;  %v559_v58 = vmax.f32 %v539_v51, 0.0 }
 0x2c5   :  { %v534_v57 = vadd.f32 %v1465_v60, %v533_v56  ;;  %v557_v61 = vmax.f32 %v531_v53, 0.0  ;;  %v1907_v60 = vld [vmem:[#allocation13 + $0x20] sm:$0xff]  }
 0x2c6   :  { %v560_v59 = vmax.f32 %v542_v55, 0.0  ;;  %1758 = vmatprep.subr.bf16.mxu0 %v1907_v60 }
 0x2c7   :  { %v558_v62 = vmax.f32 %v534_v57, 0.0  ;;  %1759 = vmatpush3.bf16.msra.mxu0 %v1907_v60 }
 0x2c8   :  { %v568_v63 = vpack.c.bf16 %v560_v59, %v559_v58  ;;  %1760 = vmatprep.subr.bf16.mxu0 %v1908_v7 }
 0x2c9   :  { %v567_v0 = vpack.c.bf16 %v558_v62, %v557_v61 }
 0x2cb   :  { %1714 = vmatprep.mubr.bf16.mxu0 %v567_v0  ;;  %1761 = vmatpush3.bf16.msra.mxu0 %v1908_v7 }
 0x2cc   :  { %1715 = vmatmul.mubr.bf16.gmra.mrb[28].mxu0 %v568_v63  ;;  %1762 = vmatprep.subr.bf16.mxu0 %v1909_v8 }
 0x2cf   :  { %1763 = vmatpush3.bf16.msra.mxu0 %v1909_v8 }
 0x2d0   :  { %1764 = vmatprep.subr.bf16.mxu0 %v1910_v4 }
 0x2d3   :  { %1765 = vmatpush3.bf16.msra.mxu0 %v1910_v4 }
 0x387   :  { %v1704_v10 = vpop.f32.mrb[16].mxu0 }
 0x388   :  { %v683_v5 = vadd.f32 %v1704_v10, %v1474_v9  ;;  %v674_v11 = vpop.f32.mrb[17].mxu0 }
 0x389   :  { %v675_v12 = vadd.f32 %v1474_v9, %v674_v11  ;;  %v1705_v13 = vpop.f32.mrb[18].mxu0 }
 0x38a   :  { %v686_v14 = vadd.f32 %v1705_v13, %v1474_v9  ;;  %v677_v15 = vpop.f32.mrb[19].mxu0  ;;  %v739_v27 = vmax.f32 %v683_v5, 0.0 }
 0x38b   :  { %v678_v17 = vadd.f32 %v1474_v9, %v677_v15  ;;  %v737_v29 = vmax.f32 %v675_v12, 0.0 }
 0x38c   :  { %v740_v28 = vmax.f32 %v686_v14, 0.0 }
 0x38d   :  { %v738_v30 = vmax.f32 %v678_v17, 0.0 }
 0x38e   :  { %v754_v31 = vpack.c.bf16 %v740_v28, %v739_v27 }
 0x38f   :  { %v753_v32 = vpack.c.bf16 %v738_v30, %v737_v29  ;;  %v1708_v33 = vpop.f32.mrb[20].mxu0 }
 0x390   :  { %v699_v34 = vadd.f32 %v1708_v33, %v1474_v9  ;;  %v690_v35 = vpop.f32.mrb[21].mxu0 }
 0x391   :  { %v691_v36 = vadd.f32 %v1474_v9, %v690_v35  ;;  %v1709_v37 = vpop.f32.mrb[22].mxu0  ;;  %1718 = vmatprep.subr.bf16.mxu1 %v753_v32 }
 0x392   :  { %v702_v38 = vadd.f32 %v1709_v37, %v1474_v9  ;;  %v693_v39 = vpop.f32.mrb[23].mxu0  ;;  %1719 = vmatpush3.bf16.msra.mxu1 %v753_v32  ;;  %v743_v41 = vmax.f32 %v699_v34, 0.0 }
 0x393   :  { %v694_v40 = vadd.f32 %v1474_v9, %v693_v39  ;;  %1720 = vmatprep.subr.bf16.mxu1 %v754_v31  ;;  %v741_v43 = vmax.f32 %v691_v36, 0.0 }
 0x394   :  { %v744_v42 = vmax.f32 %v702_v38, 0.0 }
 0x395   :  { %v742_v44 = vmax.f32 %v694_v40, 0.0 }
 0x396   :  { %v756_v45 = vpack.c.bf16 %v744_v42, %v743_v41  ;;  %1721 = vmatpush3.bf16.msra.mxu1 %v754_v31  ;;  %v1917_v42 = vld [vmem:[#allocation16 + $0x30] sm:$0xff]  }
 0x397   :  { %v755_v46 = vpack.c.bf16 %v742_v44, %v741_v43  ;;  %v1712_v47 = vpop.f32.mrb[24].mxu0  ;;  %v1918_v43 = vld [vmem:[#allocation16 + $0x38] sm:$0xff]   ;;  %v1919_v44 = vld [vmem:[#allocation19] sm:$0xff]  }
 0x398   :  { %v715_v48 = vadd.f32 %v1712_v47, %v1474_v9  ;;  %v706_v49 = vpop.f32.mrb[25].mxu0  ;;  %1814 = vmatprep.subr.bf16.mxu0 %v1919_v44  ;;  %v2538_v47 = vld [vmem:[#allocation19 + $0x18] sm:$0xff]  }
 0x399   :  { %v707_v50 = vadd.f32 %v1474_v9, %v706_v49  ;;  %v1713_v51 = vpop.f32.mrb[26].mxu0  ;;  %1722 = vmatprep.subr.bf16.mxu1 %v755_v46  ;;  %v2545_v49 = vld [vmem:[#allocation19 + $0x28] sm:$0xff]  }
 0x39a   :  { %v718_v52 = vadd.f32 %v1713_v51, %v1474_v9  ;;  %v709_v53 = vpop.f32.mrb[27].mxu0  ;;  %1723 = vmatpush3.bf16.msra.mxu1 %v755_v46  ;;  %v747_v55 = vmax.f32 %v715_v48, 0.0  ;;  %v1921_v46 = vld [vmem:[#allocation19 + $0x10] sm:$0xff]   ;;  %v2541_v48 = vld [vmem:[#allocation19 + $0x20] sm:$0xff]  }
 0x39b   :  { %v710_v54 = vadd.f32 %v1474_v9, %v709_v53  ;;  %1724 = vmatprep.subr.bf16.mxu1 %v756_v45  ;;  %v745_v57 = vmax.f32 %v707_v50, 0.0  ;;  %v2550_v50 = vld [vmem:[#allocation14] ss:$0 sm:$0xff] }
 0x39c   :  { %v748_v56 = vmax.f32 %v718_v52, 0.0 }
 0x39d   :  { %v746_v58 = vmax.f32 %v710_v54, 0.0 }
 0x39e   :  { %v758_v59 = vpack.c.bf16 %v748_v56, %v747_v55  ;;  %1725 = vmatpush3.bf16.msra.mxu1 %v756_v45  ;;  %v1920_v45 = vld [vmem:[#allocation19 + $0x8] sm:$0xff]  }
 0x39f   :  { %v757_v61 = vpack.c.bf16 %v746_v58, %v745_v57  ;;  %v1716_v62 = vpop.f32.mrb[28].mxu0 }
 0x3a0   :  { %v731_v63 = vadd.f32 %v1716_v62, %v1474_v9  ;;  %v722_v0 = vpop.f32.mrb[29].mxu0 }
 0x3a1   :  { %v723_v1 = vadd.f32 %v1474_v9, %v722_v0  ;;  %v1717_v2 = vpop.f32.mrb[30].mxu0  ;;  %1726 = vmatprep.subr.bf16.mxu1 %v757_v61 }
 0x3a2   :  { %v734_v3 = vadd.f32 %v1717_v2, %v1474_v9  ;;  %v725_v6 = vpop.f32.mrb[31].mxu0  ;;  %1727 = vmatpush3.bf16.msra.mxu1 %v757_v61  ;;  %v751_v7 = vmax.f32 %v731_v63, 0.0 }
 0x3a3   :  { %v726_v60 = vadd.f32 %v1474_v9, %v725_v6  ;;  %1728 = vmatprep.subr.bf16.mxu1 %v758_v59  ;;  %v749_v10 = vmax.f32 %v723_v1, 0.0 }
 0x3a4   :  { %v752_v8 = vmax.f32 %v734_v3, 0.0 }
 0x3a5   :  { %v750_v5 = vmax.f32 %v726_v60, 0.0 }
 0x3a6   :  { %v760_v11 = vpack.c.bf16 %v752_v8, %v751_v7  ;;  %1729 = vmatpush3.bf16.msra.mxu1 %v758_v59 }
 0x3a7   :  { %v759_v12 = vpack.c.bf16 %v750_v5, %v749_v10 }
 0x3a9   :  { %1730 = vmatprep.subr.bf16.mxu1 %v759_v12 }
 0x3aa   :  { %1731 = vmatpush3.bf16.msra.mxu1 %v759_v12 }
 0x3ab   :  { %1732 = vmatprep.subr.bf16.mxu1 %v760_v11 }
 0x3ae   :  { %1733 = vmatpush3.bf16.msra.mxu1 %v760_v11 }
 0x3b1   :  { %1735 = vmatmul.mubr.bf16.vlgmr.msra.gmra.mrb[16].mxu1 %v201_v18  ;;  %v1911_v18 = vld [vmem:[#allocation16] sm:$0xff]  }
 0x3b2   :  { %1738 = vmatprep.mubr.bf16.mxu1 %v202_v19  ;;  %v1912_v19 = vld [vmem:[#allocation16 + $0x8] sm:$0xff]   ;;  %1782 = vmatprep.subr.bf16.mxu1 %v1911_v18 }
 0x3b3   :  { %1783 = vmatpush3.bf16.msra.mxu1 %v1911_v18 }
 0x3b4   :  { %1784 = vmatprep.subr.bf16.mxu1 %v1912_v19 }
 0x3b7   :  { %1785 = vmatpush3.bf16.msra.mxu1 %v1912_v19 }
 0x3b8   :  { %1786 = vmatprep.subr.bf16.mxu1 %v1913_v16 }
 0x3b9   :  { %1739 = vmatmul.mubr.bf16.gmra.mrb[20].mxu1 %v203_v21  ;;  %v1914_v21 = vld [vmem:[#allocation16 + $0x18] sm:$0xff]  }
 0x3ba   :  { %1742 = vmatprep.mubr.bf16.mxu1 %v204_v22  ;;  %v1916_v22 = vld [vmem:[#allocation16 + $0x28] sm:$0xff]  }
 0x3bb   :  { %1787 = vmatpush3.bf16.msra.mxu1 %v1913_v16 }
 0x3bc   :  { %1788 = vmatprep.subr.bf16.mxu1 %v1914_v21 }
 0x3bf   :  { %1789 = vmatpush3.bf16.msra.mxu1 %v1914_v21 }
 0x3c0   :  { %1790 = vmatprep.subr.bf16.mxu1 %v1915_v20 }
 0x3c1   :  { %1743 = vmatmul.mubr.bf16.gmra.mrb[24].mxu1 %v205_v24 }
 0x3c2   :  { %1746 = vmatprep.mubr.bf16.mxu1 %v206_v25 }
 0x3c3   :  { %1791 = vmatpush3.bf16.msra.mxu1 %v1915_v20 }
 0x3c4   :  { %1792 = vmatprep.subr.bf16.mxu1 %v1916_v22 }
 0x3c7   :  { %1793 = vmatpush3.bf16.msra.mxu1 %v1916_v22 }
 0x3c8   :  { %1794 = vmatprep.subr.bf16.mxu1 %v1917_v42 }
 0x3c9   :  { %1747 = vmatmul.mubr.bf16.gmra.mrb[28].mxu1 %v207_v26 }
 0x3cb   :  { %1795 = vmatpush3.bf16.msra.mxu1 %v1917_v42 }
 0x3cc   :  { %1796 = vmatprep.subr.bf16.mxu1 %v1918_v43 }
 0x3cf   :  { %1797 = vmatpush3.bf16.msra.mxu1 %v1918_v43  ;;  %v1925_v43 = vld [vmem:[#allocation19 + $0x30] sm:$0xff]  }
 0x3d0   :  { %1846 = vmatprep.subr.bf16.mxu1 %v1919_v44 }
 0x484   :  { %v1736_v23 = vpop.f32.mrb[16].mxu1 }
 0x485   :  { %v795_v24 = vpop.f32.mrb[17].mxu1 }
 0x486   :  { %v1737_v25 = vpop.f32.mrb[18].mxu1 }
 0x487   :  { %v859_v26 = vpack.c.bf16 %v1737_v25, %v1736_v23  ;;  %v798_v9 = vpop.f32.mrb[19].mxu1 }
 0x488   :  { %v858_v13 = vpack.c.bf16 %v798_v9, %v795_v24 }
 0x48a   :  { %1766 = vmatprep.mubr.bf16.mxu0 %v858_v13 }
 0x48b   :  { %1767 = vmatmul.mubr.bf16.vlgmr.msra.gmra.mrb[32].mxu0 %v859_v26 }
 0x48c   :  { %v1740_v14 = vpop.f32.mrb[20].mxu1  ;;  %1815 = vmatpush3.bf16.msra.mxu0 %v1919_v44 }
 0x48d   :  { %v811_v15 = vpop.f32.mrb[21].mxu1  ;;  %1816 = vmatprep.subr.bf16.mxu0 %v1920_v45 }
 0x48e   :  { %v1741_v17 = vpop.f32.mrb[22].mxu1 }
 0x48f   :  { %v861_v27 = vpack.c.bf16 %v1741_v17, %v1740_v14  ;;  %v814_v28 = vpop.f32.mrb[23].mxu1 }
 0x490   :  { %v860_v29 = vpack.c.bf16 %v814_v28, %v811_v15  ;;  %1817 = vmatpush3.bf16.msra.mxu0 %v1920_v45 }
 0x491   :  { %1818 = vmatprep.subr.bf16.mxu0 %v1921_v46 }
 0x492   :  { %1770 = vmatprep.mubr.bf16.mxu0 %v860_v29 }
 0x493   :  { %1771 = vmatmul.mubr.bf16.gmra.mrb[36].mxu0 %v861_v27 }
 0x494   :  { %v1744_v30 = vpop.f32.mrb[24].mxu1  ;;  %1819 = vmatpush3.bf16.msra.mxu0 %v1921_v46 }
 0x495   :  { %v827_v31 = vpop.f32.mrb[25].mxu1  ;;  %1820 = vmatprep.subr.bf16.mxu0 %v2538_v47 }
 0x496   :  { %v1745_v32 = vpop.f32.mrb[26].mxu1 }
 0x497   :  { %v863_v33 = vpack.c.bf16 %v1745_v32, %v1744_v30  ;;  %v830_v34 = vpop.f32.mrb[27].mxu1 }
 0x498   :  { %v862_v35 = vpack.c.bf16 %v830_v34, %v827_v31  ;;  %1821 = vmatpush3.bf16.msra.mxu0 %v2538_v47 }
 0x499   :  { %1822 = vmatprep.subr.bf16.mxu0 %v2541_v48 }
 0x49a   :  { %1774 = vmatprep.mubr.bf16.mxu0 %v862_v35 }
 0x49b   :  { %1775 = vmatmul.mubr.bf16.gmra.mrb[40].mxu0 %v863_v33 }
 0x49c   :  { %v1748_v36 = vpop.f32.mrb[28].mxu1  ;;  %1823 = vmatpush3.bf16.msra.mxu0 %v2541_v48 }
 0x49d   :  { %v843_v37 = vpop.f32.mrb[29].mxu1  ;;  %1824 = vmatprep.subr.bf16.mxu0 %v2545_v49 }
 0x49e   :  { %v1749_v38 = vpop.f32.mrb[30].mxu1 }
 0x49f   :  { %v865_v39 = vpack.c.bf16 %v1749_v38, %v1748_v36  ;;  %v846_v40 = vpop.f32.mrb[31].mxu1 }
 0x4a0   :  { %v864_v41 = vpack.c.bf16 %v846_v40, %v843_v37  ;;  %1825 = vmatpush3.bf16.msra.mxu0 %v2545_v49 }
 0x4a1   :  { %1826 = vmatprep.subr.bf16.mxu0 %v1925_v43 }
 0x4a2   :  { %1778 = vmatprep.mubr.bf16.mxu0 %v864_v41 }
 0x4a3   :  { %1779 = vmatmul.mubr.bf16.gmra.mrb[44].mxu0 %v865_v39 }
 0x4a4   :  { %1827 = vmatpush3.bf16.msra.mxu0 %v1925_v43 }
 0x55e   :  { %v1768_v51 = vpop.f32.mrb[32].mxu0 }
 0x55f   :  { %v980_v52 = vadd.f32 %v1768_v51, %v2550_v50  ;;  %v971_v53 = vpop.f32.mrb[33].mxu0 }
 0x560   :  { %v972_v54 = vadd.f32 %v2550_v50, %v971_v53  ;;  %v1769_v55 = vpop.f32.mrb[34].mxu0 }
 0x561   :  { %v983_v56 = vadd.f32 %v1769_v55, %v2550_v50  ;;  %v974_v57 = vpop.f32.mrb[35].mxu0  ;;  %v1036_v59 = vmax.f32 %v980_v52, 0.0 }
 0x562   :  { %v975_v58 = vadd.f32 %v2550_v50, %v974_v57  ;;  %v1034_v62 = vmax.f32 %v972_v54, 0.0 }
 0x563   :  { %v1037_v61 = vmax.f32 %v983_v56, 0.0 }
 0x564   :  { %v1035_v63 = vmax.f32 %v975_v58, 0.0 }
 0x565   :  { %v1051_v0 = vpack.c.bf16 %v1037_v61, %v1036_v59 }
 0x566   :  { %v1050_v1 = vpack.c.bf16 %v1035_v63, %v1034_v62  ;;  %v1772_v2 = vpop.f32.mrb[36].mxu0 }
 0x567   :  { %v996_v3 = vadd.f32 %v1772_v2, %v2550_v50  ;;  %v987_v6 = vpop.f32.mrb[37].mxu0 }
 0x568   :  { %v988_v60 = vadd.f32 %v2550_v50, %v987_v6  ;;  %v1773_v7 = vpop.f32.mrb[38].mxu0  ;;  %1798 = vmatprep.mubr.bf16.mxu1 %v1050_v1 }
 0x569   :  { %v999_v8 = vadd.f32 %v1773_v7, %v2550_v50  ;;  %v990_v10 = vpop.f32.mrb[39].mxu0  ;;  %1799 = vmatmul.mubr.bf16.vlgmr.msra.gmra.mrb[32].mxu1 %v1051_v0  ;;  %v1040_v11 = vmax.f32 %v996_v3, 0.0 }
 0x56a   :  { %v991_v5 = vadd.f32 %v2550_v50, %v990_v10  ;;  %1854 = vmatpush3.bf16.msra.mxu1 %v1919_v44  ;;  %v1038_v4 = vmax.f32 %v988_v60, 0.0  ;;  %v1926_v44 = vld [vmem:[#allocation19 + $0x38] sm:$0xff]  }
 0x56b   :  { %v1041_v12 = vmax.f32 %v999_v8, 0.0  ;;  %1847 = vmatprep.subr.bf16.mxu1 %v1920_v45  ;;  %1828 = vmatprep.subr.bf16.mxu0 %v1926_v44 }
 0x56c   :  { %v1039_v18 = vmax.f32 %v991_v5, 0.0  ;;  %1829 = vmatpush3.bf16.msra.mxu0 %v1926_v44 }
 0x56d   :  { %v1053_v19 = vpack.c.bf16 %v1041_v12, %v1040_v11 }
 0x56e   :  { %v1052_v16 = vpack.c.bf16 %v1039_v18, %v1038_v4  ;;  %v1776_v21 = vpop.f32.mrb[40].mxu0  ;;  %1855 = vmatpush3.bf16.msra.mxu1 %v1920_v45  ;;  %v1492_v45 = vld [vmem:[#allocation17] ss:$0 sm:$0xff] }
 0x56f   :  { %v1012_v20 = vadd.f32 %v1776_v21, %v2550_v50  ;;  %v1003_v22 = vpop.f32.mrb[41].mxu0  ;;  %1848 = vmatprep.subr.bf16.mxu1 %v1921_v46 }
 0x570   :  { %v1004_v23 = vadd.f32 %v2550_v50, %v1003_v22  ;;  %v1777_v24 = vpop.f32.mrb[42].mxu0  ;;  %1802 = vmatprep.mubr.bf16.mxu1 %v1052_v16 }
 0x571   :  { %v1015_v25 = vadd.f32 %v1777_v24, %v2550_v50  ;;  %v1006_v26 = vpop.f32.mrb[43].mxu0  ;;  %1803 = vmatmul.mubr.bf16.gmra.mrb[36].mxu1 %v1053_v19  ;;  %v1044_v13 = vmax.f32 %v1012_v20, 0.0 }
 0x572   :  { %v1007_v9 = vadd.f32 %v2550_v50, %v1006_v26  ;;  %1856 = vmatpush3.bf16.msra.mxu1 %v1921_v46  ;;  %v1042_v15 = vmax.f32 %v1004_v23, 0.0 }
 0x573   :  { %v1045_v14 = vmax.f32 %v1015_v25, 0.0  ;;  %1849 = vmatprep.subr.bf16.mxu1 %v2538_v47 }
 0x574   :  { %v1043_v17 = vmax.f32 %v1007_v9, 0.0 }
 0x575   :  { %v1055_v27 = vpack.c.bf16 %v1045_v14, %v1044_v13 }
 0x576   :  { %v1054_v28 = vpack.c.bf16 %v1043_v17, %v1042_v15  ;;  %v1780_v29 = vpop.f32.mrb[44].mxu0  ;;  %1857 = vmatpush3.bf16.msra.mxu1 %v2538_v47 }
 0x577   :  { %v1028_v30 = vadd.f32 %v1780_v29, %v2550_v50  ;;  %v1019_v31 = vpop.f32.mrb[45].mxu0  ;;  %1850 = vmatprep.subr.bf16.mxu1 %v2541_v48 }
 0x578   :  { %v1020_v32 = vadd.f32 %v2550_v50, %v1019_v31  ;;  %v1781_v33 = vpop.f32.mrb[46].mxu0  ;;  %1806 = vmatprep.mubr.bf16.mxu1 %v1054_v28 }
 0x579   :  { %v1031_v34 = vadd.f32 %v1781_v33, %v2550_v50  ;;  %v1022_v35 = vpop.f32.mrb[47].mxu0  ;;  %1807 = vmatmul.mubr.bf16.gmra.mrb[40].mxu1 %v1055_v27  ;;  %v1048_v37 = vmax.f32 %v1028_v30, 0.0 }
 0x57a   :  { %v1023_v36 = vadd.f32 %v2550_v50, %v1022_v35  ;;  %1858 = vmatpush3.bf16.msra.mxu1 %v2541_v48  ;;  %v1046_v39 = vmax.f32 %v1020_v32, 0.0 }
 0x57b   :  { %v1049_v38 = vmax.f32 %v1031_v34, 0.0  ;;  %1851 = vmatprep.subr.bf16.mxu1 %v2545_v49 }
 0x57c   :  { %v1047_v40 = vmax.f32 %v1023_v36, 0.0 }
 0x57d   :  { %v1057_v41 = vpack.c.bf16 %v1049_v38, %v1048_v37  ;;  %v1501_v38 = vld [vmem:[#allocation20] ss:$0 sm:$0xff] }
 0x57e   :  { %v1056_v42 = vpack.c.bf16 %v1047_v40, %v1046_v39  ;;  %1859 = vmatpush3.bf16.msra.mxu1 %v2545_v49 }
 0x57f   :  { %1852 = vmatprep.subr.bf16.mxu1 %v1925_v43 }
 0x580   :  { %1810 = vmatprep.mubr.bf16.mxu1 %v1056_v42 }
 0x581   :  { %1811 = vmatmul.mubr.bf16.gmra.mrb[44].mxu1 %v1057_v41 }
 0x582   :  { %1860 = vmatpush3.bf16.msra.mxu1 %v1925_v43 }
 0x583   :  { %1853 = vmatprep.subr.bf16.mxu1 %v1926_v44 }
 0x586   :  { %1861 = vmatpush3.bf16.msra.mxu1 %v1926_v44 }
 0x63c   :  { %v1800_v46 = vpop.f32.mrb[32].mxu1 }
 0x63d   :  { %v1172_v47 = vadd.f32 %v1800_v46, %v1492_v45  ;;  %v1163_v48 = vpop.f32.mrb[33].mxu1 }
 0x63e   :  { %v1164_v50 = vadd.f32 %v1492_v45, %v1163_v48  ;;  %v1801_v51 = vpop.f32.mrb[34].mxu1 }
 0x63f   :  { %v1175_v52 = vadd.f32 %v1801_v51, %v1492_v45  ;;  %v1166_v49 = vpop.f32.mrb[35].mxu1  ;;  %v1228_v54 = vmax.f32 %v1172_v47, 0.0 }
 0x640   :  { %v1167_v53 = vadd.f32 %v1492_v45, %v1166_v49  ;;  %v1226_v56 = vmax.f32 %v1164_v50, 0.0 }
 0x641   :  { %v1229_v55 = vmax.f32 %v1175_v52, 0.0 }
 0x642   :  { %v1227_v57 = vmax.f32 %v1167_v53, 0.0 }
 0x643   :  { %v1243_v58 = vpack.c.bf16 %v1229_v55, %v1228_v54 }
 0x644   :  { %v1242_v59 = vpack.c.bf16 %v1227_v57, %v1226_v56  ;;  %v1804_v61 = vpop.f32.mrb[36].mxu1 }
 0x645   :  { %v1188_v62 = vadd.f32 %v1804_v61, %v1492_v45  ;;  %v1179_v63 = vpop.f32.mrb[37].mxu1 }
 0x646   :  { %v1180_v0 = vadd.f32 %v1492_v45, %v1179_v63  ;;  %v1805_v1 = vpop.f32.mrb[38].mxu1  ;;  %1830 = vmatprep.mubr.bf16.mxu0 %v1242_v59 }
 0x647   :  { %v1191_v2 = vadd.f32 %v1805_v1, %v1492_v45  ;;  %v1182_v3 = vpop.f32.mrb[39].mxu1  ;;  %1831 = vmatmul.mubr.bf16.vlgmr.msra.gmra.mrb[48].mxu0 %v1243_v58  ;;  %v1232_v60 = vmax.f32 %v1188_v62, 0.0 }
 0x648   :  { %v1183_v6 = vadd.f32 %v1492_v45, %v1182_v3  ;;  %v1230_v8 = vmax.f32 %v1180_v0, 0.0 }
 0x649   :  { %v1233_v7 = vmax.f32 %v1191_v2, 0.0 }
 0x64a   :  { %v1231_v10 = vmax.f32 %v1183_v6, 0.0 }
 0x64b   :  { %v1245_v5 = vpack.c.bf16 %v1233_v7, %v1232_v60 }
 0x64c   :  { %v1244_v11 = vpack.c.bf16 %v1231_v10, %v1230_v8  ;;  %v1808_v12 = vpop.f32.mrb[40].mxu1 }
 0x64d   :  { %v1204_v4 = vadd.f32 %v1808_v12, %v1492_v45  ;;  %v1195_v18 = vpop.f32.mrb[41].mxu1 }
 0x64e   :  { %v1196_v19 = vadd.f32 %v1492_v45, %v1195_v18  ;;  %v1809_v16 = vpop.f32.mrb[42].mxu1  ;;  %1834 = vmatprep.mubr.bf16.mxu0 %v1244_v11 }
 0x64f   :  { %v1207_v21 = vadd.f32 %v1809_v16, %v1492_v45  ;;  %v1198_v20 = vpop.f32.mrb[43].mxu1  ;;  %1835 = vmatmul.mubr.bf16.gmra.mrb[52].mxu0 %v1245_v5  ;;  %v1236_v23 = vmax.f32 %v1204_v4, 0.0 }
 0x650   :  { %v1199_v22 = vadd.f32 %v1492_v45, %v1198_v20  ;;  %v1234_v25 = vmax.f32 %v1196_v19, 0.0 }
 0x651   :  { %v1237_v24 = vmax.f32 %v1207_v21, 0.0 }
 0x652   :  { %v1235_v26 = vmax.f32 %v1199_v22, 0.0 }
 0x653   :  { %v1247_v9 = vpack.c.bf16 %v1237_v24, %v1236_v23 }
 0x654   :  { %v1246_v13 = vpack.c.bf16 %v1235_v26, %v1234_v25  ;;  %v1812_v14 = vpop.f32.mrb[44].mxu1 }
 0x655   :  { %v1220_v15 = vadd.f32 %v1812_v14, %v1492_v45  ;;  %v1211_v17 = vpop.f32.mrb[45].mxu1 }
 0x656   :  { %v1212_v27 = vadd.f32 %v1492_v45, %v1211_v17  ;;  %v1813_v28 = vpop.f32.mrb[46].mxu1  ;;  %1838 = vmatprep.mubr.bf16.mxu1 %v1246_v13 }
 0x657   :  { %v1223_v29 = vadd.f32 %v1813_v28, %v1492_v45  ;;  %v1214_v30 = vpop.f32.mrb[47].mxu1  ;;  %1839 = vmatmul.mubr.bf16.vlgmr.msra.gmra.mrb[48].mxu1 %v1247_v9  ;;  %v1240_v32 = vmax.f32 %v1220_v15, 0.0 }
 0x658   :  { %v1215_v31 = vadd.f32 %v1492_v45, %v1214_v30  ;;  %v1238_v34 = vmax.f32 %v1212_v27, 0.0 }
 0x659   :  { %v1241_v33 = vmax.f32 %v1223_v29, 0.0 }
 0x65a   :  { %v1239_v35 = vmax.f32 %v1215_v31, 0.0 }
 0x65b   :  { %v1249_v36 = vpack.c.bf16 %v1241_v33, %v1240_v32 }
 0x65c   :  { %v1248_v37 = vpack.c.bf16 %v1239_v35, %v1238_v34 }
 0x65e   :  { %1842 = vmatprep.mubr.bf16.mxu1 %v1248_v37 }
 0x65f   :  { %1843 = vmatmul.mubr.bf16.gmra.mrb[52].mxu1 %v1249_v36 }
 0x71a   :  { %v1832_v39 = vpop.f32.mrb[48].mxu0 }
 0x71b   :  { %v1364_v40 = vadd.f32 %v1832_v39, %v1501_v38  ;;  %v1355_v41 = vpop.f32.mrb[49].mxu0 }
 0x71c   :  { %v1356_v42 = vadd.f32 %v1501_v38, %v1355_v41  ;;  %v1833_v43 = vpop.f32.mrb[50].mxu0 }
 0x71d   :  { %1420 = vst [vmem:[#allocation22 + $0x10] sm:$0xff] %v1364_v40  ;;  %v1367_v44 = vadd.f32 %v1833_v43, %v1501_v38  ;;  %v1358_v46 = vpop.f32.mrb[51].mxu0 }
 0x71e   :  { %1418 = vst [vmem:[#allocation22] sm:$0xff] %v1356_v42  ;;  %v1359_v47 = vadd.f32 %v1501_v38, %v1358_v46 }
 0x71f   :  { %1421 = vst [vmem:[#allocation22 + $0x18] sm:$0xff] %v1367_v44 }
 0x720   :  { %1419 = vst [vmem:[#allocation22 + $0x8] sm:$0xff] %v1359_v47 }
 0x722   :  { %v1836_v45 = vpop.f32.mrb[52].mxu0 }
 0x723   :  { %v1380_v48 = vadd.f32 %v1836_v45, %v1501_v38  ;;  %v1371_v50 = vpop.f32.mrb[53].mxu0 }
 0x724   :  { %v1372_v51 = vadd.f32 %v1501_v38, %v1371_v50  ;;  %v1837_v52 = vpop.f32.mrb[54].mxu0 }
 0x725   :  { %1424 = vst [vmem:[#allocation22 + $0x30] sm:$0xff] %v1380_v48  ;;  %v1383_v49 = vadd.f32 %v1837_v52, %v1501_v38  ;;  %v1374_v53 = vpop.f32.mrb[55].mxu0 }
 0x726   :  { %1422 = vst [vmem:[#allocation22 + $0x20] sm:$0xff] %v1372_v51  ;;  %v1375_v54 = vadd.f32 %v1501_v38, %v1374_v53 }
 0x727   :  { %1425 = vst [vmem:[#allocation22 + $0x38] sm:$0xff] %v1383_v49 }
 0x728   :  { %1423 = vst [vmem:[#allocation22 + $0x28] sm:$0xff] %v1375_v54 }
 0x72a   :  { %v1840_v55 = vpop.f32.mrb[48].mxu1 }
 0x72b   :  { %v1396_v56 = vadd.f32 %v1840_v55, %v1501_v38  ;;  %v1387_v57 = vpop.f32.mrb[49].mxu1 }
 0x72c   :  { %v1388_v58 = vadd.f32 %v1501_v38, %v1387_v57  ;;  %v1841_v59 = vpop.f32.mrb[50].mxu1 }
 0x72d   :  { %1428 = vst [vmem:[#allocation22 + $0x50] sm:$0xff] %v1396_v56  ;;  %v1399_v61 = vadd.f32 %v1841_v59, %v1501_v38  ;;  %v1390_v62 = vpop.f32.mrb[51].mxu1 }
 0x72e   :  { %1426 = vst [vmem:[#allocation22 + $0x40] sm:$0xff] %v1388_v58  ;;  %v1391_v63 = vadd.f32 %v1501_v38, %v1390_v62 }
 0x72f   :  { %1429 = vst [vmem:[#allocation22 + $0x58] sm:$0xff] %v1399_v61 }
 0x730   :  { %1427 = vst [vmem:[#allocation22 + $0x48] sm:$0xff] %v1391_v63 }
 0x732   :  { %v1844_v0 = vpop.f32.mrb[52].mxu1 }
 0x733   :  { %v1412_v1 = vadd.f32 %v1844_v0, %v1501_v38  ;;  %v1403_v2 = vpop.f32.mrb[53].mxu1 }
 0x734   :  { %v1404_v3 = vadd.f32 %v1501_v38, %v1403_v2  ;;  %v1845_v6 = vpop.f32.mrb[54].mxu1 }
 0x735   :  { %1432 = vst [vmem:[#allocation22 + $0x70] sm:$0xff] %v1412_v1  ;;  %v1415_v60 = vadd.f32 %v1845_v6, %v1501_v38  ;;  %v1406_v7 = vpop.f32.mrb[55].mxu1 }
 0x736   :  { %1430 = vst [vmem:[#allocation22 + $0x60] sm:$0xff] %v1404_v3  ;;  %v1407_v8 = vadd.f32 %v1501_v38, %v1406_v7 }
 0x737   :  { %1433 = vst [vmem:[#allocation22 + $0x78] sm:$0xff] %v1415_v60 }
 0x738   :  { %1431 = vst [vmem:[#allocation22 + $0x68] sm:$0xff] %v1407_v8 }
 0x739   :  { %2202 = shalt.err (!%p2199_p2)
}
 0x73a   :  { %s2203_s19 = scalar_lea.hbm %s2601_s12, 2048 }
 0x73b   :  { %p2204_p3 = scmp.ne.s32.totalorder %s2601_s12, %s2203_s19  ;;  %p2207_p4 = scmp.lt.u32.totalorder %s2203_s19, %s2601_s12 }
 0x73d   :  { %p2209_p5 = pnand %p2207_p4, %p2204_p3 }
 0x73f   :  { %2212 = shalt.err (!%p2209_p5)
}
 0x740   :  { %1445 = dma.vmem_to_hbm [thread:$0]  %s1440_s14, 2048, %s2601_s12, [#allocation4], %s2237_s9, %s2237_s9, %s2238_s22  }
 0x741   :  { %2227 = dma.done.wait [#allocation4], 2048  }
 0x742   :  { %2228 = vsyncadd [#allocation4], 4294965248 }
 0x743   :  { %1449 = vsyncpa [#allocation3], 1 }
 0x744   :  { %1450 = vsyncpa [#allocation6], 1 }
 0x745   :  { %1451 = vsyncpa [#allocation9], 1 }
 0x746   :  { %1452 = vsyncpa [#allocation12], 1 }
 0x747   :  { %1453 = vsyncpa [#allocation15], 1 }
 0x748   :  { %1454 = vsyncpa [#allocation18], 1 }
 0x749   :  { %1455 = vsyncpa [#allocation21], 1 }
 0x74a   :  { %1456 = vsyncpa [#allocation4], 1 }

</bundles_post_ra>
